<compile_context>
chip_gen: v7x
topology: tpu7x:2x2x1
jax: 0.10.0
libtpu: 0.0.40
codegen_flags: <defaults>
</compile_context>

<pallas_src>
import functools

import jax
import jax.numpy as jnp
from jax.experimental import pallas as pl
from jax.experimental.pallas import tpu as pltpu

LEAKY_SLOPE = 0.2
BN_EPS = 1e-5
LANE = 128
AFFINE_BLOCK_BYTES = 2 * 1024 * 1024   # target bytes per affine tile


def _round_up(x, m):
    return (x + m - 1) // m * m


def _largest_divisor_leq(n, cap):
    cap = max(1, min(n, cap))
    for d in range(cap, 0, -1):
        if n % d == 0:
            return d
    return 1


@functools.lru_cache(maxsize=None)
def _vmem_limit_bytes():
    # Per-generation scoped-VMEM cap (v7x only has 64 MiB physical VMEM).
    try:
        cap = int(pltpu.get_tpu_info().vmem_capacity_bytes)
        return int(min((cap * 3) // 4, 96 * 1024 * 1024))
    except Exception:
        return 48 * 1024 * 1024


def _compiler_params(semantics):
    return pltpu.CompilerParams(
        dimension_semantics=semantics,
        vmem_limit_bytes=_vmem_limit_bytes(),
    )


def _apply_act(y, act):
    if act == "leaky":
        return jnp.where(y > 0, y, LEAKY_SLOPE * y)
    if act == "sigmoid":
        # exp and the approximate reciprocal both issue to the (idle) EUP.
        return pl.reciprocal(1.0 + jnp.exp(-y), approx=True)
    return y


# ----------------------------- Pallas kernels ------------------------------

def _conv_bias_act_kernel(x_ref, w_ref, shift_ref, o_ref, acc_ref, *,
                          keq_h, keq_w, wo, act):
    """One output row (n, ho): fused window extraction + matmul + bias + act."""
    dh = pl.program_id(2)

    @pl.when(dh == 0)
    def _():
        acc_ref[...] = jnp.zeros_like(acc_ref)

    partial = None
    for dw in range(keq_w):                       # static, unrolled kernel cols
        xw = x_ref[pl.ds(dw, wo), :]              # (wo, ceq) shifted window
        wk = w_ref[dh * keq_w + dw]               # (ceq, cpad) resident weights
        d = jnp.dot(xw, wk, preferred_element_type=jnp.float32)
        partial = d if partial is None else partial + d
    acc_ref[...] += partial

    @pl.when(dh == keq_h - 1)
    def _():
        y = acc_ref[...] + shift_ref[...]         # f32 epilogue
        o_ref[...] = _apply_act(y, act).astype(o_ref.dtype)


def _conv_bnstats_kernel(x_ref, w_ref, y_ref, sum_ref, ssq_ref, acc_ref, *,
                         keq_h, keq_w, wo):
    """Conv (no bias) + fused per-row per-channel sum / sum-of-squares."""
    dh = pl.program_id(2)

    @pl.when(dh == 0)
    def _():
        acc_ref[...] = jnp.zeros_like(acc_ref)

    partial = None
    for dw in range(keq_w):
        xw = x_ref[pl.ds(dw, wo), :]
        wk = w_ref[dh * keq_w + dw]
        d = jnp.dot(xw, wk, preferred_element_type=jnp.float32)
        partial = d if partial is None else partial + d
    acc_ref[...] += partial

    @pl.when(dh == keq_h - 1)
    def _():
        y = acc_ref[...]                          # (wo, cpad) f32
        y_ref[...] = y.astype(y_ref.dtype)
        sum_ref[...] = jnp.sum(y, axis=0, keepdims=True)
        ssq_ref[...] = jnp.sum(y * y, axis=0, keepdims=True)


def _affine_leaky_kernel(y_ref, scale_ref, shift_ref, o_ref):
    y = y_ref[...].astype(jnp.float32)            # (t_ho, wo, cpad)
    y = y * scale_ref[...] + shift_ref[...]       # per-channel affine (f32)
    o_ref[...] = jnp.where(y > 0, y, LEAKY_SLOPE * y).astype(o_ref.dtype)


# ------------------------------ kernel wrappers -----------------------------

def _affine_leaky(y, scale, shift):
    n, ho, wo, cpad = y.shape
    cap = max(1, AFFINE_BLOCK_BYTES // max(1, wo * cpad * 2))
    t_ho = _largest_divisor_leq(ho, cap)          # big elementwise tiles
    return pl.pallas_call(
        _affine_leaky_kernel,
        out_shape=jax.ShapeDtypeStruct((n, ho, wo, cpad), jnp.bfloat16),
        grid=(n, ho // t_ho),
        in_specs=[
            pl.BlockSpec((None, t_ho, wo, cpad), lambda ni, hi: (ni, hi, 0, 0)),
            pl.BlockSpec((1, cpad), lambda ni, hi: (0, 0)),
            pl.BlockSpec((1, cpad), lambda ni, hi: (0, 0)),
        ],
        out_specs=pl.BlockSpec((None, t_ho, wo, cpad), lambda ni, hi: (ni, hi, 0, 0)),
        compiler_params=_compiler_params(("parallel", "parallel")),
    )(y, scale, shift)


def conv_layer(x_nhwc, w_oihw, *, stride, bias=None, bn=False,
               gamma=None, beta=None, act="leaky"):
    cout, cin, k, _ = w_oihw.shape
    assert k == 4
    n, h, w, cin_x = x_nhwc.shape
    assert cin_x == cin
    cpad = _round_up(cout, LANE)                  # lane-dense output channels

    # Conv padding=1; activations travel as bf16.
    x_p = jnp.pad(x_nhwc.astype(jnp.bfloat16), ((0, 0), (1, 1), (1, 1), (0, 0)))
    w_t = jnp.transpose(w_oihw, (2, 3, 1, 0))     # (kh, kw, cin, cout)

    if stride == 2:
        assert h % 2 == 0 and w % 2 == 0
        ho, wo = h // 2, w // 2
        hq, wq = ho + 1, wo + 1
        # Space-to-depth: stride-2 4x4 conv == stride-1 2x2 conv over 4*cin ch.
        xq = (x_p.reshape(n, hq, 2, wq, 2, cin)
                  .transpose(0, 1, 3, 2, 4, 5)
                  .reshape(n, hq, wq, 4 * cin))
        keq_h = keq_w = 2
        ceq = 4 * cin
        weq = (w_t.reshape(2, 2, 2, 2, cin, cout)
                   .transpose(0, 2, 1, 3, 4, 5)
                   .reshape(keq_h * keq_w, ceq, cout))
    else:
        ho, wo = h - 1, w - 1
        hq, wq = h + 2, w + 2
        xq = x_p
        keq_h = keq_w = 4
        ceq = cin
        weq = w_t.reshape(keq_h * keq_w, ceq, cout)

    weq = jnp.pad(weq, ((0, 0), (0, 0), (0, cpad - cout))).astype(jnp.bfloat16)

    grid = (n, ho, keq_h)
    sems = ("parallel", "parallel", "arbitrary")
    x_spec = pl.BlockSpec((None, None, wq, ceq),
                          lambda ni, hi, ki: (ni, hi + ki, 0, 0))
    w_spec = pl.BlockSpec((keq_h * keq_w, ceq, cpad),
                          lambda ni, hi, ki: (0, 0, 0))      # resident weights
    y_spec = pl.BlockSpec((None, None, wo, cpad),
                          lambda ni, hi, ki: (ni, hi, 0, 0))
    stat_spec = pl.BlockSpec((None, None, 1, cpad),
                             lambda ni, hi, ki: (ni, hi, 0, 0))
    vec_spec = pl.BlockSpec((1, cpad), lambda ni, hi, ki: (0, 0))
    scratch = [pltpu.VMEM((wo, cpad), jnp.float32)]          # f32 accumulator

    flops = 2 * n * ho * wo * (keq_h * keq_w * ceq) * cpad
    bytes_est = int(xq.size * 2 * keq_h + weq.size * 2 + n * ho * wo * cpad * 2)

    if not bn:
        shift = jnp.pad(bias, (0, cpad - cout)).reshape(1, cpad).astype(jnp.float32)
        kern = functools.partial(_conv_bias_act_kernel,
                                 keq_h=keq_h, keq_w=keq_w, wo=wo, act=act)
        return pl.pallas_call(
            kern,
            out_shape=jax.ShapeDtypeStruct((n, ho, wo, cpad), jnp.bfloat16),
            grid=grid,
            in_specs=[x_spec, w_spec, vec_spec],
            out_specs=y_spec,
            scratch_shapes=scratch,
            compiler_params=_compiler_params(sems),
            cost_estimate=pl.CostEstimate(
                flops=flops,
                transcendentals=(n * ho * wo * cpad if act == "sigmoid" else 0),
                bytes_accessed=bytes_est),
        )(xq, weq, shift)

    kern = functools.partial(_conv_bnstats_kernel,
                             keq_h=keq_h, keq_w=keq_w, wo=wo)
    y_raw, psum, pssq = pl.pallas_call(
        kern,
        out_shape=(
            jax.ShapeDtypeStruct((n, ho, wo, cpad), jnp.bfloat16),
            jax.ShapeDtypeStruct((n, ho, 1, cpad), jnp.float32),
            jax.ShapeDtypeStruct((n, ho, 1, cpad), jnp.float32),
        ),
        grid=grid,
        in_specs=[x_spec, w_spec],
        out_specs=(y_spec, stat_spec, stat_spec),
        scratch_shapes=scratch,
        compiler_params=_compiler_params(sems),
        cost_estimate=pl.CostEstimate(flops=flops, transcendentals=0,
                                      bytes_accessed=bytes_est),
    )(xq, weq)

    # Tiny (N, Ho, 1, Cpad) partials -> training-mode batch statistics in JAX.
    m = n * ho * wo
    total = jnp.sum(psum, axis=(0, 1, 2))
    total_sq = jnp.sum(pssq, axis=(0, 1, 2))
    mean = total / m
    # Biased variance E[x^2]-E[x]^2 (PyTorch train-mode normalization); the
    # clamp guards f32 cancellation.
    # TODO(synk): a shifted/two-pass variance would be needed for exact parity
    #             when |mean| >> std.
    var = jnp.maximum(total_sq / m - mean * mean, 0.0)
    gamma_p = jnp.pad(gamma, (0, cpad - cout)).astype(jnp.float32)
    beta_p = jnp.pad(beta, (0, cpad - cout)).astype(jnp.float32)
    scale = gamma_p * jax.lax.rsqrt(var + BN_EPS)
    shift = beta_p - mean * scale
    return _affine_leaky(y_raw, scale.reshape(1, cpad), shift.reshape(1, cpad))


# ------------------------------- model --------------------------------------

def init_params(key, in_channels=3):
    specs = [
        # (cin, cout, has_bias, has_bn)
        (in_channels, 64, True, False),
        (64, 128, False, True),
        (128, 256, False, True),
        (256, 512, False, True),
        (512, 1, True, False),
    ]
    params = []
    for cin, cout, has_bias, has_bn in specs:
        key, kw, kb = jax.random.split(key, 3)
        fan_in = cin * 16
        w = jax.random.normal(kw, (cout, cin, 4, 4), jnp.float32) / jnp.sqrt(fan_in)
        params.append({
            "w": w,
            "b": (jax.random.normal(kb, (cout,), jnp.float32) * 0.01
                  if has_bias else None),
            "gamma": jnp.ones((cout,), jnp.float32) if has_bn else None,
            "beta": jnp.zeros((cout,), jnp.float32) if has_bn else None,
        })
    return params


def patch_discriminator(x_nchw, params):
    x = jnp.transpose(x_nchw, (0, 2, 3, 1))          # NCHW -> NHWC
    p = params
    y = conv_layer(x, p[0]["w"], stride=2, bias=p[0]["b"], act="leaky")
    # Layer-1 output is channel-padded 64->128; the slice fuses into the next
    # layer's pad/space-to-depth pass.
    y = conv_layer(y[..., :64], p[1]["w"], stride=2, bn=True,
                   gamma=p[1]["gamma"], beta=p[1]["beta"])
    y = conv_layer(y, p[2]["w"], stride=2, bn=True,
                   gamma=p[2]["gamma"], beta=p[2]["beta"])
    y = conv_layer(y, p[3]["w"], stride=1, bn=True,
                   gamma=p[3]["gamma"], beta=p[3]["beta"])
    y = conv_layer(y, p[4]["w"], stride=1, bias=p[4]["b"], act="sigmoid")
    out = y[..., :1].astype(jnp.float32)             # drop 1->128 channel pad
    return jnp.transpose(out, (0, 3, 1, 2))          # NHWC -> NCHW


if __name__ == "__main__":
    key = jax.random.PRNGKey(0)
    kx, kp = jax.random.split(key)
    # 32x32 is the minimum-ish spatial size that survives all five conv layers
    # (32 -> 16 -> 8 -> 4 -> 3 -> 2).
    x = jax.random.normal(kx, (2, 3, 32, 32), jnp.float32)
    params = init_params(kp, in_channels=3)

    out = jax.jit(patch_discriminator)(x, params)
    out = jax.block_until_ready(out)

    assert out.shape == (2, 1, 2, 2), out.shape
    assert bool(jnp.all(jnp.isfinite(out)))
    # Sigmoid range (tolerance for bf16 storage + approximate EUP reciprocal).
    assert bool(jnp.all((out >= -1e-2) & (out <= 1.0 + 1e-2)))
    print("KERNEL_OK")
</pallas_src>

<mosaic_0001>
module attributes {stable_mosaic.version = 11 : i64} {
  func.func @_conv_bias_act_kernel(%arg0: i32, %arg1: i32, %arg2: i32, %arg3: memref<1x1x17x12xbf16, #tpu.memory_space<vmem>>, %arg4: memref<4x12x128xbf16, #tpu.memory_space<vmem>>, %arg5: memref<1x128xf32, #tpu.memory_space<vmem>>, %arg6: memref<1x1x16x128xbf16, #tpu.memory_space<vmem>>, %arg7: memref<16x128xf32, #tpu.memory_space<vmem>>) attributes {dimension_semantics = [#tpu.dimension_semantics<parallel>, #tpu.dimension_semantics<parallel>, #tpu.dimension_semantics<arbitrary>], iteration_bounds = array<i64: 2, 16, 2>, scalar_prefetch = 0 : i64, scratch_operands = 1 : i64, tpu.core_type = #tpu.core_type<tc>, window_params = [{transform_indices = @transform_0, window_bounds = array<i64: 1, 1, 17, 12>}, {pipeline_mode = #tpu.pipeline_mode<synchronous>, transform_indices = @transform_1, window_bounds = array<i64: 4, 12, 128>}, {pipeline_mode = #tpu.pipeline_mode<synchronous>, transform_indices = @transform_2, window_bounds = array<i64: 1, 128>}, {transform_indices = @transform_3, window_bounds = array<i64: 1, 1, 16, 128>}]} {
    %c0_i32 = arith.constant 0 : i32
    %0 = arith.cmpi eq, %arg2, %c0_i32 : i32
    %1 = arith.extui %0 : i1 to i32
    %c0_i32_0 = arith.constant 0 : i32
    %2 = arith.cmpi ne, %1, %c0_i32_0 : i32
    scf.if %2 {
      %cst_20 = arith.constant 0.000000e+00 : f32
      %26 = vector.broadcast %cst_20 : f32 to vector<16x128xf32>
      %c0_21 = arith.constant 0 : index
      %c0_22 = arith.constant 0 : index
      %27 = vector.load %arg7[%c0_21, %c0_22] : memref<16x128xf32, #tpu.memory_space<vmem>>, vector<16x128xf32>
      tpu.vector_store %arg7[%c0_21, %c0_22], %26 {strides = array<i32>} : memref<16x128xf32, #tpu.memory_space<vmem>>, vector<16x128xf32>,
    } else {
    }
    %c0 = arith.constant 0 : index
    %c0_1 = arith.constant 0 : index
    %c0_2 = arith.constant 0 : index
    %c0_3 = arith.constant 0 : index
    %3 = vector.load %arg3[%c0, %c0_1, %c0_2, %c0_3] : memref<1x1x17x12xbf16, #tpu.memory_space<vmem>>, vector<1x1x16x12xbf16>
    %4 = vector.shape_cast %3 : vector<1x1x16x12xbf16> to vector<16x12xbf16>
    %c2_i32 = arith.constant 2 : i32
    %5 = arith.muli %arg2, %c2_i32 : i32
    %c0_i32_4 = arith.constant 0 : i32
    %6 = arith.addi %5, %c0_i32_4 : i32
    %7 = arith.index_cast %6 : i32 to index
    %c0_5 = arith.constant 0 : index
    %c0_6 = arith.constant 0 : index
    %8 = vector.load %arg4[%7, %c0_5, %c0_6] : memref<4x12x128xbf16, #tpu.memory_space<vmem>>, vector<1x12x128xbf16>
    %9 = vector.shape_cast %8 : vector<1x12x128xbf16> to vector<12x128xbf16>
    %cst = arith.constant dense<0.000000e+00> : vector<16x128xf32>
    %10 = tpu.matmul %4, %9, %cst {dimension_numbers = #tpu.dot_dimension_numbers<[1], [0], [0], [1], [0, 0, 1, 1], [], []>} : vector<16x12xbf16>, vector<12x128xbf16>, vector<16x128xf32> -> vector<16x128xf32>
    %c0_7 = arith.constant 0 : index
    %c0_8 = arith.constant 0 : index
    %c1 = arith.constant 1 : index
    %c0_9 = arith.constant 0 : index
    %11 = vector.load %arg3[%c0_7, %c0_8, %c1, %c0_9] : memref<1x1x17x12xbf16, #tpu.memory_space<vmem>>, vector<1x1x16x12xbf16>
    %12 = vector.shape_cast %11 : vector<1x1x16x12xbf16> to vector<16x12xbf16>
    %c2_i32_10 = arith.constant 2 : i32
    %13 = arith.muli %arg2, %c2_i32_10 : i32
    %c1_i32 = arith.constant 1 : i32
    %14 = arith.addi %13, %c1_i32 : i32
    %15 = arith.index_cast %14 : i32 to index
    %c0_11 = arith.constant 0 : index
    %c0_12 = arith.constant 0 : index
    %16 = vector.load %arg4[%15, %c0_11, %c0_12] : memref<4x12x128xbf16, #tpu.memory_space<vmem>>, vector<1x12x128xbf16>
    %17 = vector.shape_cast %16 : vector<1x12x128xbf16> to vector<12x128xbf16>
    %cst_13 = arith.constant dense<0.000000e+00> : vector<16x128xf32>
    %18 = tpu.matmul %12, %17, %cst_13 {dimension_numbers = #tpu.dot_dimension_numbers<[1], [0], [0], [1], [0, 0, 1, 1], [], []>} : vector<16x12xbf16>, vector<12x128xbf16>, vector<16x128xf32> -> vector<16x128xf32>
    %19 = arith.addf %10, %18 : vector<16x128xf32>
    %c0_14 = arith.constant 0 : index
    %c0_15 = arith.constant 0 : index
    %20 = vector.load %arg7[%c0_14, %c0_15] : memref<16x128xf32, #tpu.memory_space<vmem>>, vector<16x128xf32>
    %21 = arith.addf %20, %19 : vector<16x128xf32>
    %c0_16 = arith.constant 0 : index
    %c0_17 = arith.constant 0 : index
    %22 = vector.load %arg7[%c0_16, %c0_17] : memref<16x128xf32, #tpu.memory_space<vmem>>, vector<16x128xf32>
    tpu.vector_store %arg7[%c0_16, %c0_17], %21 {strides = array<i32>} : memref<16x128xf32, #tpu.memory_space<vmem>>, vector<16x128xf32>,
    %c1_i32_18 = arith.constant 1 : i32
    %23 = arith.cmpi eq, %arg2, %c1_i32_18 : i32
    %24 = arith.extui %23 : i1 to i32
    %c0_i32_19 = arith.constant 0 : i32
    %25 = arith.cmpi ne, %24, %c0_i32_19 : i32
    scf.if %25 {
      %c0_20 = arith.constant 0 : index
      %c0_21 = arith.constant 0 : index
      %26 = vector.load %arg7[%c0_20, %c0_21] : memref<16x128xf32, #tpu.memory_space<vmem>>, vector<16x128xf32>
      %c0_22 = arith.constant 0 : index
      %c0_23 = arith.constant 0 : index
      %27 = vector.load %arg5[%c0_22, %c0_23] : memref<1x128xf32, #tpu.memory_space<vmem>>, vector<1x128xf32>
      %28 = vector.broadcast %27 : vector<1x128xf32> to vector<16x128xf32>
      %29 = arith.addf %26, %28 : vector<16x128xf32>
      %cst_24 = arith.constant 0.000000e+00 : f32
      %30 = vector.broadcast %cst_24 : f32 to vector<16x128xf32>
      %31 = arith.cmpf ogt, %29, %30 : vector<16x128xf32>
      %cst_25 = arith.constant 2.000000e-01 : f32
      %32 = vector.broadcast %cst_25 : f32 to vector<16x128xf32>
      %33 = arith.mulf %32, %29 : vector<16x128xf32>
      %34 = arith.select %31, %29, %33 : vector<16x128xi1>, vector<16x128xf32>
      %35 = arith.truncf %34 : vector<16x128xf32> to vector<16x128xbf16>
      %c0_26 = arith.constant 0 : index
      %c0_27 = arith.constant 0 : index
      %c0_28 = arith.constant 0 : index
      %c0_29 = arith.constant 0 : index
      %36 = vector.load %arg6[%c0_26, %c0_27, %c0_28, %c0_29] : memref<1x1x16x128xbf16, #tpu.memory_space<vmem>>, vector<1x1x16x128xbf16>
      %37 = vector.shape_cast %36 : vector<1x1x16x128xbf16> to vector<16x128xbf16>
      %38 = vector.shape_cast %35 : vector<16x128xbf16> to vector<1x1x16x128xbf16>
      tpu.vector_store %arg6[%c0_26, %c0_27, %c0_28, %c0_29], %38 {strides = array<i32>} : memref<1x1x16x128xbf16, #tpu.memory_space<vmem>>, vector<1x1x16x128xbf16>,
    } else {
    }
    return
  }
  func.func @transform_0(%arg0: i32, %arg1: i32, %arg2: i32) -> (i32, i32, i32, i32) {
    %0 = arith.addi %arg1, %arg2 : i32
    %c0_i32 = arith.constant 0 : i32
    %c0_i32_0 = arith.constant 0 : i32
    %c0_i32_1 = arith.constant 0 : i32
    return %arg0, %0, %c0_i32, %c0_i32_0 : i32, i32, i32, i32
  }
  func.func @transform_1(%arg0: i32, %arg1: i32, %arg2: i32) -> (i32, i32, i32) {
    %c0_i32 = arith.constant 0 : i32
    %c0_i32_0 = arith.constant 0 : i32
    %c0_i32_1 = arith.constant 0 : i32
    %c0_i32_2 = arith.constant 0 : i32
    return %c0_i32, %c0_i32_0, %c0_i32_1 : i32, i32, i32
  }
  func.func @transform_2(%arg0: i32, %arg1: i32, %arg2: i32) -> (i32, i32) {
    %c0_i32 = arith.constant 0 : i32
    %c0_i32_0 = arith.constant 0 : i32
    %c0_i32_1 = arith.constant 0 : i32
    return %c0_i32, %c0_i32_0 : i32, i32
  }
  func.func @transform_3(%arg0: i32, %arg1: i32, %arg2: i32) -> (i32, i32, i32, i32) {
    %c0_i32 = arith.constant 0 : i32
    %c0_i32_0 = arith.constant 0 : i32
    %c0_i32_1 = arith.constant 0 : i32
    return %arg0, %arg1, %c0_i32, %c0_i32_0 : i32, i32, i32, i32
  }
}

module attributes {stable_mosaic.version = 11 : i64} {
  func.func @_conv_bnstats_kernel(%arg0: i32, %arg1: i32, %arg2: i32, %arg3: memref<1x1x9x256xbf16, #tpu.memory_space<vmem>>, %arg4: memref<4x256x128xbf16, #tpu.memory_space<vmem>>, %arg5: memref<1x1x8x128xbf16, #tpu.memory_space<vmem>>, %arg6: memref<1x1x1x128xf32, #tpu.memory_space<vmem>>, %arg7: memref<1x1x1x128xf32, #tpu.memory_space<vmem>>, %arg8: memref<8x128xf32, #tpu.memory_space<vmem>>) attributes {dimension_semantics = [#tpu.dimension_semantics<parallel>, #tpu.dimension_semantics<parallel>, #tpu.dimension_semantics<arbitrary>], iteration_bounds = array<i64: 2, 8, 2>, scalar_prefetch = 0 : i64, scratch_operands = 1 : i64, tpu.core_type = #tpu.core_type<tc>, window_params = [{transform_indices = @transform_0, window_bounds = array<i64: 1, 1, 9, 256>}, {pipeline_mode = #tpu.pipeline_mode<synchronous>, transform_indices = @transform_1, window_bounds = array<i64: 4, 256, 128>}, {transform_indices = @transform_2, window_bounds = array<i64: 1, 1, 8, 128>}, {transform_indices = @transform_3, window_bounds = array<i64: 1, 1, 1, 128>}, {transform_indices = @transform_4, window_bounds = array<i64: 1, 1, 1, 128>}]} {
    %c0_i32 = arith.constant 0 : i32
    %0 = arith.cmpi eq, %arg2, %c0_i32 : i32
    %1 = arith.extui %0 : i1 to i32
    %c0_i32_0 = arith.constant 0 : i32
    %2 = arith.cmpi ne, %1, %c0_i32_0 : i32
    scf.if %2 {
      %cst_20 = arith.constant 0.000000e+00 : f32
      %26 = vector.broadcast %cst_20 : f32 to vector<8x128xf32>
      %c0_21 = arith.constant 0 : index
      %c0_22 = arith.constant 0 : index
      %27 = vector.load %arg8[%c0_21, %c0_22] : memref<8x128xf32, #tpu.memory_space<vmem>>, vector<8x128xf32>
      tpu.vector_store %arg8[%c0_21, %c0_22], %26 {strides = array<i32>} : memref<8x128xf32, #tpu.memory_space<vmem>>, vector<8x128xf32>,
    } else {
    }
    %c0 = arith.constant 0 : index
    %c0_1 = arith.constant 0 : index
    %c0_2 = arith.constant 0 : index
    %c0_3 = arith.constant 0 : index
    %3 = vector.load %arg3[%c0, %c0_1, %c0_2, %c0_3] : memref<1x1x9x256xbf16, #tpu.memory_space<vmem>>, vector<1x1x8x256xbf16>
    %4 = vector.shape_cast %3 : vector<1x1x8x256xbf16> to vector<8x256xbf16>
    %c2_i32 = arith.constant 2 : i32
    %5 = arith.muli %arg2, %c2_i32 : i32
    %c0_i32_4 = arith.constant 0 : i32
    %6 = arith.addi %5, %c0_i32_4 : i32
    %7 = arith.index_cast %6 : i32 to index
    %c0_5 = arith.constant 0 : index
    %c0_6 = arith.constant 0 : index
    %8 = vector.load %arg4[%7, %c0_5, %c0_6] : memref<4x256x128xbf16, #tpu.memory_space<vmem>>, vector<1x256x128xbf16>
    %9 = vector.shape_cast %8 : vector<1x256x128xbf16> to vector<256x128xbf16>
    %cst = arith.constant dense<0.000000e+00> : vector<8x128xf32>
    %10 = tpu.matmul %4, %9, %cst {dimension_numbers = #tpu.dot_dimension_numbers<[1], [0], [0], [1], [0, 0, 1, 1], [], []>} : vector<8x256xbf16>, vector<256x128xbf16>, vector<8x128xf32> -> vector<8x128xf32>
    %c0_7 = arith.constant 0 : index
    %c0_8 = arith.constant 0 : index
    %c1 = arith.constant 1 : index
    %c0_9 = arith.constant 0 : index
    %11 = vector.load %arg3[%c0_7, %c0_8, %c1, %c0_9] : memref<1x1x9x256xbf16, #tpu.memory_space<vmem>>, vector<1x1x8x256xbf16>
    %12 = vector.shape_cast %11 : vector<1x1x8x256xbf16> to vector<8x256xbf16>
    %c2_i32_10 = arith.constant 2 : i32
    %13 = arith.muli %arg2, %c2_i32_10 : i32
    %c1_i32 = arith.constant 1 : i32
    %14 = arith.addi %13, %c1_i32 : i32
    %15 = arith.index_cast %14 : i32 to index
    %c0_11 = arith.constant 0 : index
    %c0_12 = arith.constant 0 : index
    %16 = vector.load %arg4[%15, %c0_11, %c0_12] : memref<4x256x128xbf16, #tpu.memory_space<vmem>>, vector<1x256x128xbf16>
    %17 = vector.shape_cast %16 : vector<1x256x128xbf16> to vector<256x128xbf16>
    %cst_13 = arith.constant dense<0.000000e+00> : vector<8x128xf32>
    %18 = tpu.matmul %12, %17, %cst_13 {dimension_numbers = #tpu.dot_dimension_numbers<[1], [0], [0], [1], [0, 0, 1, 1], [], []>} : vector<8x256xbf16>, vector<256x128xbf16>, vector<8x128xf32> -> vector<8x128xf32>
    %19 = arith.addf %10, %18 : vector<8x128xf32>
    %c0_14 = arith.constant 0 : index
    %c0_15 = arith.constant 0 : index
    %20 = vector.load %arg8[%c0_14, %c0_15] : memref<8x128xf32, #tpu.memory_space<vmem>>, vector<8x128xf32>
    %21 = arith.addf %20, %19 : vector<8x128xf32>
    %c0_16 = arith.constant 0 : index
    %c0_17 = arith.constant 0 : index
    %22 = vector.load %arg8[%c0_16, %c0_17] : memref<8x128xf32, #tpu.memory_space<vmem>>, vector<8x128xf32>
    tpu.vector_store %arg8[%c0_16, %c0_17], %21 {strides = array<i32>} : memref<8x128xf32, #tpu.memory_space<vmem>>, vector<8x128xf32>,
    %c1_i32_18 = arith.constant 1 : i32
    %23 = arith.cmpi eq, %arg2, %c1_i32_18 : i32
    %24 = arith.extui %23 : i1 to i32
    %c0_i32_19 = arith.constant 0 : i32
    %25 = arith.cmpi ne, %24, %c0_i32_19 : i32
    scf.if %25 {
      %c0_20 = arith.constant 0 : index
      %c0_21 = arith.constant 0 : index
      %26 = vector.load %arg8[%c0_20, %c0_21] : memref<8x128xf32, #tpu.memory_space<vmem>>, vector<8x128xf32>
      %27 = arith.truncf %26 : vector<8x128xf32> to vector<8x128xbf16>
      %c0_22 = arith.constant 0 : index
      %c0_23 = arith.constant 0 : index
      %c0_24 = arith.constant 0 : index
      %c0_25 = arith.constant 0 : index
      %28 = vector.load %arg5[%c0_22, %c0_23, %c0_24, %c0_25] : memref<1x1x8x128xbf16, #tpu.memory_space<vmem>>, vector<1x1x8x128xbf16>
      %29 = vector.shape_cast %28 : vector<1x1x8x128xbf16> to vector<8x128xbf16>
      %30 = vector.shape_cast %27 : vector<8x128xbf16> to vector<1x1x8x128xbf16>
      tpu.vector_store %arg5[%c0_22, %c0_23, %c0_24, %c0_25], %30 {strides = array<i32>} : memref<1x1x8x128xbf16, #tpu.memory_space<vmem>>, vector<1x1x8x128xbf16>,
      %cst_26 = arith.constant dense<0.000000e+00> : vector<128xf32>
      %31 = vector.multi_reduction <add>, %26, %cst_26 [0] : vector<8x128xf32> to vector<128xf32>
      %32 = vector.shape_cast %31 : vector<128xf32> to vector<1x128xf32>
      %c0_27 = arith.constant 0 : index
      %c0_28 = arith.constant 0 : index
      %c0_29 = arith.constant 0 : index
      %c0_30 = arith.constant 0 : index
      %33 = vector.load %arg6[%c0_27, %c0_28, %c0_29, %c0_30] : memref<1x1x1x128xf32, #tpu.memory_space<vmem>>, vector<1x1x1x128xf32>
      %34 = vector.shape_cast %33 : vector<1x1x1x128xf32> to vector<1x128xf32>
      %35 = vector.shape_cast %32 : vector<1x128xf32> to vector<1x1x1x128xf32>
      tpu.vector_store %arg6[%c0_27, %c0_28, %c0_29, %c0_30], %35 {strides = array<i32>} : memref<1x1x1x128xf32, #tpu.memory_space<vmem>>, vector<1x1x1x128xf32>,
      %36 = arith.mulf %26, %26 : vector<8x128xf32>
      %cst_31 = arith.constant dense<0.000000e+00> : vector<128xf32>
      %37 = vector.multi_reduction <add>, %36, %cst_31 [0] : vector<8x128xf32> to vector<128xf32>
      %38 = vector.shape_cast %37 : vector<128xf32> to vector<1x128xf32>
      %c0_32 = arith.constant 0 : index
      %c0_33 = arith.constant 0 : index
      %c0_34 = arith.constant 0 : index
      %c0_35 = arith.constant 0 : index
      %39 = vector.load %arg7[%c0_32, %c0_33, %c0_34, %c0_35] : memref<1x1x1x128xf32, #tpu.memory_space<vmem>>, vector<1x1x1x128xf32>
      %40 = vector.shape_cast %39 : vector<1x1x1x128xf32> to vector<1x128xf32>
      %41 = vector.shape_cast %38 : vector<1x128xf32> to vector<1x1x1x128xf32>
      tpu.vector_store %arg7[%c0_32, %c0_33, %c0_34, %c0_35], %41 {strides = array<i32>} : memref<1x1x1x128xf32, #tpu.memory_space<vmem>>, vector<1x1x1x128xf32>,
    } else {
    }
    return
  }
  func.func @transform_0(%arg0: i32, %arg1: i32, %arg2: i32) -> (i32, i32, i32, i32) {
    %0 = arith.addi %arg1, %arg2 : i32
    %c0_i32 = arith.constant 0 : i32
    %c0_i32_0 = arith.constant 0 : i32
    %c0_i32_1 = arith.constant 0 : i32
    return %arg0, %0, %c0_i32, %c0_i32_0 : i32, i32, i32, i32
  }
  func.func @transform_1(%arg0: i32, %arg1: i32, %arg2: i32) -> (i32, i32, i32) {
    %c0_i32 = arith.constant 0 : i32
    %c0_i32_0 = arith.constant 0 : i32
    %c0_i32_1 = arith.constant 0 : i32
    %c0_i32_2 = arith.constant 0 : i32
    return %c0_i32, %c0_i32_0, %c0_i32_1 : i32, i32, i32
  }
  func.func @transform_2(%arg0: i32, %arg1: i32, %arg2: i32) -> (i32, i32, i32, i32) {
    %c0_i32 = arith.constant 0 : i32
    %c0_i32_0 = arith.constant 0 : i32
    %c0_i32_1 = arith.constant 0 : i32
    return %arg0, %arg1, %c0_i32, %c0_i32_0 : i32, i32, i32, i32
  }
  func.func @transform_3(%arg0: i32, %arg1: i32, %arg2: i32) -> (i32, i32, i32, i32) {
    %c0_i32 = arith.constant 0 : i32
    %c0_i32_0 = arith.constant 0 : i32
    %c0_i32_1 = arith.constant 0 : i32
    return %arg0, %arg1, %c0_i32, %c0_i32_0 : i32, i32, i32, i32
  }
  func.func @transform_4(%arg0: i32, %arg1: i32, %arg2: i32) -> (i32, i32, i32, i32) {
    %c0_i32 = arith.constant 0 : i32
    %c0_i32_0 = arith.constant 0 : i32
    %c0_i32_1 = arith.constant 0 : i32
    return %arg0, %arg1, %c0_i32, %c0_i32_0 : i32, i32, i32, i32
  }
}

module attributes {stable_mosaic.version = 11 : i64} {
  func.func @_affine_leaky_kernel(%arg0: i32, %arg1: i32, %arg2: memref<1x8x8x128xbf16, #tpu.memory_space<vmem>>, %arg3: memref<1x128xf32, #tpu.memory_space<vmem>>, %arg4: memref<1x128xf32, #tpu.memory_space<vmem>>, %arg5: memref<1x8x8x128xbf16, #tpu.memory_space<vmem>>) attributes {dimension_semantics = [#tpu.dimension_semantics<parallel>, #tpu.dimension_semantics<parallel>], iteration_bounds = array<i64: 2, 1>, scalar_prefetch = 0 : i64, scratch_operands = 0 : i64, tpu.core_type = #tpu.core_type<tc>, window_params = [{transform_indices = @transform_0, window_bounds = array<i64: 1, 8, 8, 128>}, {pipeline_mode = #tpu.pipeline_mode<synchronous>, transform_indices = @transform_1, window_bounds = array<i64: 1, 128>}, {pipeline_mode = #tpu.pipeline_mode<synchronous>, transform_indices = @transform_2, window_bounds = array<i64: 1, 128>}, {transform_indices = @transform_3, window_bounds = array<i64: 1, 8, 8, 128>}]} {
    %c0 = arith.constant 0 : index
    %c0_0 = arith.constant 0 : index
    %c0_1 = arith.constant 0 : index
    %c0_2 = arith.constant 0 : index
    %0 = vector.load %arg2[%c0, %c0_0, %c0_1, %c0_2] : memref<1x8x8x128xbf16, #tpu.memory_space<vmem>>, vector<1x8x8x128xbf16>
    %1 = vector.shape_cast %0 : vector<1x8x8x128xbf16> to vector<8x8x128xbf16>
    %2 = arith.extf %1 : vector<8x8x128xbf16> to vector<8x8x128xf32>
    %c0_3 = arith.constant 0 : index
    %c0_4 = arith.constant 0 : index
    %3 = vector.load %arg3[%c0_3, %c0_4] : memref<1x128xf32, #tpu.memory_space<vmem>>, vector<1x128xf32>
    %4 = vector.shape_cast %3 : vector<1x128xf32> to vector<1x1x128xf32>
    %5 = vector.broadcast %4 : vector<1x1x128xf32> to vector<8x8x128xf32>
    %6 = arith.mulf %2, %5 : vector<8x8x128xf32>
    %c0_5 = arith.constant 0 : index
    %c0_6 = arith.constant 0 : index
    %7 = vector.load %arg4[%c0_5, %c0_6] : memref<1x128xf32, #tpu.memory_space<vmem>>, vector<1x128xf32>
    %8 = vector.shape_cast %7 : vector<1x128xf32> to vector<1x1x128xf32>
    %9 = vector.broadcast %8 : vector<1x1x128xf32> to vector<8x8x128xf32>
    %10 = arith.addf %6, %9 : vector<8x8x128xf32>
    %cst = arith.constant 0.000000e+00 : f32
    %11 = vector.broadcast %cst : f32 to vector<8x8x128xf32>
    %12 = arith.cmpf ogt, %10, %11 : vector<8x8x128xf32>
    %cst_7 = arith.constant 2.000000e-01 : f32
    %13 = vector.broadcast %cst_7 : f32 to vector<8x8x128xf32>
    %14 = arith.mulf %13, %10 : vector<8x8x128xf32>
    %15 = arith.select %12, %10, %14 : vector<8x8x128xi1>, vector<8x8x128xf32>
    %16 = arith.truncf %15 : vector<8x8x128xf32> to vector<8x8x128xbf16>
    %c0_8 = arith.constant 0 : index
    %c0_9 = arith.constant 0 : index
    %c0_10 = arith.constant 0 : index
    %c0_11 = arith.constant 0 : index
    %17 = vector.load %arg5[%c0_8, %c0_9, %c0_10, %c0_11] : memref<1x8x8x128xbf16, #tpu.memory_space<vmem>>, vector<1x8x8x128xbf16>
    %18 = vector.shape_cast %17 : vector<1x8x8x128xbf16> to vector<8x8x128xbf16>
    %19 = vector.shape_cast %16 : vector<8x8x128xbf16> to vector<1x8x8x128xbf16>
    tpu.vector_store %arg5[%c0_8, %c0_9, %c0_10, %c0_11], %19 {strides = array<i32>} : memref<1x8x8x128xbf16, #tpu.memory_space<vmem>>, vector<1x8x8x128xbf16>,
    return
  }
  func.func @transform_0(%arg0: i32, %arg1: i32) -> (i32, i32, i32, i32) {
    %c0_i32 = arith.constant 0 : i32
    %c0_i32_0 = arith.constant 0 : i32
    %c0_i32_1 = arith.constant 0 : i32
    return %arg0, %arg1, %c0_i32, %c0_i32_0 : i32, i32, i32, i32
  }
  func.func @transform_1(%arg0: i32, %arg1: i32) -> (i32, i32) {
    %c0_i32 = arith.constant 0 : i32
    %c0_i32_0 = arith.constant 0 : i32
    %c0_i32_1 = arith.constant 0 : i32
    return %c0_i32, %c0_i32_0 : i32, i32
  }
  func.func @transform_2(%arg0: i32, %arg1: i32) -> (i32, i32) {
    %c0_i32 = arith.constant 0 : i32
    %c0_i32_0 = arith.constant 0 : i32
    %c0_i32_1 = arith.constant 0 : i32
    return %c0_i32, %c0_i32_0 : i32, i32
  }
  func.func @transform_3(%arg0: i32, %arg1: i32) -> (i32, i32, i32, i32) {
    %c0_i32 = arith.constant 0 : i32
    %c0_i32_0 = arith.constant 0 : i32
    %c0_i32_1 = arith.constant 0 : i32
    return %arg0, %arg1, %c0_i32, %c0_i32_0 : i32, i32, i32, i32
  }
}

module attributes {stable_mosaic.version = 11 : i64} {
  func.func @_conv_bnstats_kernel(%arg0: i32, %arg1: i32, %arg2: i32, %arg3: memref<1x1x5x512xbf16, #tpu.memory_space<vmem>>, %arg4: memref<4x512x256xbf16, #tpu.memory_space<vmem>>, %arg5: memref<1x1x4x256xbf16, #tpu.memory_space<vmem>>, %arg6: memref<1x1x1x256xf32, #tpu.memory_space<vmem>>, %arg7: memref<1x1x1x256xf32, #tpu.memory_space<vmem>>, %arg8: memref<4x256xf32, #tpu.memory_space<vmem>>) attributes {dimension_semantics = [#tpu.dimension_semantics<parallel>, #tpu.dimension_semantics<parallel>, #tpu.dimension_semantics<arbitrary>], iteration_bounds = array<i64: 2, 4, 2>, scalar_prefetch = 0 : i64, scratch_operands = 1 : i64, tpu.core_type = #tpu.core_type<tc>, window_params = [{transform_indices = @transform_0, window_bounds = array<i64: 1, 1, 5, 512>}, {pipeline_mode = #tpu.pipeline_mode<synchronous>, transform_indices = @transform_1, window_bounds = array<i64: 4, 512, 256>}, {transform_indices = @transform_2, window_bounds = array<i64: 1, 1, 4, 256>}, {transform_indices = @transform_3, window_bounds = array<i64: 1, 1, 1, 256>}, {transform_indices = @transform_4, window_bounds = array<i64: 1, 1, 1, 256>}]} {
    %c0_i32 = arith.constant 0 : i32
    %0 = arith.cmpi eq, %arg2, %c0_i32 : i32
    %1 = arith.extui %0 : i1 to i32
    %c0_i32_0 = arith.constant 0 : i32
    %2 = arith.cmpi ne, %1, %c0_i32_0 : i32
    scf.if %2 {
      %cst_20 = arith.constant 0.000000e+00 : f32
      %26 = vector.broadcast %cst_20 : f32 to vector<4x256xf32>
      %c0_21 = arith.constant 0 : index
      %c0_22 = arith.constant 0 : index
      %27 = vector.load %arg8[%c0_21, %c0_22] : memref<4x256xf32, #tpu.memory_space<vmem>>, vector<4x256xf32>
      tpu.vector_store %arg8[%c0_21, %c0_22], %26 {strides = array<i32>} : memref<4x256xf32, #tpu.memory_space<vmem>>, vector<4x256xf32>,
    } else {
    }
    %c0 = arith.constant 0 : index
    %c0_1 = arith.constant 0 : index
    %c0_2 = arith.constant 0 : index
    %c0_3 = arith.constant 0 : index
    %3 = vector.load %arg3[%c0, %c0_1, %c0_2, %c0_3] : memref<1x1x5x512xbf16, #tpu.memory_space<vmem>>, vector<1x1x4x512xbf16>
    %4 = vector.shape_cast %3 : vector<1x1x4x512xbf16> to vector<4x512xbf16>
    %c2_i32 = arith.constant 2 : i32
    %5 = arith.muli %arg2, %c2_i32 : i32
    %c0_i32_4 = arith.constant 0 : i32
    %6 = arith.addi %5, %c0_i32_4 : i32
    %7 = arith.index_cast %6 : i32 to index
    %c0_5 = arith.constant 0 : index
    %c0_6 = arith.constant 0 : index
    %8 = vector.load %arg4[%7, %c0_5, %c0_6] : memref<4x512x256xbf16, #tpu.memory_space<vmem>>, vector<1x512x256xbf16>
    %9 = vector.shape_cast %8 : vector<1x512x256xbf16> to vector<512x256xbf16>
    %cst = arith.constant dense<0.000000e+00> : vector<4x256xf32>
    %10 = tpu.matmul %4, %9, %cst {dimension_numbers = #tpu.dot_dimension_numbers<[1], [0], [0], [1], [0, 0, 1, 1], [], []>} : vector<4x512xbf16>, vector<512x256xbf16>, vector<4x256xf32> -> vector<4x256xf32>
    %c0_7 = arith.constant 0 : index
    %c0_8 = arith.constant 0 : index
    %c1 = arith.constant 1 : index
    %c0_9 = arith.constant 0 : index
    %11 = vector.load %arg3[%c0_7, %c0_8, %c1, %c0_9] : memref<1x1x5x512xbf16, #tpu.memory_space<vmem>>, vector<1x1x4x512xbf16>
    %12 = vector.shape_cast %11 : vector<1x1x4x512xbf16> to vector<4x512xbf16>
    %c2_i32_10 = arith.constant 2 : i32
    %13 = arith.muli %arg2, %c2_i32_10 : i32
    %c1_i32 = arith.constant 1 : i32
    %14 = arith.addi %13, %c1_i32 : i32
    %15 = arith.index_cast %14 : i32 to index
    %c0_11 = arith.constant 0 : index
    %c0_12 = arith.constant 0 : index
    %16 = vector.load %arg4[%15, %c0_11, %c0_12] : memref<4x512x256xbf16, #tpu.memory_space<vmem>>, vector<1x512x256xbf16>
    %17 = vector.shape_cast %16 : vector<1x512x256xbf16> to vector<512x256xbf16>
    %cst_13 = arith.constant dense<0.000000e+00> : vector<4x256xf32>
    %18 = tpu.matmul %12, %17, %cst_13 {dimension_numbers = #tpu.dot_dimension_numbers<[1], [0], [0], [1], [0, 0, 1, 1], [], []>} : vector<4x512xbf16>, vector<512x256xbf16>, vector<4x256xf32> -> vector<4x256xf32>
    %19 = arith.addf %10, %18 : vector<4x256xf32>
    %c0_14 = arith.constant 0 : index
    %c0_15 = arith.constant 0 : index
    %20 = vector.load %arg8[%c0_14, %c0_15] : memref<4x256xf32, #tpu.memory_space<vmem>>, vector<4x256xf32>
    %21 = arith.addf %20, %19 : vector<4x256xf32>
    %c0_16 = arith.constant 0 : index
    %c0_17 = arith.constant 0 : index
    %22 = vector.load %arg8[%c0_16, %c0_17] : memref<4x256xf32, #tpu.memory_space<vmem>>, vector<4x256xf32>
    tpu.vector_store %arg8[%c0_16, %c0_17], %21 {strides = array<i32>} : memref<4x256xf32, #tpu.memory_space<vmem>>, vector<4x256xf32>,
    %c1_i32_18 = arith.constant 1 : i32
    %23 = arith.cmpi eq, %arg2, %c1_i32_18 : i32
    %24 = arith.extui %23 : i1 to i32
    %c0_i32_19 = arith.constant 0 : i32
    %25 = arith.cmpi ne, %24, %c0_i32_19 : i32
    scf.if %25 {
      %c0_20 = arith.constant 0 : index
      %c0_21 = arith.constant 0 : index
      %26 = vector.load %arg8[%c0_20, %c0_21] : memref<4x256xf32, #tpu.memory_space<vmem>>, vector<4x256xf32>
      %27 = arith.truncf %26 : vector<4x256xf32> to vector<4x256xbf16>
      %c0_22 = arith.constant 0 : index
      %c0_23 = arith.constant 0 : index
      %c0_24 = arith.constant 0 : index
      %c0_25 = arith.constant 0 : index
      %28 = vector.load %arg5[%c0_22, %c0_23, %c0_24, %c0_25] : memref<1x1x4x256xbf16, #tpu.memory_space<vmem>>, vector<1x1x4x256xbf16>
      %29 = vector.shape_cast %28 : vector<1x1x4x256xbf16> to vector<4x256xbf16>
      %30 = vector.shape_cast %27 : vector<4x256xbf16> to vector<1x1x4x256xbf16>
      tpu.vector_store %arg5[%c0_22, %c0_23, %c0_24, %c0_25], %30 {strides = array<i32>} : memref<1x1x4x256xbf16, #tpu.memory_space<vmem>>, vector<1x1x4x256xbf16>,
      %cst_26 = arith.constant dense<0.000000e+00> : vector<256xf32>
      %31 = vector.multi_reduction <add>, %26, %cst_26 [0] : vector<4x256xf32> to vector<256xf32>
      %32 = vector.shape_cast %31 : vector<256xf32> to vector<1x256xf32>
      %c0_27 = arith.constant 0 : index
      %c0_28 = arith.constant 0 : index
      %c0_29 = arith.constant 0 : index
      %c0_30 = arith.constant 0 : index
      %33 = vector.load %arg6[%c0_27, %c0_28, %c0_29, %c0_30] : memref<1x1x1x256xf32, #tpu.memory_space<vmem>>, vector<1x1x1x256xf32>
      %34 = vector.shape_cast %33 : vector<1x1x1x256xf32> to vector<1x256xf32>
      %35 = vector.shape_cast %32 : vector<1x256xf32> to vector<1x1x1x256xf32>
      tpu.vector_store %arg6[%c0_27, %c0_28, %c0_29, %c0_30], %35 {strides = array<i32>} : memref<1x1x1x256xf32, #tpu.memory_space<vmem>>, vector<1x1x1x256xf32>,
      %36 = arith.mulf %26, %26 : vector<4x256xf32>
      %cst_31 = arith.constant dense<0.000000e+00> : vector<256xf32>
      %37 = vector.multi_reduction <add>, %36, %cst_31 [0] : vector<4x256xf32> to vector<256xf32>
      %38 = vector.shape_cast %37 : vector<256xf32> to vector<1x256xf32>
      %c0_32 = arith.constant 0 : index
      %c0_33 = arith.constant 0 : index
      %c0_34 = arith.constant 0 : index
      %c0_35 = arith.constant 0 : index
      %39 = vector.load %arg7[%c0_32, %c0_33, %c0_34, %c0_35] : memref<1x1x1x256xf32, #tpu.memory_space<vmem>>, vector<1x1x1x256xf32>
      %40 = vector.shape_cast %39 : vector<1x1x1x256xf32> to vector<1x256xf32>
      %41 = vector.shape_cast %38 : vector<1x256xf32> to vector<1x1x1x256xf32>
      tpu.vector_store %arg7[%c0_32, %c0_33, %c0_34, %c0_35], %41 {strides = array<i32>} : memref<1x1x1x256xf32, #tpu.memory_space<vmem>>, vector<1x1x1x256xf32>,
    } else {
    }
    return
  }
  func.func @transform_0(%arg0: i32, %arg1: i32, %arg2: i32) -> (i32, i32, i32, i32) {
    %0 = arith.addi %arg1, %arg2 : i32
    %c0_i32 = arith.constant 0 : i32
    %c0_i32_0 = arith.constant 0 : i32
    %c0_i32_1 = arith.constant 0 : i32
    return %arg0, %0, %c0_i32, %c0_i32_0 : i32, i32, i32, i32
  }
  func.func @transform_1(%arg0: i32, %arg1: i32, %arg2: i32) -> (i32, i32, i32) {
    %c0_i32 = arith.constant 0 : i32
    %c0_i32_0 = arith.constant 0 : i32
    %c0_i32_1 = arith.constant 0 : i32
    %c0_i32_2 = arith.constant 0 : i32
    return %c0_i32, %c0_i32_0, %c0_i32_1 : i32, i32, i32
  }
  func.func @transform_2(%arg0: i32, %arg1: i32, %arg2: i32) -> (i32, i32, i32, i32) {
    %c0_i32 = arith.constant 0 : i32
    %c0_i32_0 = arith.constant 0 : i32
    %c0_i32_1 = arith.constant 0 : i32
    return %arg0, %arg1, %c0_i32, %c0_i32_0 : i32, i32, i32, i32
  }
  func.func @transform_3(%arg0: i32, %arg1: i32, %arg2: i32) -> (i32, i32, i32, i32) {
    %c0_i32 = arith.constant 0 : i32
    %c0_i32_0 = arith.constant 0 : i32
    %c0_i32_1 = arith.constant 0 : i32
    return %arg0, %arg1, %c0_i32, %c0_i32_0 : i32, i32, i32, i32
  }
  func.func @transform_4(%arg0: i32, %arg1: i32, %arg2: i32) -> (i32, i32, i32, i32) {
    %c0_i32 = arith.constant 0 : i32
    %c0_i32_0 = arith.constant 0 : i32
    %c0_i32_1 = arith.constant 0 : i32
    return %arg0, %arg1, %c0_i32, %c0_i32_0 : i32, i32, i32, i32
  }
}

module attributes {stable_mosaic.version = 11 : i64} {
  func.func @_affine_leaky_kernel(%arg0: i32, %arg1: i32, %arg2: memref<1x4x4x256xbf16, #tpu.memory_space<vmem>>, %arg3: memref<1x256xf32, #tpu.memory_space<vmem>>, %arg4: memref<1x256xf32, #tpu.memory_space<vmem>>, %arg5: memref<1x4x4x256xbf16, #tpu.memory_space<vmem>>) attributes {dimension_semantics = [#tpu.dimension_semantics<parallel>, #tpu.dimension_semantics<parallel>], iteration_bounds = array<i64: 2, 1>, scalar_prefetch = 0 : i64, scratch_operands = 0 : i64, tpu.core_type = #tpu.core_type<tc>, window_params = [{transform_indices = @transform_0, window_bounds = array<i64: 1, 4, 4, 256>}, {pipeline_mode = #tpu.pipeline_mode<synchronous>, transform_indices = @transform_1, window_bounds = array<i64: 1, 256>}, {pipeline_mode = #tpu.pipeline_mode<synchronous>, transform_indices = @transform_2, window_bounds = array<i64: 1, 256>}, {transform_indices = @transform_3, window_bounds = array<i64: 1, 4, 4, 256>}]} {
    %c0 = arith.constant 0 : index
    %c0_0 = arith.constant 0 : index
    %c0_1 = arith.constant 0 : index
    %c0_2 = arith.constant 0 : index
    %0 = vector.load %arg2[%c0, %c0_0, %c0_1, %c0_2] : memref<1x4x4x256xbf16, #tpu.memory_space<vmem>>, vector<1x4x4x256xbf16>
    %1 = vector.shape_cast %0 : vector<1x4x4x256xbf16> to vector<4x4x256xbf16>
    %2 = arith.extf %1 : vector<4x4x256xbf16> to vector<4x4x256xf32>
    %c0_3 = arith.constant 0 : index
    %c0_4 = arith.constant 0 : index
    %3 = vector.load %arg3[%c0_3, %c0_4] : memref<1x256xf32, #tpu.memory_space<vmem>>, vector<1x256xf32>
    %4 = vector.shape_cast %3 : vector<1x256xf32> to vector<1x1x256xf32>
    %5 = vector.broadcast %4 : vector<1x1x256xf32> to vector<4x4x256xf32>
    %6 = arith.mulf %2, %5 : vector<4x4x256xf32>
    %c0_5 = arith.constant 0 : index
    %c0_6 = arith.constant 0 : index
    %7 = vector.load %arg4[%c0_5, %c0_6] : memref<1x256xf32, #tpu.memory_space<vmem>>, vector<1x256xf32>
    %8 = vector.shape_cast %7 : vector<1x256xf32> to vector<1x1x256xf32>
    %9 = vector.broadcast %8 : vector<1x1x256xf32> to vector<4x4x256xf32>
    %10 = arith.addf %6, %9 : vector<4x4x256xf32>
    %cst = arith.constant 0.000000e+00 : f32
    %11 = vector.broadcast %cst : f32 to vector<4x4x256xf32>
    %12 = arith.cmpf ogt, %10, %11 : vector<4x4x256xf32>
    %cst_7 = arith.constant 2.000000e-01 : f32
    %13 = vector.broadcast %cst_7 : f32 to vector<4x4x256xf32>
    %14 = arith.mulf %13, %10 : vector<4x4x256xf32>
    %15 = arith.select %12, %10, %14 : vector<4x4x256xi1>, vector<4x4x256xf32>
    %16 = arith.truncf %15 : vector<4x4x256xf32> to vector<4x4x256xbf16>
    %c0_8 = arith.constant 0 : index
    %c0_9 = arith.constant 0 : index
    %c0_10 = arith.constant 0 : index
    %c0_11 = arith.constant 0 : index
    %17 = vector.load %arg5[%c0_8, %c0_9, %c0_10, %c0_11] : memref<1x4x4x256xbf16, #tpu.memory_space<vmem>>, vector<1x4x4x256xbf16>
    %18 = vector.shape_cast %17 : vector<1x4x4x256xbf16> to vector<4x4x256xbf16>
    %19 = vector.shape_cast %16 : vector<4x4x256xbf16> to vector<1x4x4x256xbf16>
    tpu.vector_store %arg5[%c0_8, %c0_9, %c0_10, %c0_11], %19 {strides = array<i32>} : memref<1x4x4x256xbf16, #tpu.memory_space<vmem>>, vector<1x4x4x256xbf16>,
    return
  }
  func.func @transform_0(%arg0: i32, %arg1: i32) -> (i32, i32, i32, i32) {
    %c0_i32 = arith.constant 0 : i32
    %c0_i32_0 = arith.constant 0 : i32
    %c0_i32_1 = arith.constant 0 : i32
    return %arg0, %arg1, %c0_i32, %c0_i32_0 : i32, i32, i32, i32
  }
  func.func @transform_1(%arg0: i32, %arg1: i32) -> (i32, i32) {
    %c0_i32 = arith.constant 0 : i32
    %c0_i32_0 = arith.constant 0 : i32
    %c0_i32_1 = arith.constant 0 : i32
    return %c0_i32, %c0_i32_0 : i32, i32
  }
  func.func @transform_2(%arg0: i32, %arg1: i32) -> (i32, i32) {
    %c0_i32 = arith.constant 0 : i32
    %c0_i32_0 = arith.constant 0 : i32
    %c0_i32_1 = arith.constant 0 : i32
    return %c0_i32, %c0_i32_0 : i32, i32
  }
  func.func @transform_3(%arg0: i32, %arg1: i32) -> (i32, i32, i32, i32) {
    %c0_i32 = arith.constant 0 : i32
    %c0_i32_0 = arith.constant 0 : i32
    %c0_i32_1 = arith.constant 0 : i32
    return %arg0, %arg1, %c0_i32, %c0_i32_0 : i32, i32, i32, i32
  }
}

module attributes {stable_mosaic.version = 11 : i64} {
  func.func @_conv_bnstats_kernel(%arg0: i32, %arg1: i32, %arg2: i32, %arg3: memref<1x1x6x256xbf16, #tpu.memory_space<vmem>>, %arg4: memref<16x256x512xbf16, #tpu.memory_space<vmem>>, %arg5: memref<1x1x3x512xbf16, #tpu.memory_space<vmem>>, %arg6: memref<1x1x1x512xf32, #tpu.memory_space<vmem>>, %arg7: memref<1x1x1x512xf32, #tpu.memory_space<vmem>>, %arg8: memref<3x512xf32, #tpu.memory_space<vmem>>) attributes {dimension_semantics = [#tpu.dimension_semantics<parallel>, #tpu.dimension_semantics<parallel>, #tpu.dimension_semantics<arbitrary>], iteration_bounds = array<i64: 2, 3, 4>, scalar_prefetch = 0 : i64, scratch_operands = 1 : i64, tpu.core_type = #tpu.core_type<tc>, window_params = [{transform_indices = @transform_0, window_bounds = array<i64: 1, 1, 6, 256>}, {pipeline_mode = #tpu.pipeline_mode<synchronous>, transform_indices = @transform_1, window_bounds = array<i64: 16, 256, 512>}, {transform_indices = @transform_2, window_bounds = array<i64: 1, 1, 3, 512>}, {transform_indices = @transform_3, window_bounds = array<i64: 1, 1, 1, 512>}, {transform_indices = @transform_4, window_bounds = array<i64: 1, 1, 1, 512>}]} {
    %c0_i32 = arith.constant 0 : i32
    %0 = arith.cmpi eq, %arg2, %c0_i32 : i32
    %1 = arith.extui %0 : i1 to i32
    %c0_i32_0 = arith.constant 0 : i32
    %2 = arith.cmpi ne, %1, %c0_i32_0 : i32
    scf.if %2 {
      %cst_34 = arith.constant 0.000000e+00 : f32
      %44 = vector.broadcast %cst_34 : f32 to vector<3x512xf32>
      %c0_35 = arith.constant 0 : index
      %c0_36 = arith.constant 0 : index
      %45 = vector.load %arg8[%c0_35, %c0_36] : memref<3x512xf32, #tpu.memory_space<vmem>>, vector<3x512xf32>
      tpu.vector_store %arg8[%c0_35, %c0_36], %44 {strides = array<i32>} : memref<3x512xf32, #tpu.memory_space<vmem>>, vector<3x512xf32>,
    } else {
    }
    %c0 = arith.constant 0 : index
    %c0_1 = arith.constant 0 : index
    %c0_2 = arith.constant 0 : index
    %c0_3 = arith.constant 0 : index
    %3 = vector.load %arg3[%c0, %c0_1, %c0_2, %c0_3] : memref<1x1x6x256xbf16, #tpu.memory_space<vmem>>, vector<1x1x3x256xbf16>
    %4 = vector.shape_cast %3 : vector<1x1x3x256xbf16> to vector<3x256xbf16>
    %c4_i32 = arith.constant 4 : i32
    %5 = arith.muli %arg2, %c4_i32 : i32
    %c0_i32_4 = arith.constant 0 : i32
    %6 = arith.addi %5, %c0_i32_4 : i32
    %7 = arith.index_cast %6 : i32 to index
    %c0_5 = arith.constant 0 : index
    %c0_6 = arith.constant 0 : index
    %8 = vector.load %arg4[%7, %c0_5, %c0_6] : memref<16x256x512xbf16, #tpu.memory_space<vmem>>, vector<1x256x512xbf16>
    %9 = vector.shape_cast %8 : vector<1x256x512xbf16> to vector<256x512xbf16>
    %cst = arith.constant dense<0.000000e+00> : vector<3x512xf32>
    %10 = tpu.matmul %4, %9, %cst {dimension_numbers = #tpu.dot_dimension_numbers<[1], [0], [0], [1], [0, 0, 1, 1], [], []>} : vector<3x256xbf16>, vector<256x512xbf16>, vector<3x512xf32> -> vector<3x512xf32>
    %c0_7 = arith.constant 0 : index
    %c0_8 = arith.constant 0 : index
    %c1 = arith.constant 1 : index
    %c0_9 = arith.constant 0 : index
    %11 = vector.load %arg3[%c0_7, %c0_8, %c1, %c0_9] : memref<1x1x6x256xbf16, #tpu.memory_space<vmem>>, vector<1x1x3x256xbf16>
    %12 = vector.shape_cast %11 : vector<1x1x3x256xbf16> to vector<3x256xbf16>
    %c4_i32_10 = arith.constant 4 : i32
    %13 = arith.muli %arg2, %c4_i32_10 : i32
    %c1_i32 = arith.constant 1 : i32
    %14 = arith.addi %13, %c1_i32 : i32
    %15 = arith.index_cast %14 : i32 to index
    %c0_11 = arith.constant 0 : index
    %c0_12 = arith.constant 0 : index
    %16 = vector.load %arg4[%15, %c0_11, %c0_12] : memref<16x256x512xbf16, #tpu.memory_space<vmem>>, vector<1x256x512xbf16>
    %17 = vector.shape_cast %16 : vector<1x256x512xbf16> to vector<256x512xbf16>
    %cst_13 = arith.constant dense<0.000000e+00> : vector<3x512xf32>
    %18 = tpu.matmul %12, %17, %cst_13 {dimension_numbers = #tpu.dot_dimension_numbers<[1], [0], [0], [1], [0, 0, 1, 1], [], []>} : vector<3x256xbf16>, vector<256x512xbf16>, vector<3x512xf32> -> vector<3x512xf32>
    %19 = arith.addf %10, %18 : vector<3x512xf32>
    %c0_14 = arith.constant 0 : index
    %c0_15 = arith.constant 0 : index
    %c2 = arith.constant 2 : index
    %c0_16 = arith.constant 0 : index
    %20 = vector.load %arg3[%c0_14, %c0_15, %c2, %c0_16] : memref<1x1x6x256xbf16, #tpu.memory_space<vmem>>, vector<1x1x3x256xbf16>
    %21 = vector.shape_cast %20 : vector<1x1x3x256xbf16> to vector<3x256xbf16>
    %c4_i32_17 = arith.constant 4 : i32
    %22 = arith.muli %arg2, %c4_i32_17 : i32
    %c2_i32 = arith.constant 2 : i32
    %23 = arith.addi %22, %c2_i32 : i32
    %24 = arith.index_cast %23 : i32 to index
    %c0_18 = arith.constant 0 : index
    %c0_19 = arith.constant 0 : index
    %25 = vector.load %arg4[%24, %c0_18, %c0_19] : memref<16x256x512xbf16, #tpu.memory_space<vmem>>, vector<1x256x512xbf16>
    %26 = vector.shape_cast %25 : vector<1x256x512xbf16> to vector<256x512xbf16>
    %cst_20 = arith.constant dense<0.000000e+00> : vector<3x512xf32>
    %27 = tpu.matmul %21, %26, %cst_20 {dimension_numbers = #tpu.dot_dimension_numbers<[1], [0], [0], [1], [0, 0, 1, 1], [], []>} : vector<3x256xbf16>, vector<256x512xbf16>, vector<3x512xf32> -> vector<3x512xf32>
    %28 = arith.addf %19, %27 : vector<3x512xf32>
    %c0_21 = arith.constant 0 : index
    %c0_22 = arith.constant 0 : index
    %c3 = arith.constant 3 : index
    %c0_23 = arith.constant 0 : index
    %29 = vector.load %arg3[%c0_21, %c0_22, %c3, %c0_23] : memref<1x1x6x256xbf16, #tpu.memory_space<vmem>>, vector<1x1x3x256xbf16>
    %30 = vector.shape_cast %29 : vector<1x1x3x256xbf16> to vector<3x256xbf16>
    %c4_i32_24 = arith.constant 4 : i32
    %31 = arith.muli %arg2, %c4_i32_24 : i32
    %c3_i32 = arith.constant 3 : i32
    %32 = arith.addi %31, %c3_i32 : i32
    %33 = arith.index_cast %32 : i32 to index
    %c0_25 = arith.constant 0 : index
    %c0_26 = arith.constant 0 : index
    %34 = vector.load %arg4[%33, %c0_25, %c0_26] : memref<16x256x512xbf16, #tpu.memory_space<vmem>>, vector<1x256x512xbf16>
    %35 = vector.shape_cast %34 : vector<1x256x512xbf16> to vector<256x512xbf16>
    %cst_27 = arith.constant dense<0.000000e+00> : vector<3x512xf32>
    %36 = tpu.matmul %30, %35, %cst_27 {dimension_numbers = #tpu.dot_dimension_numbers<[1], [0], [0], [1], [0, 0, 1, 1], [], []>} : vector<3x256xbf16>, vector<256x512xbf16>, vector<3x512xf32> -> vector<3x512xf32>
    %37 = arith.addf %28, %36 : vector<3x512xf32>
    %c0_28 = arith.constant 0 : index
    %c0_29 = arith.constant 0 : index
    %38 = vector.load %arg8[%c0_28, %c0_29] : memref<3x512xf32, #tpu.memory_space<vmem>>, vector<3x512xf32>
    %39 = arith.addf %38, %37 : vector<3x512xf32>
    %c0_30 = arith.constant 0 : index
    %c0_31 = arith.constant 0 : index
    %40 = vector.load %arg8[%c0_30, %c0_31] : memref<3x512xf32, #tpu.memory_space<vmem>>, vector<3x512xf32>
    tpu.vector_store %arg8[%c0_30, %c0_31], %39 {strides = array<i32>} : memref<3x512xf32, #tpu.memory_space<vmem>>, vector<3x512xf32>,
    %c3_i32_32 = arith.constant 3 : i32
    %41 = arith.cmpi eq, %arg2, %c3_i32_32 : i32
    %42 = arith.extui %41 : i1 to i32
    %c0_i32_33 = arith.constant 0 : i32
    %43 = arith.cmpi ne, %42, %c0_i32_33 : i32
    scf.if %43 {
      %c0_34 = arith.constant 0 : index
      %c0_35 = arith.constant 0 : index
      %44 = vector.load %arg8[%c0_34, %c0_35] : memref<3x512xf32, #tpu.memory_space<vmem>>, vector<3x512xf32>
      %45 = arith.truncf %44 : vector<3x512xf32> to vector<3x512xbf16>
      %c0_36 = arith.constant 0 : index
      %c0_37 = arith.constant 0 : index
      %c0_38 = arith.constant 0 : index
      %c0_39 = arith.constant 0 : index
      %46 = vector.load %arg5[%c0_36, %c0_37, %c0_38, %c0_39] : memref<1x1x3x512xbf16, #tpu.memory_space<vmem>>, vector<1x1x3x512xbf16>
      %47 = vector.shape_cast %46 : vector<1x1x3x512xbf16> to vector<3x512xbf16>
      %48 = vector.shape_cast %45 : vector<3x512xbf16> to vector<1x1x3x512xbf16>
      tpu.vector_store %arg5[%c0_36, %c0_37, %c0_38, %c0_39], %48 {strides = array<i32>} : memref<1x1x3x512xbf16, #tpu.memory_space<vmem>>, vector<1x1x3x512xbf16>,
      %cst_40 = arith.constant dense<0.000000e+00> : vector<512xf32>
      %49 = vector.multi_reduction <add>, %44, %cst_40 [0] : vector<3x512xf32> to vector<512xf32>
      %50 = vector.shape_cast %49 : vector<512xf32> to vector<1x512xf32>
      %c0_41 = arith.constant 0 : index
      %c0_42 = arith.constant 0 : index
      %c0_43 = arith.constant 0 : index
      %c0_44 = arith.constant 0 : index
      %51 = vector.load %arg6[%c0_41, %c0_42, %c0_43, %c0_44] : memref<1x1x1x512xf32, #tpu.memory_space<vmem>>, vector<1x1x1x512xf32>
      %52 = vector.shape_cast %51 : vector<1x1x1x512xf32> to vector<1x512xf32>
      %53 = vector.shape_cast %50 : vector<1x512xf32> to vector<1x1x1x512xf32>
      tpu.vector_store %arg6[%c0_41, %c0_42, %c0_43, %c0_44], %53 {strides = array<i32>} : memref<1x1x1x512xf32, #tpu.memory_space<vmem>>, vector<1x1x1x512xf32>,
      %54 = arith.mulf %44, %44 : vector<3x512xf32>
      %cst_45 = arith.constant dense<0.000000e+00> : vector<512xf32>
      %55 = vector.multi_reduction <add>, %54, %cst_45 [0] : vector<3x512xf32> to vector<512xf32>
      %56 = vector.shape_cast %55 : vector<512xf32> to vector<1x512xf32>
      %c0_46 = arith.constant 0 : index
      %c0_47 = arith.constant 0 : index
      %c0_48 = arith.constant 0 : index
      %c0_49 = arith.constant 0 : index
      %57 = vector.load %arg7[%c0_46, %c0_47, %c0_48, %c0_49] : memref<1x1x1x512xf32, #tpu.memory_space<vmem>>, vector<1x1x1x512xf32>
      %58 = vector.shape_cast %57 : vector<1x1x1x512xf32> to vector<1x512xf32>
      %59 = vector.shape_cast %56 : vector<1x512xf32> to vector<1x1x1x512xf32>
      tpu.vector_store %arg7[%c0_46, %c0_47, %c0_48, %c0_49], %59 {strides = array<i32>} : memref<1x1x1x512xf32, #tpu.memory_space<vmem>>, vector<1x1x1x512xf32>,
    } else {
    }
    return
  }
  func.func @transform_0(%arg0: i32, %arg1: i32, %arg2: i32) -> (i32, i32, i32, i32) {
    %0 = arith.addi %arg1, %arg2 : i32
    %c0_i32 = arith.constant 0 : i32
    %c0_i32_0 = arith.constant 0 : i32
    %c0_i32_1 = arith.constant 0 : i32
    return %arg0, %0, %c0_i32, %c0_i32_0 : i32, i32, i32, i32
  }
  func.func @transform_1(%arg0: i32, %arg1: i32, %arg2: i32) -> (i32, i32, i32) {
    %c0_i32 = arith.constant 0 : i32
    %c0_i32_0 = arith.constant 0 : i32
    %c0_i32_1 = arith.constant 0 : i32
    %c0_i32_2 = arith.constant 0 : i32
    return %c0_i32, %c0_i32_0, %c0_i32_1 : i32, i32, i32
  }
  func.func @transform_2(%arg0: i32, %arg1: i32, %arg2: i32) -> (i32, i32, i32, i32) {
    %c0_i32 = arith.constant 0 : i32
    %c0_i32_0 = arith.constant 0 : i32
    %c0_i32_1 = arith.constant 0 : i32
    return %arg0, %arg1, %c0_i32, %c0_i32_0 : i32, i32, i32, i32
  }
  func.func @transform_3(%arg0: i32, %arg1: i32, %arg2: i32) -> (i32, i32, i32, i32) {
    %c0_i32 = arith.constant 0 : i32
    %c0_i32_0 = arith.constant 0 : i32
    %c0_i32_1 = arith.constant 0 : i32
    return %arg0, %arg1, %c0_i32, %c0_i32_0 : i32, i32, i32, i32
  }
  func.func @transform_4(%arg0: i32, %arg1: i32, %arg2: i32) -> (i32, i32, i32, i32) {
    %c0_i32 = arith.constant 0 : i32
    %c0_i32_0 = arith.constant 0 : i32
    %c0_i32_1 = arith.constant 0 : i32
    return %arg0, %arg1, %c0_i32, %c0_i32_0 : i32, i32, i32, i32
  }
}

module attributes {stable_mosaic.version = 11 : i64} {
  func.func @_affine_leaky_kernel(%arg0: i32, %arg1: i32, %arg2: memref<1x3x3x512xbf16, #tpu.memory_space<vmem>>, %arg3: memref<1x512xf32, #tpu.memory_space<vmem>>, %arg4: memref<1x512xf32, #tpu.memory_space<vmem>>, %arg5: memref<1x3x3x512xbf16, #tpu.memory_space<vmem>>) attributes {dimension_semantics = [#tpu.dimension_semantics<parallel>, #tpu.dimension_semantics<parallel>], iteration_bounds = array<i64: 2, 1>, scalar_prefetch = 0 : i64, scratch_operands = 0 : i64, tpu.core_type = #tpu.core_type<tc>, window_params = [{transform_indices = @transform_0, window_bounds = array<i64: 1, 3, 3, 512>}, {pipeline_mode = #tpu.pipeline_mode<synchronous>, transform_indices = @transform_1, window_bounds = array<i64: 1, 512>}, {pipeline_mode = #tpu.pipeline_mode<synchronous>, transform_indices = @transform_2, window_bounds = array<i64: 1, 512>}, {transform_indices = @transform_3, window_bounds = array<i64: 1, 3, 3, 512>}]} {
    %c0 = arith.constant 0 : index
    %c0_0 = arith.constant 0 : index
    %c0_1 = arith.constant 0 : index
    %c0_2 = arith.constant 0 : index
    %0 = vector.load %arg2[%c0, %c0_0, %c0_1, %c0_2] : memref<1x3x3x512xbf16, #tpu.memory_space<vmem>>, vector<1x3x3x512xbf16>
    %1 = vector.shape_cast %0 : vector<1x3x3x512xbf16> to vector<3x3x512xbf16>
    %2 = arith.extf %1 : vector<3x3x512xbf16> to vector<3x3x512xf32>
    %c0_3 = arith.constant 0 : index
    %c0_4 = arith.constant 0 : index
    %3 = vector.load %arg3[%c0_3, %c0_4] : memref<1x512xf32, #tpu.memory_space<vmem>>, vector<1x512xf32>
    %4 = vector.shape_cast %3 : vector<1x512xf32> to vector<1x1x512xf32>
    %5 = vector.broadcast %4 : vector<1x1x512xf32> to vector<3x3x512xf32>
    %6 = arith.mulf %2, %5 : vector<3x3x512xf32>
    %c0_5 = arith.constant 0 : index
    %c0_6 = arith.constant 0 : index
    %7 = vector.load %arg4[%c0_5, %c0_6] : memref<1x512xf32, #tpu.memory_space<vmem>>, vector<1x512xf32>
    %8 = vector.shape_cast %7 : vector<1x512xf32> to vector<1x1x512xf32>
    %9 = vector.broadcast %8 : vector<1x1x512xf32> to vector<3x3x512xf32>
    %10 = arith.addf %6, %9 : vector<3x3x512xf32>
    %cst = arith.constant 0.000000e+00 : f32
    %11 = vector.broadcast %cst : f32 to vector<3x3x512xf32>
    %12 = arith.cmpf ogt, %10, %11 : vector<3x3x512xf32>
    %cst_7 = arith.constant 2.000000e-01 : f32
    %13 = vector.broadcast %cst_7 : f32 to vector<3x3x512xf32>
    %14 = arith.mulf %13, %10 : vector<3x3x512xf32>
    %15 = arith.select %12, %10, %14 : vector<3x3x512xi1>, vector<3x3x512xf32>
    %16 = arith.truncf %15 : vector<3x3x512xf32> to vector<3x3x512xbf16>
    %c0_8 = arith.constant 0 : index
    %c0_9 = arith.constant 0 : index
    %c0_10 = arith.constant 0 : index
    %c0_11 = arith.constant 0 : index
    %17 = vector.load %arg5[%c0_8, %c0_9, %c0_10, %c0_11] : memref<1x3x3x512xbf16, #tpu.memory_space<vmem>>, vector<1x3x3x512xbf16>
    %18 = vector.shape_cast %17 : vector<1x3x3x512xbf16> to vector<3x3x512xbf16>
    %19 = vector.shape_cast %16 : vector<3x3x512xbf16> to vector<1x3x3x512xbf16>
    tpu.vector_store %arg5[%c0_8, %c0_9, %c0_10, %c0_11], %19 {strides = array<i32>} : memref<1x3x3x512xbf16, #tpu.memory_space<vmem>>, vector<1x3x3x512xbf16>,
    return
  }
  func.func @transform_0(%arg0: i32, %arg1: i32) -> (i32, i32, i32, i32) {
    %c0_i32 = arith.constant 0 : i32
    %c0_i32_0 = arith.constant 0 : i32
    %c0_i32_1 = arith.constant 0 : i32
    return %arg0, %arg1, %c0_i32, %c0_i32_0 : i32, i32, i32, i32
  }
  func.func @transform_1(%arg0: i32, %arg1: i32) -> (i32, i32) {
    %c0_i32 = arith.constant 0 : i32
    %c0_i32_0 = arith.constant 0 : i32
    %c0_i32_1 = arith.constant 0 : i32
    return %c0_i32, %c0_i32_0 : i32, i32
  }
  func.func @transform_2(%arg0: i32, %arg1: i32) -> (i32, i32) {
    %c0_i32 = arith.constant 0 : i32
    %c0_i32_0 = arith.constant 0 : i32
    %c0_i32_1 = arith.constant 0 : i32
    return %c0_i32, %c0_i32_0 : i32, i32
  }
  func.func @transform_3(%arg0: i32, %arg1: i32) -> (i32, i32, i32, i32) {
    %c0_i32 = arith.constant 0 : i32
    %c0_i32_0 = arith.constant 0 : i32
    %c0_i32_1 = arith.constant 0 : i32
    return %arg0, %arg1, %c0_i32, %c0_i32_0 : i32, i32, i32, i32
  }
}

module attributes {stable_mosaic.version = 11 : i64} {
  func.func @_conv_bias_act_kernel(%arg0: i32, %arg1: i32, %arg2: i32, %arg3: memref<1x1x5x512xbf16, #tpu.memory_space<vmem>>, %arg4: memref<16x512x128xbf16, #tpu.memory_space<vmem>>, %arg5: memref<1x128xf32, #tpu.memory_space<vmem>>, %arg6: memref<1x1x2x128xbf16, #tpu.memory_space<vmem>>, %arg7: memref<2x128xf32, #tpu.memory_space<vmem>>) attributes {dimension_semantics = [#tpu.dimension_semantics<parallel>, #tpu.dimension_semantics<parallel>, #tpu.dimension_semantics<arbitrary>], iteration_bounds = array<i64: 2, 2, 4>, scalar_prefetch = 0 : i64, scratch_operands = 1 : i64, tpu.core_type = #tpu.core_type<tc>, window_params = [{transform_indices = @transform_0, window_bounds = array<i64: 1, 1, 5, 512>}, {pipeline_mode = #tpu.pipeline_mode<synchronous>, transform_indices = @transform_1, window_bounds = array<i64: 16, 512, 128>}, {pipeline_mode = #tpu.pipeline_mode<synchronous>, transform_indices = @transform_2, window_bounds = array<i64: 1, 128>}, {transform_indices = @transform_3, window_bounds = array<i64: 1, 1, 2, 128>}]} {
    %c0_i32 = arith.constant 0 : i32
    %0 = arith.cmpi eq, %arg2, %c0_i32 : i32
    %1 = arith.extui %0 : i1 to i32
    %c0_i32_0 = arith.constant 0 : i32
    %2 = arith.cmpi ne, %1, %c0_i32_0 : i32
    scf.if %2 {
      %cst_34 = arith.constant 0.000000e+00 : f32
      %44 = vector.broadcast %cst_34 : f32 to vector<2x128xf32>
      %c0_35 = arith.constant 0 : index
      %c0_36 = arith.constant 0 : index
      %45 = vector.load %arg7[%c0_35, %c0_36] : memref<2x128xf32, #tpu.memory_space<vmem>>, vector<2x128xf32>
      tpu.vector_store %arg7[%c0_35, %c0_36], %44 {strides = array<i32>} : memref<2x128xf32, #tpu.memory_space<vmem>>, vector<2x128xf32>,
    } else {
    }
    %c0 = arith.constant 0 : index
    %c0_1 = arith.constant 0 : index
    %c0_2 = arith.constant 0 : index
    %c0_3 = arith.constant 0 : index
    %3 = vector.load %arg3[%c0, %c0_1, %c0_2, %c0_3] : memref<1x1x5x512xbf16, #tpu.memory_space<vmem>>, vector<1x1x2x512xbf16>
    %4 = vector.shape_cast %3 : vector<1x1x2x512xbf16> to vector<2x512xbf16>
    %c4_i32 = arith.constant 4 : i32
    %5 = arith.muli %arg2, %c4_i32 : i32
    %c0_i32_4 = arith.constant 0 : i32
    %6 = arith.addi %5, %c0_i32_4 : i32
    %7 = arith.index_cast %6 : i32 to index
    %c0_5 = arith.constant 0 : index
    %c0_6 = arith.constant 0 : index
    %8 = vector.load %arg4[%7, %c0_5, %c0_6] : memref<16x512x128xbf16, #tpu.memory_space<vmem>>, vector<1x512x128xbf16>
    %9 = vector.shape_cast %8 : vector<1x512x128xbf16> to vector<512x128xbf16>
    %cst = arith.constant dense<0.000000e+00> : vector<2x128xf32>
    %10 = tpu.matmul %4, %9, %cst {dimension_numbers = #tpu.dot_dimension_numbers<[1], [0], [0], [1], [0, 0, 1, 1], [], []>} : vector<2x512xbf16>, vector<512x128xbf16>, vector<2x128xf32> -> vector<2x128xf32>
    %c0_7 = arith.constant 0 : index
    %c0_8 = arith.constant 0 : index
    %c1 = arith.constant 1 : index
    %c0_9 = arith.constant 0 : index
    %11 = vector.load %arg3[%c0_7, %c0_8, %c1, %c0_9] : memref<1x1x5x512xbf16, #tpu.memory_space<vmem>>, vector<1x1x2x512xbf16>
    %12 = vector.shape_cast %11 : vector<1x1x2x512xbf16> to vector<2x512xbf16>
    %c4_i32_10 = arith.constant 4 : i32
    %13 = arith.muli %arg2, %c4_i32_10 : i32
    %c1_i32 = arith.constant 1 : i32
    %14 = arith.addi %13, %c1_i32 : i32
    %15 = arith.index_cast %14 : i32 to index
    %c0_11 = arith.constant 0 : index
    %c0_12 = arith.constant 0 : index
    %16 = vector.load %arg4[%15, %c0_11, %c0_12] : memref<16x512x128xbf16, #tpu.memory_space<vmem>>, vector<1x512x128xbf16>
    %17 = vector.shape_cast %16 : vector<1x512x128xbf16> to vector<512x128xbf16>
    %cst_13 = arith.constant dense<0.000000e+00> : vector<2x128xf32>
    %18 = tpu.matmul %12, %17, %cst_13 {dimension_numbers = #tpu.dot_dimension_numbers<[1], [0], [0], [1], [0, 0, 1, 1], [], []>} : vector<2x512xbf16>, vector<512x128xbf16>, vector<2x128xf32> -> vector<2x128xf32>
    %19 = arith.addf %10, %18 : vector<2x128xf32>
    %c0_14 = arith.constant 0 : index
    %c0_15 = arith.constant 0 : index
    %c2 = arith.constant 2 : index
    %c0_16 = arith.constant 0 : index
    %20 = vector.load %arg3[%c0_14, %c0_15, %c2, %c0_16] : memref<1x1x5x512xbf16, #tpu.memory_space<vmem>>, vector<1x1x2x512xbf16>
    %21 = vector.shape_cast %20 : vector<1x1x2x512xbf16> to vector<2x512xbf16>
    %c4_i32_17 = arith.constant 4 : i32
    %22 = arith.muli %arg2, %c4_i32_17 : i32
    %c2_i32 = arith.constant 2 : i32
    %23 = arith.addi %22, %c2_i32 : i32
    %24 = arith.index_cast %23 : i32 to index
    %c0_18 = arith.constant 0 : index
    %c0_19 = arith.constant 0 : index
    %25 = vector.load %arg4[%24, %c0_18, %c0_19] : memref<16x512x128xbf16, #tpu.memory_space<vmem>>, vector<1x512x128xbf16>
    %26 = vector.shape_cast %25 : vector<1x512x128xbf16> to vector<512x128xbf16>
    %cst_20 = arith.constant dense<0.000000e+00> : vector<2x128xf32>
    %27 = tpu.matmul %21, %26, %cst_20 {dimension_numbers = #tpu.dot_dimension_numbers<[1], [0], [0], [1], [0, 0, 1, 1], [], []>} : vector<2x512xbf16>, vector<512x128xbf16>, vector<2x128xf32> -> vector<2x128xf32>
    %28 = arith.addf %19, %27 : vector<2x128xf32>
    %c0_21 = arith.constant 0 : index
    %c0_22 = arith.constant 0 : index
    %c3 = arith.constant 3 : index
    %c0_23 = arith.constant 0 : index
    %29 = vector.load %arg3[%c0_21, %c0_22, %c3, %c0_23] : memref<1x1x5x512xbf16, #tpu.memory_space<vmem>>, vector<1x1x2x512xbf16>
    %30 = vector.shape_cast %29 : vector<1x1x2x512xbf16> to vector<2x512xbf16>
    %c4_i32_24 = arith.constant 4 : i32
    %31 = arith.muli %arg2, %c4_i32_24 : i32
    %c3_i32 = arith.constant 3 : i32
    %32 = arith.addi %31, %c3_i32 : i32
    %33 = arith.index_cast %32 : i32 to index
    %c0_25 = arith.constant 0 : index
    %c0_26 = arith.constant 0 : index
    %34 = vector.load %arg4[%33, %c0_25, %c0_26] : memref<16x512x128xbf16, #tpu.memory_space<vmem>>, vector<1x512x128xbf16>
    %35 = vector.shape_cast %34 : vector<1x512x128xbf16> to vector<512x128xbf16>
    %cst_27 = arith.constant dense<0.000000e+00> : vector<2x128xf32>
    %36 = tpu.matmul %30, %35, %cst_27 {dimension_numbers = #tpu.dot_dimension_numbers<[1], [0], [0], [1], [0, 0, 1, 1], [], []>} : vector<2x512xbf16>, vector<512x128xbf16>, vector<2x128xf32> -> vector<2x128xf32>
    %37 = arith.addf %28, %36 : vector<2x128xf32>
    %c0_28 = arith.constant 0 : index
    %c0_29 = arith.constant 0 : index
    %38 = vector.load %arg7[%c0_28, %c0_29] : memref<2x128xf32, #tpu.memory_space<vmem>>, vector<2x128xf32>
    %39 = arith.addf %38, %37 : vector<2x128xf32>
    %c0_30 = arith.constant 0 : index
    %c0_31 = arith.constant 0 : index
    %40 = vector.load %arg7[%c0_30, %c0_31] : memref<2x128xf32, #tpu.memory_space<vmem>>, vector<2x128xf32>
    tpu.vector_store %arg7[%c0_30, %c0_31], %39 {strides = array<i32>} : memref<2x128xf32, #tpu.memory_space<vmem>>, vector<2x128xf32>,
    %c3_i32_32 = arith.constant 3 : i32
    %41 = arith.cmpi eq, %arg2, %c3_i32_32 : i32
    %42 = arith.extui %41 : i1 to i32
    %c0_i32_33 = arith.constant 0 : i32
    %43 = arith.cmpi ne, %42, %c0_i32_33 : i32
    scf.if %43 {
      %c0_34 = arith.constant 0 : index
      %c0_35 = arith.constant 0 : index
      %44 = vector.load %arg7[%c0_34, %c0_35] : memref<2x128xf32, #tpu.memory_space<vmem>>, vector<2x128xf32>
      %c0_36 = arith.constant 0 : index
      %c0_37 = arith.constant 0 : index
      %45 = vector.load %arg5[%c0_36, %c0_37] : memref<1x128xf32, #tpu.memory_space<vmem>>, vector<1x128xf32>
      %46 = vector.broadcast %45 : vector<1x128xf32> to vector<2x128xf32>
      %47 = arith.addf %44, %46 : vector<2x128xf32>
      %cst_38 = arith.constant 0.000000e+00 : f32
      %48 = vector.broadcast %cst_38 : f32 to vector<2x128xf32>
      %49 = arith.subf %48, %47 : vector<2x128xf32>
      %50 = math.exp %49 : vector<2x128xf32>
      %cst_39 = arith.constant 1.000000e+00 : f32
      %51 = vector.broadcast %cst_39 : f32 to vector<2x128xf32>
      %52 = arith.addf %51, %50 : vector<2x128xf32>
      %53 = tpu.reciprocal %52 {approx = true} : vector<2x128xf32> -> vector<2x128xf32>
      %54 = arith.truncf %53 : vector<2x128xf32> to vector<2x128xbf16>
      %c0_40 = arith.constant 0 : index
      %c0_41 = arith.constant 0 : index
      %c0_42 = arith.constant 0 : index
      %c0_43 = arith.constant 0 : index
      %55 = vector.load %arg6[%c0_40, %c0_41, %c0_42, %c0_43] : memref<1x1x2x128xbf16, #tpu.memory_space<vmem>>, vector<1x1x2x128xbf16>
      %56 = vector.shape_cast %55 : vector<1x1x2x128xbf16> to vector<2x128xbf16>
      %57 = vector.shape_cast %54 : vector<2x128xbf16> to vector<1x1x2x128xbf16>
      tpu.vector_store %arg6[%c0_40, %c0_41, %c0_42, %c0_43], %57 {strides = array<i32>} : memref<1x1x2x128xbf16, #tpu.memory_space<vmem>>, vector<1x1x2x128xbf16>,
    } else {
    }
    return
  }
  func.func @transform_0(%arg0: i32, %arg1: i32, %arg2: i32) -> (i32, i32, i32, i32) {
    %0 = arith.addi %arg1, %arg2 : i32
    %c0_i32 = arith.constant 0 : i32
    %c0_i32_0 = arith.constant 0 : i32
    %c0_i32_1 = arith.constant 0 : i32
    return %arg0, %0, %c0_i32, %c0_i32_0 : i32, i32, i32, i32
  }
  func.func @transform_1(%arg0: i32, %arg1: i32, %arg2: i32) -> (i32, i32, i32) {
    %c0_i32 = arith.constant 0 : i32
    %c0_i32_0 = arith.constant 0 : i32
    %c0_i32_1 = arith.constant 0 : i32
    %c0_i32_2 = arith.constant 0 : i32
    return %c0_i32, %c0_i32_0, %c0_i32_1 : i32, i32, i32
  }
  func.func @transform_2(%arg0: i32, %arg1: i32, %arg2: i32) -> (i32, i32) {
    %c0_i32 = arith.constant 0 : i32
    %c0_i32_0 = arith.constant 0 : i32
    %c0_i32_1 = arith.constant 0 : i32
    return %c0_i32, %c0_i32_0 : i32, i32
  }
  func.func @transform_3(%arg0: i32, %arg1: i32, %arg2: i32) -> (i32, i32, i32, i32) {
    %c0_i32 = arith.constant 0 : i32
    %c0_i32_0 = arith.constant 0 : i32
    %c0_i32_1 = arith.constant 0 : i32
    return %arg0, %arg1, %c0_i32, %c0_i32_0 : i32, i32, i32, i32
  }
}

</mosaic_0001>

<bundles_post_ra>
// kernel: patch_discriminator.8
= control target key start
LH: loop header
LB: loop body
LE: loop exit
PB: predicated region body
PF: predicated region fallthrough
CT: control target
= control target key end

     0   :  { %s712_s12 = smov 0   ;;  %s714_s13 = smov 0   ;;  %s801_s0 = inlined_call_operand.vmem [shape: bf16[2,17,17,12], index: 0, kind: input, shape index: {}]   ;;  %s802_s1 = inlined_call_operand.vmem [shape: bf16[4,12,128], index: 1, kind: input, shape index: {}]   ;;  %s803_s2 = inlined_call_operand.vmem [shape: f32[1,128], index: 2, kind: input, shape index: {}]   ;;  %s804_s3 = inlined_call_operand.vmem [shape: bf16[2,16,16,128], index: 3, kind: output, shape index: {}]  }
   0x1   :  { %s716_s14 = smov 0   ;;  %s718_s15 = smov 0  }
   0x2   :  { %s720_s16 = smov 0   ;;  %s722_s17 = smov 0  }
   0x3   :  { %s724_s18 = smov 0  }
   0x4 LB: > { %s25_s19 = sadd.s32 1, %s675_s15  ;;  %s28_s20 = sadd.s32 1, %s679_s16  ;;  %s687_s18 = sphi %s724_s18, %s13_s18   ;;  %s683_s17 = sphi %s722_s17, %s810_s17   ;;  %s679_s16 = sphi %s720_s16, %s809_s16   ;;  %s675_s15 = sphi %s718_s15, %s808_s15   ;;  %s671_s14 = sphi %s716_s14, %s807_s14   ;;  %s667_s13 = sphi %s714_s13, %s806_s13   ;;  %s663_s12 = sphi %s712_s12, %s805_s12  }
   0x5   : > { %p26_p0 = scmp.ge.s32.totalorder %s25_s19, 2  ;;  %p517_p1 = scmp.ge.s32.totalorder %s687_s18, 1 }
   0x6   : > { %p168_p2 = scmp.lt.s32.totalorder %s687_s18, 65  ;;  %s32_s21 = sadd.s32 1, %s683_s17 }
   0x7   : > { %s812_s19 = smov (%p26_p0, %s25_s19), 0  ;;  %s814_s20 = smov (!%p26_p0, %s28_s20), %s679_s16 }
   0x8   : > { %p169_p3 = pnand %p517_p1, %p168_p2  ;;  %p30_p4 = scmp.ge.s32.totalorder %s814_s20, 16 }
   0x9   : > { %s201_s22 = sadd.s32 (!%p169_p3), %s663_s12, %s667_s13  ;;  %p202_p6 = scmp.lt.s32.totalorder (!%p169_p3), %s671_s14, 1 }
   0xa   : > { %s816_s20 = smov (%p30_p4, %s814_s20), 0  ;;  %s818_s21 = smov (!%p30_p4, %s32_s21), %s683_s17 }
   0xb   : > { %p34_p5 = scmp.ge.s32.totalorder %s818_s21, 2  ;;  %172 = sbr.rel (%p169_p3) target bundleno = 270 (0x10e), region = 32 }
   0xc   : > { %p204_p7 = scmp.lt.s32.totalorder (!%p169_p3), %s201_s22, 16  ;;  %p214_p8 = scmp.lt.s32.totalorder (!%p169_p3), %s667_s13, 15 }
   0xd   : > { %s820_s21 = smov (%p34_p5, %s818_s21), 0  ;;  %p522_p9 = scmp.ne.s32.totalorder (!%p169_p3), %s663_s12, 0 }
  0x12   : > { %s822_s14 = smov (!%p202_p6, %s671_s14), 1  ;;  %s824_s22 = smov (!%p204_p7, %s201_s22), 16 }
  0x13   : > { %s569_s23 = smul.u32 51, %s822_s14  ;;  %s520_s25 = sshll.u32 %s822_s14, 5  ;;  %v689_v0 = vmov (!%p522_p9), 0.0  }
  0x14   : > { %s568_s24 = smul.u32 3, %s824_s22  ;;  %s826_s13 = smov (!%p214_p8, %s667_s13), 15  ;;  %226 = vst [vmem:[#allocation2] sm:$0xff] (!%p522_p9), %v689_v0  ;;  %227 = vst [vmem:[#allocation2 + $0x8] sm:$0xff] (!%p522_p9), %v689_v0 }
  0x15   : > { %s519_s28 = sshll.u32 %s826_s13, 1  ;;  %225 = sbr.rel (%p522_p9) target bundleno = 28 (0x1c), region = 36 }
  0x16   : > { %s208_s26 = sadd.s32 %s569_s23, %s568_s24  ;;  %s218_s5 = sadd.s32 %s520_s25, %s519_s28 }
  0x17   : > { %s518_s27 = sshll.u32 %s208_s26, 2  ;;  %s521_s6 = sshll.u32 %s218_s5, 2 }
  0x18   : > { %s210_s4 = scalar_lea.vmem %s801_s0, %s518_s27  ;;  %s768_s9 = scalar_lea.vmem %s804_s3, %s521_s6 }
  0x1c PF: > { %s543_s10 = sshll.u32 %s663_s12, 4  ;;  %v690_v1 = vmov 0.0   ;;  %vm273_vm0 = vcmask 1045504   ;;  %v631_v2 = vld [vmem:[%s210_s4] sm:$0xff]   ;;  %vm691_vm1 = vmmov 0   ;;  %vm269_vm2 = vcmask 97280  }
  0x1d   : > { %562 = vmatprep.subr.bf16.mxu1 %v690_v1  ;;  %556 = vmatprep.subr.bf16.mxu0 %v690_v1  ;;  %s233_s14 = scalar_lea.vmem %s802_s1, %s543_s10  ;;  %v632_v6 = vld [vmem:[%s210_s4 + $0x8] ss:$0 sps:$4 sm:$0x11]   ;;  %v253_v8 = vshrl.u32 %v631_v2, 16  ;;  %v255_v9 = vshll.u32 %v631_v2, 16  ;;  %v369_v20 = vld [vmem:[#allocation2] sm:$0xff] }
  0x1e   : > { %v629_v3 = vld [vmem:[%s233_s14] sm:$0x3f]   ;;  %564 = vmatprep.mubr.msk.bf16.mxu1 %vm691_vm1, %v690_v1  ;;  %558 = vmatprep.mubr.msk.bf16.mxu0 %vm691_vm1, %v690_v1  ;;  %v630_v4 = vld [vmem:[%s233_s14 + $0x8] sm:$0x3f]   ;;  %v260_v10 = vshll.u32 %v632_v6, 16  ;;  %p536_p10 = scmp.ne.s32.totalorder %s663_s12, 1 }
  0x1f   : > { %v326_v5 = vsel %vm273_vm0, %v629_v3, 0  ;;  %v275_v7 = vsel %vm273_vm0, %v630_v4, 0  ;;  %v257_v11 = vrot.slane %v255_v9, 1  ;;  %vm251_vm3 = vsmask.f32 7424  ;;  %v370_v24 = vld [vmem:[#allocation2 + $0x8] sm:$0xff] }
  0x20   : > { %563 = vmatpush3.bf16.msra.mxu1 %v326_v5  ;;  %557 = vmatpush3.bf16.msra.mxu0 %v275_v7  ;;  %v262_v12 = vrot.slane %v260_v10, 1  ;;  %v537_v31 = vld [vmem:[%s803_s2] ss:$0 sm:$0xff] (!%p536_p10) }
  0x21   : > { %v258_v13 = vor.u32 %v257_v11, %v253_v8 }
  0x23   : > { %565 = vmatmul.mubr.msk.bf16.vlgmr.msra.gmra.mrb[0].mxu1 %vm269_vm2, %v631_v2  ;;  %v263_v14 = vsel %vm251_vm3, %v258_v13, %v262_v12 }
  0x24   : > { %559 = vmatmul.mubr.msk.bf16.vlgmr.msra.gmra.mrb[0].mxu0 %vm269_vm2, %v263_v14 }
  0xf6   : > { %v362_v15 = vpop.f32.mrb[0].mxu1 }
  0xf7   : > { %v566_v16 = vpop.f32.mrb[1].mxu1  ;;  %v311_v19 = vpop.f32.mrb[0].mxu0 }
  0xf8   : > { %v365_v17 = vpop.f32.mrb[2].mxu1  ;;  %v363_v21 = vadd.f32 %v362_v15, %v311_v19  ;;  %v560_v22 = vpop.f32.mrb[1].mxu0  ;;  %378 = sbr.rel (%p536_p10) target bundleno = 270 (0x10e), region = 40 }
  0xf9   : > { %v567_v18 = vpop.f32.mrb[3].mxu1  ;;  %v314_v23 = vpop.f32.mrb[2].mxu0 }
  0xfa   : > { %v371_v25 = vadd.f32 %v369_v20, %v363_v21  ;;  %v366_v26 = vadd.f32 %v365_v17, %v314_v23  ;;  %v561_v27 = vpop.f32.mrb[3].mxu0 }
  0xfc   : > { %373 = vst [vmem:[#allocation2] sm:$0xff] %v371_v25  ;;  %v372_v28 = vadd.f32 %v370_v24, %v366_v26 }
  0xfe   : > { %374 = vst [vmem:[#allocation2 + $0x8] sm:$0xff] %v372_v28 }
 0x103   : > { %v379_v29 = vld [vmem:[#allocation2] sm:$0xff] }
 0x104   : > { %v388_v32 = vadd.f32 %v537_v31, %v379_v29 }
 0x105   : > { %v380_v30 = vld [vmem:[#allocation2 + $0x8] sm:$0xff] }
 0x106   : > { %v389_v33 = vadd.f32 %v537_v31, %v380_v30  ;;  %vm390_vm4 = vcmp.gt.f32.partialorder %v388_v32, 0.0  ;;  %v392_v34 = vmul.f32 0.2, %v388_v32 }
 0x108   : > { %vm391_vm5 = vcmp.gt.f32.partialorder %v389_v33, 0.0  ;;  %v393_v35 = vmul.f32 0.2, %v389_v33  ;;  %v394_v36 = vsel %vm390_vm4, %v388_v32, %v392_v34 }
 0x10a   : > { %v395_v37 = vsel %vm391_vm5, %v389_v33, %v393_v35 }
 0x10b   : > { %v550_v38 = vpack.c.bf16 %v395_v37, %v394_v36 }
 0x10d   : > { %551 = vst [vmem:[%s768_s9] sm:$0xff] %v550_v38  }
 0x10e PF: > { %s13_s18 = sadd.s32 1, %s687_s18   ;;  %s805_s12 = smov %s675_s15 }
 0x10f   : > { %p10_p11 = scmp.ge.s32.totalorder %s13_s18, 66   ;;  %s806_s13 = smov %s679_s16 }
 0x110   : > { %s807_s14 = smov %s683_s17  ;;  %s808_s15 = smov %s812_s19 }
 0x111   : > { %s809_s16 = smov %s816_s20  ;;  %s810_s17 = smov %s820_s21 }
 0x112   :  { %12 = sbr.rel (!%p10_p11) target bundleno = 4 (0x4), region = 72 }

// kernel: patch_discriminator.10
= control target key start
LH: loop header
LB: loop body
LE: loop exit
PB: predicated region body
PF: predicated region fallthrough
CT: control target
= control target key end

     0   :  { %s508_s12 = smov 0   ;;  %s510_s13 = smov 0   ;;  %s554_s0 = inlined_call_operand.vmem [shape: bf16[2,8,8,128], index: 0, kind: input, shape index: {}]   ;;  %s555_s1 = inlined_call_operand.vmem [shape: f32[1,128], index: 1, kind: input, shape index: {}]   ;;  %s556_s2 = inlined_call_operand.vmem [shape: f32[1,128], index: 2, kind: input, shape index: {}]   ;;  %s557_s3 = inlined_call_operand.vmem [shape: bf16[2,8,8,128], index: 3, kind: output, shape index: {}]  }
   0x1   :  { %s512_s14 = smov 0  }
   0x2 LB: > { %s25_s15 = sadd.s32 1, %s482_s13  ;;  %p387_p0 = scmp.ge.s32.totalorder %s486_s14, 1  ;;  %s486_s14 = sphi %s512_s14, %s13_s14   ;;  %s482_s13 = sphi %s510_s13, %s559_s13   ;;  %s478_s12 = sphi %s508_s12, %s558_s12  }
   0x3   : > { %p27_p1 = scmp.ge.s32.totalorder %s25_s15, 2  ;;  %p158_p2 = scmp.lt.s32.totalorder %s486_s14, 3 }
   0x5   : > { %s561_s15 = smov (%p27_p1, %s25_s15), 0  ;;  %p159_p3 = pnand %p387_p0, %p158_p2 }
   0x6   : > { %p191_p4 = scmp.lt.s32.totalorder (!%p159_p3), %s478_s12, 1  ;;  %v392_v0 = vld [vmem:[%s555_s1] ss:$0 sm:$0xff] (!%p159_p3) }
   0x7   : > { %162 = sbr.rel (%p159_p3) target bundleno = 35 (0x23), region = 32  ;;  %v393_v13 = vld [vmem:[%s556_s2] ss:$0 sm:$0xff] (!%p159_p3) }
   0xe   : > { %s563_s12 = smov (!%p191_p4, %s478_s12), 1 }
   0xf   : > { %s396_s16 = sshll.u32 %s563_s12, 5 }
  0x10   : > { %s198_s19 = scalar_lea.vmem %s554_s0, %s396_s16  ;;  %s208_s26 = scalar_lea.vmem %s557_s3, %s396_s16 }
  0x11   : > { %v399_v1 = vld [vmem:[%s198_s19] sm:$0xff]   ;;  %v434_v2 = vld [vmem:[%s198_s19 + $0x8] sm:$0xff]   ;;  %v435_v3 = vld [vmem:[%s198_s19 + $0x10] sm:$0xff]  }
  0x12   : > { %v400_v4 = vunpack.c.l.bf16 %v399_v1  ;;  %v401_v5 = vunpack.c.h.bf16 %v399_v1  ;;  %v404_v6 = vunpack.c.l.bf16 %v434_v2  ;;  %v405_v7 = vunpack.c.h.bf16 %v434_v2  ;;  %v436_v8 = vld [vmem:[%s198_s19 + $0x18] sm:$0xff]  }
  0x13   : > { %v408_v9 = vunpack.c.l.bf16 %v435_v3  ;;  %v409_v10 = vunpack.c.h.bf16 %v435_v3  ;;  %v412_v11 = vunpack.c.l.bf16 %v436_v8  ;;  %v413_v12 = vunpack.c.h.bf16 %v436_v8 }
  0x14   : > { %v233_v14 = vmul.f32 %v400_v4, %v392_v0  ;;  %v234_v15 = vmul.f32 %v401_v5, %v392_v0  ;;  %v235_v16 = vmul.f32 %v404_v6, %v392_v0  ;;  %v236_v17 = vmul.f32 %v405_v7, %v392_v0 }
  0x15   : > { %v237_v18 = vmul.f32 %v408_v9, %v392_v0  ;;  %v238_v19 = vmul.f32 %v409_v10, %v392_v0  ;;  %v239_v20 = vmul.f32 %v412_v11, %v392_v0  ;;  %v240_v21 = vmul.f32 %v413_v12, %v392_v0 }
  0x16   : > { %v248_v22 = vadd.f32 %v393_v13, %v233_v14  ;;  %v249_v23 = vadd.f32 %v393_v13, %v234_v15  ;;  %v250_v24 = vadd.f32 %v393_v13, %v235_v16  ;;  %v251_v25 = vadd.f32 %v393_v13, %v236_v17 }
  0x17   : > { %v252_v26 = vadd.f32 %v393_v13, %v237_v18  ;;  %v253_v27 = vadd.f32 %v393_v13, %v238_v19  ;;  %v254_v28 = vadd.f32 %v393_v13, %v239_v20  ;;  %v255_v29 = vadd.f32 %v393_v13, %v240_v21 }
  0x18   : > { %vm256_vm0 = vcmp.gt.f32.partialorder %v248_v22, 0.0  ;;  %vm257_vm1 = vcmp.gt.f32.partialorder %v249_v23, 0.0  ;;  %v264_v30 = vmul.f32 0.2, %v248_v22  ;;  %v265_v31 = vmul.f32 0.2, %v249_v23 }
  0x19   : > { %vm258_vm2 = vcmp.gt.f32.partialorder %v250_v24, 0.0  ;;  %vm259_vm3 = vcmp.gt.f32.partialorder %v251_v25, 0.0  ;;  %v266_v32 = vmul.f32 0.2, %v250_v24  ;;  %v267_v33 = vmul.f32 0.2, %v251_v25 }
  0x1a   : > { %v272_v34 = vsel %vm256_vm0, %v248_v22, %v264_v30  ;;  %v273_v35 = vsel %vm257_vm1, %v249_v23, %v265_v31  ;;  %vm260_vm4 = vcmp.gt.f32.partialorder %v252_v26, 0.0  ;;  %vm261_vm5 = vcmp.gt.f32.partialorder %v253_v27, 0.0 }
  0x1b   : > { %v417_v36 = vpack.c.bf16 %v273_v35, %v272_v34  ;;  %v274_v37 = vsel %vm258_vm2, %v250_v24, %v266_v32  ;;  %v275_v38 = vsel %vm259_vm3, %v251_v25, %v267_v33  ;;  %v268_v39 = vmul.f32 0.2, %v252_v26 }
  0x1c   : > { %v422_v40 = vpack.c.bf16 %v275_v38, %v274_v37  ;;  %v269_v41 = vmul.f32 0.2, %v253_v27  ;;  %vm262_vm6 = vcmp.gt.f32.partialorder %v254_v28, 0.0  ;;  %vm263_vm7 = vcmp.gt.f32.partialorder %v255_v29, 0.0 }
  0x1d   : > { %418 = vst [vmem:[%s208_s26] sm:$0xff] %v417_v36   ;;  %v276_v42 = vsel %vm260_vm4, %v252_v26, %v268_v39  ;;  %v270_v43 = vmul.f32 0.2, %v254_v28  ;;  %v271_v44 = vmul.f32 0.2, %v255_v29 }
  0x1e   : > { %437 = vst [vmem:[%s208_s26 + $0x8] sm:$0xff] %v422_v40   ;;  %v277_v45 = vsel %vm261_vm5, %v253_v27, %v269_v41 }
  0x1f   : > { %v427_v46 = vpack.c.bf16 %v277_v45, %v276_v42  ;;  %v278_v47 = vsel %vm262_vm6, %v254_v28, %v270_v43  ;;  %v279_v48 = vsel %vm263_vm7, %v255_v29, %v271_v44 }
  0x20   : > { %v432_v49 = vpack.c.bf16 %v279_v48, %v278_v47 }
  0x21   : > { %438 = vst [vmem:[%s208_s26 + $0x10] sm:$0xff] %v427_v46  }
  0x22   : > { %439 = vst [vmem:[%s208_s26 + $0x18] sm:$0xff] %v432_v49  }
  0x23 PF: > { %s13_s14 = sadd.s32 1, %s486_s14   ;;  %s558_s12 = smov %s482_s13 }
  0x24   : > { %p10_p5 = scmp.ge.s32.totalorder %s13_s14, 4   ;;  %s559_s13 = smov %s561_s15 }
  0x26   :  { %12 = sbr.rel (!%p10_p5) target bundleno = 2 (0x2), region = 62 }

// kernel: patch_discriminator.9
= control target key start
LH: loop header
LB: loop body
LE: loop exit
PB: predicated region body
PF: predicated region fallthrough
CT: control target
= control target key end

     0   :  { %s1182_s15 = smov 0   ;;  %s1184_s16 = smov 0   ;;  %s1331_s0 = inlined_call_operand.vmem [shape: bf16[2,9,9,256], index: 0, kind: input, shape index: {}]   ;;  %s1332_s1 = inlined_call_operand.vmem [shape: bf16[4,256,128], index: 1, kind: input, shape index: {}]   ;;  %s1333_s2 = inlined_call_operand.vmem [shape: bf16[2,8,8,128], index: 2, kind: output, shape index: {0}]   ;;  %s1334_s3 = inlined_call_operand.vmem [shape: f32[2,8,1,128], index: 3, kind: output, shape index: {1}]   ;;  %s1335_s4 = inlined_call_operand.vmem [shape: f32[2,8,1,128], index: 4, kind: output, shape index: {2}]  }
   0x1   :  { %s1186_s17 = smov 0   ;;  %s1188_s18 = smov 0  }
   0x2   :  { %s1190_s19 = smov 0   ;;  %s1192_s20 = smov 0  }
   0x3   :  { %s1194_s21 = smov 0  }
   0x4 LB: > { %s27_s22 = sadd.s32 1, %s1142_s18  ;;  %s30_s23 = sadd.s32 1, %s1146_s19  ;;  %s1154_s21 = sphi %s1194_s21, %s15_s21   ;;  %s1150_s20 = sphi %s1192_s20, %s1341_s20   ;;  %s1146_s19 = sphi %s1190_s19, %s1340_s19   ;;  %s1142_s18 = sphi %s1188_s18, %s1339_s18   ;;  %s1138_s17 = sphi %s1186_s17, %s1338_s17   ;;  %s1134_s16 = sphi %s1184_s16, %s1337_s16   ;;  %s1130_s15 = sphi %s1182_s15, %s1336_s15  }
   0x5   : > { %p28_p0 = scmp.ge.s32.totalorder %s27_s22, 2  ;;  %p875_p1 = scmp.ge.s32.totalorder %s1154_s21, 1 }
   0x6   : > { %p202_p2 = scmp.lt.s32.totalorder %s1154_s21, 33  ;;  %s34_s24 = sadd.s32 1, %s1150_s20 }
   0x7   : > { %s1343_s22 = smov (%p28_p0, %s27_s22), 0  ;;  %s1345_s23 = smov (!%p28_p0, %s30_s23), %s1146_s19 }
   0x8   : > { %p203_p3 = pnand %p875_p1, %p202_p2  ;;  %p32_p4 = scmp.ge.s32.totalorder %s1345_s23, 8 }
   0x9   : > { %s250_s25 = sadd.s32 (!%p203_p3), %s1130_s15, %s1134_s16  ;;  %p251_p6 = scmp.lt.s32.totalorder (!%p203_p3), %s1138_s17, 1 }
   0xa   : > { %s1347_s23 = smov (%p32_p4, %s1345_s23), 0  ;;  %s1349_s24 = smov (!%p32_p4, %s34_s24), %s1150_s20 }
   0xb   : > { %p36_p5 = scmp.ge.s32.totalorder %s1349_s24, 2  ;;  %206 = sbr.rel (%p203_p3) target bundleno = 311 (0x137), region = 28 }
   0xc   : > { %p253_p7 = scmp.lt.s32.totalorder (!%p203_p3), %s250_s25, 8  ;;  %p263_p8 = scmp.lt.s32.totalorder (!%p203_p3), %s1134_s16, 7 }
   0xd   : > { %s1351_s24 = smov (%p36_p5, %s1349_s24), 0  ;;  %p882_p9 = scmp.ne.s32.totalorder (!%p203_p3), %s1130_s15, 0 }
  0x12   : > { %s1353_s17 = smov (!%p251_p6, %s1138_s17), 1  ;;  %s1355_s25 = smov (!%p253_p7, %s250_s25), 8 }
  0x13   : > { %s1006_s26 = smul.u32 36, %s1353_s17  ;;  %s876_s27 = sshll.u32 %s1355_s25, 2  ;;  %v1156_v0 = vmov (!%p882_p9), 0.0  }
  0x14   : > { %s878_s7 = sshll.u32 %s1353_s17, 3  ;;  %s1357_s16 = smov (!%p263_p8, %s1134_s16), 7  ;;  %288 = vst [vmem:[#allocation2] sm:$0xff] (!%p882_p9), %v1156_v0 }
  0x15   : > { %s257_s28 = sadd.s32 %s1006_s26, %s876_s27  ;;  %s1235_s8 = sadd.s32 %s878_s7, %s1357_s16 }
  0x16   : > { %s877_s29 = sshll.u32 %s257_s28, 2  ;;  %s879_s9 = sshll.u32 %s1235_s8, 2 }
  0x17   : > { %s259_s6 = scalar_lea.vmem %s1331_s0, %s877_s29  ;;  %s275_s12 = scalar_lea.vmem %s1334_s3, %s1235_s8 }
  0x18   : > { %s1245_s25 = scalar_lea.vmem %s1333_s2, %s879_s9  ;;  %s282_s17 = scalar_lea.vmem %s1335_s4, %s1235_s8 }
  0x19   : > { %287 = sbr.rel (%p882_p9) target bundleno = 32 (0x20), region = 32 }
  0x20 PF: > { %s960_s16 = sshll.u32 %s1130_s15, 8  ;;  %v1253_v1 = vld [vmem:[%s259_s6] sm:$0xff]  ;;  %v326_v2 = vld [vmem:[%s259_s6 + $0x8] sm:$0x11]  ;;  %p956_p10 = scmp.ne.s32.totalorder %s1130_s15, 1 }
  0x21   : > { %s1258_s30 = scalar_lea.vmem %s1332_s1, %s960_s16  ;;  %v921_v3 = vcombine.high %v1253_v1, %v326_v2  ;;  %v939_v4 = vcombine.high %v1253_v1, %v1253_v1  ;;  %v920_v29 = vcombine.low %v1253_v1, %v326_v2  ;;  %v938_v46 = vcombine.low %v1253_v1, %v1253_v1  ;;  %v663_v56 = vld [vmem:[#allocation2] sm:$0xff] }
  0x22   : > { %v1064_v5 = vld [vmem:[%s1258_s30 + $0xc0] sm:$0xff]   ;;  %v1068_v11 = vld [vmem:[%s1258_s30 + $0xc8] sm:$0xff]   ;;  %v1072_v17 = vld [vmem:[%s1258_s30 + $0xd0] sm:$0xff]  }
  0x23   : > { %v1065_v6 = vld [vmem:[%s1258_s30 + $0x40] sm:$0xff]   ;;  %v379_v7 = vshrl.u32 %v921_v3, 16  ;;  %655 = vmatprep.mubr.bf16.mxu1 %v939_v4  ;;  %962 = vmatprep.subr.bf16.mxu0 %v1064_v5  ;;  %v381_v9 = vshll.u32 %v921_v3, 16  ;;  %v1069_v13 = vld [vmem:[%s1258_s30 + $0x48] sm:$0xff]   ;;  %v1073_v18 = vld [vmem:[%s1258_s30 + $0x50] sm:$0xff]   ;;  %v374_v34 = vshll.u32 %v920_v29, 16 }
  0x24   : > { %v1066_v8 = vld [vmem:[%s1258_s30 + $0x80] sm:$0xff]   ;;  %984 = vmatprep.subr.bf16.mxu1 %v1065_v6  ;;  %v1070_v14 = vld [vmem:[%s1258_s30 + $0x88] sm:$0xff]   ;;  %v1074_v19 = vld [vmem:[%s1258_s30 + $0x90] sm:$0xff]   ;;  %v372_v38 = vshrl.u32 %v920_v29, 16 }
  0x25   : > { %v1067_v10 = vld [vmem:[%s1258_s30] sm:$0xff]   ;;  %963 = vmatpush3.bf16.msra.mxu0 %v1066_v8  ;;  %v383_v12 = vrot.slane %v381_v9, 1  ;;  %v1071_v16 = vld [vmem:[%s1258_s30 + $0x8] sm:$0xff]   ;;  %v1075_v20 = vld [vmem:[%s1258_s30 + $0x10] sm:$0xff]   ;;  %v376_v40 = vrot.slane %v374_v34, 1 }
  0x26   : > { %985 = vmatpush3.bf16.msra.mxu1 %v1067_v10  ;;  %964 = vmatprep.subr.bf16.mxu0 %v1068_v11  ;;  %v1076_v21 = vld [vmem:[%s1258_s30 + $0xd8] sm:$0xff]   ;;  %v1080_v25 = vld [vmem:[%s1258_s30 + $0xe0] sm:$0xff]   ;;  %v1084_v30 = vld [vmem:[%s1258_s30 + $0xe8] sm:$0xff]  }
  0x27   : > { %v384_v15 = vor.u32 %v383_v12, %v379_v7  ;;  %986 = vmatprep.subr.bf16.mxu1 %v1069_v13  ;;  %v1077_v22 = vld [vmem:[%s1258_s30 + $0x58] sm:$0xff]   ;;  %v1081_v26 = vld [vmem:[%s1258_s30 + $0x60] sm:$0xff]   ;;  %v1085_v31 = vld [vmem:[%s1258_s30 + $0x68] sm:$0xff]   ;;  %v377_v45 = vor.u32 %v376_v40, %v372_v38 }
  0x28   : > { %v1078_v23 = vld [vmem:[%s1258_s30 + $0x98] sm:$0xff]   ;;  %v1082_v27 = vld [vmem:[%s1258_s30 + $0xa0] sm:$0xff]   ;;  %v1086_v32 = vld [vmem:[%s1258_s30 + $0xa8] sm:$0xff]  }
  0x29   : > { %965 = vmatpush3.bf16.msra.mxu0 %v1070_v14  ;;  %515 = vmatprep.mubr.bf16.mxu0 %v384_v15  ;;  %v1079_v24 = vld [vmem:[%s1258_s30 + $0x18] sm:$0xff]   ;;  %v1083_v28 = vld [vmem:[%s1258_s30 + $0x20] sm:$0xff]   ;;  %v1087_v33 = vld [vmem:[%s1258_s30 + $0x28] sm:$0xff]  }
  0x2a   : > { %987 = vmatpush3.bf16.msra.mxu1 %v1071_v16  ;;  %966 = vmatprep.subr.bf16.mxu0 %v1072_v17  ;;  %v1088_v35 = vld [vmem:[%s1258_s30 + $0xf0] sm:$0xff]   ;;  %v1092_v41 = vld [vmem:[%s1258_s30 + $0xf8] sm:$0xff]  }
  0x2b   : > { %988 = vmatprep.subr.bf16.mxu1 %v1073_v18  ;;  %v1089_v36 = vld [vmem:[%s1258_s30 + $0x70] sm:$0xff]   ;;  %v1093_v42 = vld [vmem:[%s1258_s30 + $0x78] sm:$0xff]  }
  0x2c   : > { %v1090_v37 = vld [vmem:[%s1258_s30 + $0xb0] sm:$0xff]   ;;  %v1094_v43 = vld [vmem:[%s1258_s30 + $0xb8] sm:$0xff]  }
  0x2d   : > { %967 = vmatpush3.bf16.msra.mxu0 %v1074_v19  ;;  %v1091_v39 = vld [vmem:[%s1258_s30 + $0x30] sm:$0xff]   ;;  %v1095_v44 = vld [vmem:[%s1258_s30 + $0x38] sm:$0xff]  }
  0x2e   : > { %989 = vmatpush3.bf16.msra.mxu1 %v1075_v20  ;;  %968 = vmatprep.subr.bf16.mxu0 %v1076_v21 }
  0x2f   : > { %990 = vmatprep.subr.bf16.mxu1 %v1077_v22 }
  0x31   : > { %969 = vmatpush3.bf16.msra.mxu0 %v1078_v23 }
  0x32   : > { %991 = vmatpush3.bf16.msra.mxu1 %v1079_v24  ;;  %970 = vmatprep.subr.bf16.mxu0 %v1080_v25 }
  0x33   : > { %992 = vmatprep.subr.bf16.mxu1 %v1081_v26 }
  0x35   : > { %971 = vmatpush3.bf16.msra.mxu0 %v1082_v27 }
  0x36   : > { %993 = vmatpush3.bf16.msra.mxu1 %v1083_v28  ;;  %972 = vmatprep.subr.bf16.mxu0 %v1084_v30 }
  0x37   : > { %994 = vmatprep.subr.bf16.mxu1 %v1085_v31 }
  0x39   : > { %973 = vmatpush3.bf16.msra.mxu0 %v1086_v32 }
  0x3a   : > { %995 = vmatpush3.bf16.msra.mxu1 %v1087_v33  ;;  %974 = vmatprep.subr.bf16.mxu0 %v1088_v35 }
  0x3b   : > { %996 = vmatprep.subr.bf16.mxu1 %v1089_v36 }
  0x3d   : > { %975 = vmatpush3.bf16.msra.mxu0 %v1090_v37 }
  0x3e   : > { %997 = vmatpush3.bf16.msra.mxu1 %v1091_v39  ;;  %976 = vmatprep.subr.bf16.mxu0 %v1092_v41 }
  0x3f   : > { %998 = vmatprep.subr.bf16.mxu1 %v1093_v42 }
  0x41   : > { %977 = vmatpush3.bf16.msra.mxu0 %v1094_v43 }
  0x42   : > { %999 = vmatpush3.bf16.msra.mxu1 %v1095_v44 }
  0x44   : > { %516 = vmatmul.mubr.bf16.vlgmr.msra.gmra.mrb[0].mxu0 %v377_v45 }
  0x45   : > { %656 = vmatmul.mubr.bf16.vlgmr.msra.gmra.mrb[0].mxu1 %v938_v46 }
 0x117   : > { %v978_v47 = vpop.f32.mrb[0].mxu0 }
 0x118   : > { %v1000_v48 = vpop.f32.mrb[0].mxu1  ;;  %v979_v49 = vpop.f32.mrb[1].mxu0 }
 0x119   : > { %v980_v50 = vadd.f32 %v979_v49, %v978_v47  ;;  %v1001_v51 = vpop.f32.mrb[1].mxu1  ;;  %v981_v52 = vpop.f32.mrb[2].mxu0 }
 0x11a   : > { %v1002_v53 = vadd.f32 %v1001_v51, %v1000_v48  ;;  %v1003_v54 = vpop.f32.mrb[2].mxu1  ;;  %v982_v55 = vpop.f32.mrb[3].mxu0  ;;  %669 = sbr.rel (%p956_p10) target bundleno = 311 (0x137), region = 36 }
 0x11b   : > { %v1004_v57 = vpop.f32.mrb[3].mxu1 }
 0x11c   : > { %v658_v58 = vadd.f32 %v1002_v53, %v980_v50 }
 0x11e   : > { %v664_v59 = vadd.f32 %v663_v56, %v658_v58 }
 0x120   : > { %665 = vst [vmem:[#allocation2] sm:$0xff] %v664_v59 }
 0x127   : > { %v670_v60 = vld [vmem:[#allocation2] sm:$0xff] }
 0x128   : > { %v671_v61 = vpack.c.bf16 %v670_v60, %v670_v60  ;;  %v673_v62 = vrot.slane %v670_v60, 4  ;;  %v680_v63 = vmul.f32 %v670_v60, %v670_v60 }
 0x12a   : > { %672 = vst [vmem:[%s1245_s25] sm:$0xf] %v671_v61  ;;  %v674_v0 = vadd.f32 %v673_v62, %v670_v60  ;;  %v681_v1 = vrot.slane %v680_v63, 4 }
 0x12c   : > { %v675_v2 = vrot.slane %v674_v0, 2  ;;  %v682_v3 = vadd.f32 %v681_v1, %v680_v63 }
 0x12e   : > { %v676_v4 = vadd.f32 %v675_v2, %v674_v0  ;;  %v683_v5 = vrot.slane %v682_v3, 2 }
 0x130   : > { %v677_v6 = vrot.slane %v676_v4, 1  ;;  %v684_v7 = vadd.f32 %v683_v5, %v682_v3 }
 0x132   : > { %v678_v8 = vadd.f32 %v677_v6, %v676_v4  ;;  %v685_v9 = vrot.slane %v684_v7, 1 }
 0x134   : > { %679 = vst [vmem:[%s275_s12] sm:$0x1] %v678_v8  ;;  %v686_v10 = vadd.f32 %v685_v9, %v684_v7 }
 0x136   : > { %687 = vst [vmem:[%s282_s17] sm:$0x1] %v686_v10 }
 0x137 PF: > { %s15_s21 = sadd.s32 1, %s1154_s21   ;;  %s1336_s15 = smov %s1142_s18 }
 0x138   : > { %p12_p11 = scmp.ge.s32.totalorder %s15_s21, 34   ;;  %s1337_s16 = smov %s1146_s19 }
 0x139   : > { %s1338_s17 = smov %s1150_s20  ;;  %s1339_s18 = smov %s1343_s22 }
 0x13a   : > { %s1340_s19 = smov %s1347_s23  ;;  %s1341_s20 = smov %s1351_s24 }
 0x13b   :  { %14 = sbr.rel (!%p12_p11) target bundleno = 4 (0x4), region = 92 }

// kernel: patch_discriminator.11
= control target key start
LH: loop header
LB: loop body
LE: loop exit
PB: predicated region body
PF: predicated region fallthrough
CT: control target
= control target key end

     0   :  { %s2180_s15 = smov 0   ;;  %s2182_s16 = smov 0   ;;  %s2447_s0 = inlined_call_operand.vmem [shape: bf16[2,5,5,512], index: 0, kind: input, shape index: {}]   ;;  %s2448_s1 = inlined_call_operand.vmem [shape: bf16[4,512,256], index: 1, kind: input, shape index: {}]   ;;  %s2449_s2 = inlined_call_operand.vmem [shape: bf16[2,4,4,256], index: 2, kind: output, shape index: {0}]   ;;  %s2450_s3 = inlined_call_operand.vmem [shape: f32[2,4,1,256], index: 3, kind: output, shape index: {1}]   ;;  %s2451_s4 = inlined_call_operand.vmem [shape: f32[2,4,1,256], index: 4, kind: output, shape index: {2}]  }
   0x1   :  { %s2184_s17 = smov 0   ;;  %s2186_s18 = smov 0  }
   0x2   :  { %s2188_s19 = smov 0   ;;  %s2190_s20 = smov 0  }
   0x3   :  { %s2192_s21 = smov 0  }
   0x4 LB: > { %s27_s22 = sadd.s32 1, %s2139_s18  ;;  %s30_s23 = sadd.s32 1, %s2143_s19  ;;  %s2151_s21 = sphi %s2192_s21, %s15_s21   ;;  %s2147_s20 = sphi %s2190_s20, %s2457_s20   ;;  %s2143_s19 = sphi %s2188_s19, %s2456_s19   ;;  %s2139_s18 = sphi %s2186_s18, %s2455_s18   ;;  %s2135_s17 = sphi %s2184_s17, %s2454_s17   ;;  %s2131_s16 = sphi %s2182_s16, %s2453_s16   ;;  %s2127_s15 = sphi %s2180_s15, %s2452_s15  }
   0x5   : > { %p28_p0 = scmp.ge.s32.totalorder %s27_s22, 2  ;;  %p1603_p1 = scmp.ge.s32.totalorder %s2151_s21, 1 }
   0x6   : > { %p202_p2 = scmp.lt.s32.totalorder %s2151_s21, 17  ;;  %s34_s24 = sadd.s32 1, %s2147_s20 }
   0x7   : > { %s2459_s22 = smov (%p28_p0, %s27_s22), 0  ;;  %s2461_s23 = smov (!%p28_p0, %s30_s23), %s2143_s19 }
   0x8   : > { %p203_p3 = pnand %p1603_p1, %p202_p2  ;;  %p32_p4 = scmp.ge.s32.totalorder %s2461_s23, 4 }
   0x9   : > { %s253_s25 = sadd.s32 (!%p203_p3), %s2127_s15, %s2131_s16  ;;  %p254_p6 = scmp.lt.s32.totalorder (!%p203_p3), %s2135_s17, 1 }
   0xa   : > { %s2463_s23 = smov (%p32_p4, %s2461_s23), 0  ;;  %s2465_s24 = smov (!%p32_p4, %s34_s24), %s2147_s20 }
   0xb   : > { %p36_p5 = scmp.ge.s32.totalorder %s2465_s24, 2  ;;  %206 = sbr.rel (%p203_p3) target bundleno = 416 (0x1a0), region = 28 }
   0xc   : > { %p256_p7 = scmp.lt.s32.totalorder (!%p203_p3), %s253_s25, 4  ;;  %p266_p8 = scmp.lt.s32.totalorder (!%p203_p3), %s2131_s16, 3 }
   0xd   : > { %s2467_s24 = smov (%p36_p5, %s2465_s24), 0  ;;  %p1613_p9 = scmp.ne.s32.totalorder (!%p203_p3), %s2127_s15, 0 }
  0x12   : > { %s2469_s17 = smov (!%p254_p6, %s2135_s17), 1  ;;  %s2471_s25 = smov (!%p256_p7, %s253_s25), 4 }
  0x13   : > { %s1837_s26 = smul.u32 20, %s2469_s17  ;;  %s1604_s27 = sshll.u32 %s2471_s25, 2  ;;  %v2153_v0 = vmov (!%p1613_p9), 0.0  }
  0x14   : > { %s1607_s7 = sshll.u32 %s2469_s17, 3  ;;  %s2473_s16 = smov (!%p266_p8, %s2131_s16), 3  ;;  %293 = vst [vmem:[#allocation2] sm:$0xff] (!%p1613_p9), %v2153_v0 }
  0x15   : > { %s260_s28 = sadd.s32 %s1837_s26, %s1604_s27  ;;  %s1606_s8 = sshll.u32 %s2473_s16, 1 }
  0x16   : > { %s1605_s29 = sshll.u32 %s260_s28, 2  ;;  %s2235_s9 = sadd.s32 %s1607_s7, %s1606_s8 }
  0x17   : > { %s2232_s6 = scalar_lea.vmem %s2447_s0, %s1605_s29  ;;  %s1608_s10 = sshll.u32 %s2235_s9, 1 }
  0x18   : > { %s280_s13 = scalar_lea.vmem %s2450_s3, %s2235_s9  ;;  %s2245_s26 = scalar_lea.vmem %s2449_s2, %s1608_s10 }
  0x19   : > { %s288_s17 = scalar_lea.vmem %s2451_s4, %s2235_s9  ;;  %292 = sbr.rel (%p1613_p9) target bundleno = 32 (0x20), region = 32 }
  0x20 PF: > { %s1825_s16 = sshll.u32 %s2127_s15, 10  ;;  %v2254_v1 = vld [vmem:[%s2232_s6] sm:$0x77]  ;;  %v2323_v63 = vld [vmem:[%s2232_s6 + $0x8] sm:$0x77]  ;;  %p1819_p10 = scmp.ne.s32.totalorder %s2127_s15, 1 }
  0x21   : > { %v2257_v2 = vld [vmem:[%s2232_s6] sm:$0x33]  ;;  %s2262_s5 = scalar_lea.vmem %s2448_s1, %s1825_s16  ;;  %v1684_v3 = vcombine.high %v2254_v1, %v2254_v1  ;;  %vm1323_vm0 = vcmask (!%p1819_p10), 1043456  }
  0x22   : > { %v1752_v4 = vcombine.high %v2257_v2, %v2257_v2  ;;  %v1896_v5 = vld [vmem:[%s2262_s5 + $0x204] ss:$8 sps:$4 sm:$0xff]   ;;  %v1900_v9 = vld [vmem:[%s2262_s5 + $0x200] ss:$8 sps:$4 sm:$0xff]   ;;  %v1902_v11 = vld [vmem:[%s2262_s5 + $0x214] ss:$8 sps:$4 sm:$0xff]  }
  0x23   : > { %v1898_v6 = vld [vmem:[%s2262_s5 + $0x4] ss:$8 sps:$4 sm:$0xff]   ;;  %v452_v7 = vshrl.u32 %v1684_v3, 16  ;;  %v454_v8 = vshll.u32 %v1684_v3, 16  ;;  %796 = vmatprep.subr.bf16.mxu1 %v1896_v5  ;;  %v1901_v10 = vld [vmem:[%s2262_s5] ss:$8 sps:$4 sm:$0xff]  }
  0x24   : > { %1244 = vmatprep.mubr.bf16.mxu0 %v1752_v4  ;;  %1212 = vmatprep.subr.bf16.mxu0 %v1898_v6  ;;  %v1904_v13 = vld [vmem:[%s2262_s5 + $0x14] ss:$8 sps:$4 sm:$0xff]   ;;  %v1906_v14 = vld [vmem:[%s2262_s5 + $0x210] ss:$8 sps:$4 sm:$0xff]   ;;  %v1908_v17 = vld [vmem:[%s2262_s5 + $0x224] ss:$8 sps:$4 sm:$0xff]   ;;  %v1683_v4 = vcombine.low %v2254_v1, %v2254_v1 }
  0x25   : > { %v456_v12 = vrot.slane %v454_v8, 1  ;;  %797 = vmatpush1.bf16.msra.mxu1 %v1900_v9  ;;  %1213 = vmatpush1.bf16.msra.mxu0 %v1901_v10  ;;  %v1907_v15 = vld [vmem:[%s2262_s5 + $0x10] ss:$8 sps:$4 sm:$0xff]   ;;  %v1910_v18 = vld [vmem:[%s2262_s5 + $0x24] ss:$8 sps:$4 sm:$0xff]  }
  0x26   : > { %798 = vmatprep.subr.bf16.mxu1 %v1902_v11  ;;  %1214 = vmatprep.subr.bf16.mxu0 %v1904_v13  ;;  %v1912_v19 = vld [vmem:[%s2262_s5 + $0x220] ss:$8 sps:$4 sm:$0xff]   ;;  %v1914_v21 = vld [vmem:[%s2262_s5 + $0x234] ss:$8 sps:$4 sm:$0xff]   ;;  %v1918_v23 = vld [vmem:[%s2262_s5 + $0x230] ss:$8 sps:$4 sm:$0xff]  }
  0x27   : > { %v457_v16 = vor.u32 %v456_v12, %v452_v7  ;;  %v1913_v20 = vld [vmem:[%s2262_s5 + $0x20] ss:$8 sps:$4 sm:$0xff]   ;;  %v1916_v22 = vld [vmem:[%s2262_s5 + $0x34] ss:$8 sps:$4 sm:$0xff]   ;;  %v1919_v24 = vld [vmem:[%s2262_s5 + $0x30] ss:$8 sps:$4 sm:$0xff]   ;;  %v1686_v7 = vcombine.high %v2323_v63, %v2323_v63 }
  0x28   : > { %v1920_v25 = vld [vmem:[%s2262_s5 + $0x244] ss:$8 sps:$4 sm:$0xff]   ;;  %v1924_v27 = vld [vmem:[%s2262_s5 + $0x240] ss:$8 sps:$4 sm:$0xff]   ;;  %v1926_v29 = vld [vmem:[%s2262_s5 + $0x254] ss:$8 sps:$4 sm:$0xff]  }
  0x29   : > { %828 = vmatprep.mubr.bf16.mxu1 %v457_v16  ;;  %799 = vmatpush1.bf16.msra.mxu1 %v1906_v14  ;;  %v1922_v26 = vld [vmem:[%s2262_s5 + $0x44] ss:$8 sps:$4 sm:$0xff]   ;;  %v1925_v28 = vld [vmem:[%s2262_s5 + $0x40] ss:$8 sps:$4 sm:$0xff]   ;;  %v1928_v30 = vld [vmem:[%s2262_s5 + $0x54] ss:$8 sps:$4 sm:$0xff]  }
  0x2a   : > { %1215 = vmatpush1.bf16.msra.mxu0 %v1907_v15  ;;  %800 = vmatprep.subr.bf16.mxu1 %v1908_v17  ;;  %v1930_v31 = vld [vmem:[%s2262_s5 + $0x250] ss:$8 sps:$4 sm:$0xff]   ;;  %v1932_v33 = vld [vmem:[%s2262_s5 + $0x264] ss:$8 sps:$4 sm:$0xff]   ;;  %v1936_v35 = vld [vmem:[%s2262_s5 + $0x260] ss:$8 sps:$4 sm:$0xff]  }
  0x2b   : > { %1216 = vmatprep.subr.bf16.mxu0 %v1910_v18  ;;  %v1931_v32 = vld [vmem:[%s2262_s5 + $0x50] ss:$8 sps:$4 sm:$0xff]   ;;  %v1934_v34 = vld [vmem:[%s2262_s5 + $0x64] ss:$8 sps:$4 sm:$0xff]   ;;  %v1937_v36 = vld [vmem:[%s2262_s5 + $0x60] ss:$8 sps:$4 sm:$0xff]  }
  0x2c   : > { %v1938_v37 = vld [vmem:[%s2262_s5 + $0x274] ss:$8 sps:$4 sm:$0xff]   ;;  %v1942_v39 = vld [vmem:[%s2262_s5 + $0x270] ss:$8 sps:$4 sm:$0xff]   ;;  %v1944_v41 = vld [vmem:[%s2262_s5 + $0x284] ss:$8 sps:$4 sm:$0xff]  }
  0x2d   : > { %801 = vmatpush1.bf16.msra.mxu1 %v1912_v19  ;;  %v1940_v38 = vld [vmem:[%s2262_s5 + $0x74] ss:$8 sps:$4 sm:$0xff]   ;;  %v1943_v40 = vld [vmem:[%s2262_s5 + $0x70] ss:$8 sps:$4 sm:$0xff]   ;;  %v1946_v42 = vld [vmem:[%s2262_s5 + $0x84] ss:$8 sps:$4 sm:$0xff]  }
  0x2e   : > { %1217 = vmatpush1.bf16.msra.mxu0 %v1913_v20  ;;  %802 = vmatprep.subr.bf16.mxu1 %v1914_v21  ;;  %v1948_v43 = vld [vmem:[%s2262_s5 + $0x280] ss:$8 sps:$4 sm:$0xff]   ;;  %v1950_v45 = vld [vmem:[%s2262_s5 + $0x294] ss:$8 sps:$4 sm:$0xff]   ;;  %v1954_v47 = vld [vmem:[%s2262_s5 + $0x290] ss:$8 sps:$4 sm:$0xff]  }
  0x2f   : > { %1218 = vmatprep.subr.bf16.mxu0 %v1916_v22  ;;  %v1949_v44 = vld [vmem:[%s2262_s5 + $0x80] ss:$8 sps:$4 sm:$0xff]   ;;  %v1952_v46 = vld [vmem:[%s2262_s5 + $0x94] ss:$8 sps:$4 sm:$0xff]   ;;  %v1955_v48 = vld [vmem:[%s2262_s5 + $0x90] ss:$8 sps:$4 sm:$0xff]  }
  0x30   : > { %v1956_v49 = vld [vmem:[%s2262_s5 + $0x2a4] ss:$8 sps:$4 sm:$0xff]   ;;  %v1960_v51 = vld [vmem:[%s2262_s5 + $0x2a0] ss:$8 sps:$4 sm:$0xff]   ;;  %v1962_v53 = vld [vmem:[%s2262_s5 + $0x2b4] ss:$8 sps:$4 sm:$0xff]  }
  0x31   : > { %803 = vmatpush1.bf16.msra.mxu1 %v1918_v23  ;;  %v1958_v50 = vld [vmem:[%s2262_s5 + $0xa4] ss:$8 sps:$4 sm:$0xff]   ;;  %v1961_v52 = vld [vmem:[%s2262_s5 + $0xa0] ss:$8 sps:$4 sm:$0xff]   ;;  %v1964_v54 = vld [vmem:[%s2262_s5 + $0xb4] ss:$8 sps:$4 sm:$0xff]   ;;  %v1751_v23 = vcombine.low %v2257_v2, %v2257_v2 }
  0x32   : > { %1219 = vmatpush1.bf16.msra.mxu0 %v1919_v24  ;;  %804 = vmatprep.subr.bf16.mxu1 %v1920_v25  ;;  %v1966_v55 = vld [vmem:[%s2262_s5 + $0x2b0] ss:$8 sps:$4 sm:$0xff]   ;;  %v1968_v57 = vld [vmem:[%s2262_s5 + $0x2c4] ss:$8 sps:$4 sm:$0xff]   ;;  %v1972_v59 = vld [vmem:[%s2262_s5 + $0x2c0] ss:$8 sps:$4 sm:$0xff]  }
  0x33   : > { %1220 = vmatprep.subr.bf16.mxu0 %v1922_v26  ;;  %v1967_v56 = vld [vmem:[%s2262_s5 + $0xb0] ss:$8 sps:$4 sm:$0xff]   ;;  %v1970_v58 = vld [vmem:[%s2262_s5 + $0xc4] ss:$8 sps:$4 sm:$0xff]   ;;  %v1973_v60 = vld [vmem:[%s2262_s5 + $0xc0] ss:$8 sps:$4 sm:$0xff]  }
  0x34   : > { %v1974_v61 = vld [vmem:[%s2262_s5 + $0x2d4] ss:$8 sps:$4 sm:$0xff]   ;;  %v1978_v0 = vld [vmem:[%s2262_s5 + $0x2d0] ss:$8 sps:$4 sm:$0xff]   ;;  %v1980_v5 = vld [vmem:[%s2262_s5 + $0x2e4] ss:$8 sps:$4 sm:$0xff]  }
  0x35   : > { %805 = vmatpush1.bf16.msra.mxu1 %v1924_v27  ;;  %v1976_v62 = vld [vmem:[%s2262_s5 + $0xd4] ss:$8 sps:$4 sm:$0xff]   ;;  %v1979_v3 = vld [vmem:[%s2262_s5 + $0xd0] ss:$8 sps:$4 sm:$0xff]   ;;  %v1982_v6 = vld [vmem:[%s2262_s5 + $0xe4] ss:$8 sps:$4 sm:$0xff]  }
  0x36   : > { %1221 = vmatpush1.bf16.msra.mxu0 %v1925_v28  ;;  %806 = vmatprep.subr.bf16.mxu1 %v1926_v29  ;;  %v1984_v8 = vld [vmem:[%s2262_s5 + $0x2e0] ss:$8 sps:$4 sm:$0xff]   ;;  %v447_v10 = vshll.u32 %v1683_v4, 16  ;;  %v1986_v1 = vld [vmem:[%s2262_s5 + $0x2f4] ss:$8 sps:$4 sm:$0xff]   ;;  %v445_v12 = vshrl.u32 %v1683_v4, 16 }
  0x37   : > { %1222 = vmatprep.subr.bf16.mxu0 %v1928_v30  ;;  %v1985_v9 = vld [vmem:[%s2262_s5 + $0xe0] ss:$8 sps:$4 sm:$0xff]   ;;  %v1988_v11 = vld [vmem:[%s2262_s5 + $0xf4] ss:$8 sps:$4 sm:$0xff]   ;;  %v468_v13 = vshll.u32 %v1686_v7, 16  ;;  %v466_v19 = vshrl.u32 %v1686_v7, 16 }
  0x38   : > { %v1990_v14 = vld [vmem:[%s2262_s5 + $0x2f0] ss:$8 sps:$4 sm:$0xff]   ;;  %v449_v16 = vrot.slane %v447_v10, 1  ;;  %v1996_v17 = vld [vmem:[%s2262_s5 + $0x304] ss:$8 sps:$4 sm:$0xff]  }
  0x39   : > { %807 = vmatpush1.bf16.msra.mxu1 %v1930_v31  ;;  %v1991_v15 = vld [vmem:[%s2262_s5 + $0xf0] ss:$8 sps:$4 sm:$0xff]   ;;  %v2001_v18 = vld [vmem:[%s2262_s5 + $0x104] ss:$8 sps:$4 sm:$0xff]   ;;  %v470_v20 = vrot.slane %v468_v13, 1 }
  0x3a   : > { %1223 = vmatpush1.bf16.msra.mxu0 %v1931_v32  ;;  %808 = vmatprep.subr.bf16.mxu1 %v1932_v33  ;;  %v2342_v21 = vld [vmem:[%s2232_s6 + $0x8] sm:$0x33]  ;;  %v450_v25 = vor.u32 %v449_v16, %v445_v12  ;;  %v2004_v26 = vld [vmem:[%s2262_s5 + $0x314] ss:$8 sps:$4 sm:$0xff]   ;;  %v2002_v2 = vld [vmem:[%s2262_s5 + $0x310] ss:$8 sps:$4 sm:$0xff]  }
  0x3b   : > { %1224 = vmatprep.subr.bf16.mxu0 %v1934_v34  ;;  %v1994_v22 = vld [vmem:[%s2262_s5 + $0x300] ss:$8 sps:$4 sm:$0xff]   ;;  %v2007_v27 = vld [vmem:[%s2262_s5 + $0x114] ss:$8 sps:$4 sm:$0xff]   ;;  %v471_v28 = vor.u32 %v470_v20, %v466_v19  ;;  %v1754_v29 = vcombine.high %v2342_v21, %v2342_v21  ;;  %v2005_v30 = vld [vmem:[%s2262_s5 + $0x110] ss:$8 sps:$4 sm:$0xff]  }
  0x3c   : > { %v1999_v24 = vld [vmem:[%s2262_s5 + $0x100] ss:$8 sps:$4 sm:$0xff]   ;;  %v2010_v31 = vld [vmem:[%s2262_s5 + $0x324] ss:$8 sps:$4 sm:$0xff]   ;;  %v2067_v7 = vld [vmem:[%s2262_s5 + $0x1b4] ss:$8 sps:$4 sm:$0xff]  }
  0x3d   : > { %809 = vmatpush1.bf16.msra.mxu1 %v1936_v35  ;;  %v2013_v32 = vld [vmem:[%s2262_s5 + $0x124] ss:$8 sps:$4 sm:$0xff]   ;;  %v2008_v33 = vld [vmem:[%s2262_s5 + $0x320] ss:$8 sps:$4 sm:$0xff]   ;;  %v2016_v35 = vld [vmem:[%s2262_s5 + $0x334] ss:$8 sps:$4 sm:$0xff]  }
  0x3e   : > { %1225 = vmatpush1.bf16.msra.mxu0 %v1937_v36  ;;  %810 = vmatprep.subr.bf16.mxu1 %v1938_v37  ;;  %v2011_v34 = vld [vmem:[%s2262_s5 + $0x120] ss:$8 sps:$4 sm:$0xff]   ;;  %v2019_v36 = vld [vmem:[%s2262_s5 + $0x134] ss:$8 sps:$4 sm:$0xff]   ;;  %v2014_v37 = vld [vmem:[%s2262_s5 + $0x330] ss:$8 sps:$4 sm:$0xff]  }
  0x3f   : > { %1226 = vmatprep.subr.bf16.mxu0 %v1940_v38  ;;  %v2017_v38 = vld [vmem:[%s2262_s5 + $0x130] ss:$8 sps:$4 sm:$0xff]   ;;  %v2056_v4 = vld [vmem:[%s2262_s5 + $0x3a0] ss:$8 sps:$4 sm:$0xff]   ;;  %v2070_v10 = vld [vmem:[%s2262_s5 + $0x3c4] ss:$8 sps:$4 sm:$0xff]  }
  0x40   : > { %v2071_v12 = vld [vmem:[%s2262_s5 + $0x1c0] ss:$8 sps:$4 sm:$0xff]   ;;  %v2076_v13 = vld [vmem:[%s2262_s5 + $0x3d4] ss:$8 sps:$4 sm:$0xff]   ;;  %v2074_v16 = vld [vmem:[%s2262_s5 + $0x3d0] ss:$8 sps:$4 sm:$0xff]  }
  0x41   : > { %811 = vmatpush1.bf16.msra.mxu1 %v1942_v39  ;;  %v2022_v39 = vld [vmem:[%s2262_s5 + $0x344] ss:$8 sps:$4 sm:$0xff]  }
  0x42   : > { %1227 = vmatpush1.bf16.msra.mxu0 %v1943_v40  ;;  %812 = vmatprep.subr.bf16.mxu1 %v1944_v41  ;;  %v2025_v40 = vld [vmem:[%s2262_s5 + $0x144] ss:$8 sps:$4 sm:$0xff]   ;;  %v2020_v41 = vld [vmem:[%s2262_s5 + $0x340] ss:$8 sps:$4 sm:$0xff]  }
  0x43   : > { %1228 = vmatprep.subr.bf16.mxu0 %v1946_v42  ;;  %v2023_v42 = vld [vmem:[%s2262_s5 + $0x140] ss:$8 sps:$4 sm:$0xff]   ;;  %v2085_v19 = vld [vmem:[%s2262_s5 + $0x1e4] ss:$8 sps:$4 sm:$0xff]  }
  0x45   : > { %813 = vmatpush1.bf16.msra.mxu1 %v1948_v43  ;;  %v2028_v43 = vld [vmem:[%s2262_s5 + $0x354] ss:$8 sps:$4 sm:$0xff]  }
  0x46   : > { %1229 = vmatpush1.bf16.msra.mxu0 %v1949_v44  ;;  %814 = vmatprep.subr.bf16.mxu1 %v1950_v45  ;;  %v2031_v44 = vld [vmem:[%s2262_s5 + $0x154] ss:$8 sps:$4 sm:$0xff]   ;;  %v2026_v45 = vld [vmem:[%s2262_s5 + $0x350] ss:$8 sps:$4 sm:$0xff]  }
  0x47   : > { %1230 = vmatprep.subr.bf16.mxu0 %v1952_v46  ;;  %v2029_v46 = vld [vmem:[%s2262_s5 + $0x150] ss:$8 sps:$4 sm:$0xff]  }
  0x49   : > { %815 = vmatpush1.bf16.msra.mxu1 %v1954_v47  ;;  %v2034_v47 = vld [vmem:[%s2262_s5 + $0x364] ss:$8 sps:$4 sm:$0xff]  }
  0x4a   : > { %1231 = vmatpush1.bf16.msra.mxu0 %v1955_v48  ;;  %816 = vmatprep.subr.bf16.mxu1 %v1956_v49  ;;  %v2037_v48 = vld [vmem:[%s2262_s5 + $0x164] ss:$8 sps:$4 sm:$0xff]   ;;  %v2032_v49 = vld [vmem:[%s2262_s5 + $0x360] ss:$8 sps:$4 sm:$0xff]  }
  0x4b   : > { %1232 = vmatprep.subr.bf16.mxu0 %v1958_v50  ;;  %v2035_v50 = vld [vmem:[%s2262_s5 + $0x160] ss:$8 sps:$4 sm:$0xff]  }
  0x4d   : > { %817 = vmatpush1.bf16.msra.mxu1 %v1960_v51  ;;  %v2040_v51 = vld [vmem:[%s2262_s5 + $0x374] ss:$8 sps:$4 sm:$0xff]  }
  0x4e   : > { %1233 = vmatpush1.bf16.msra.mxu0 %v1961_v52  ;;  %818 = vmatprep.subr.bf16.mxu1 %v1962_v53  ;;  %v2043_v52 = vld [vmem:[%s2262_s5 + $0x174] ss:$8 sps:$4 sm:$0xff]   ;;  %v2038_v53 = vld [vmem:[%s2262_s5 + $0x370] ss:$8 sps:$4 sm:$0xff]  }
  0x4f   : > { %1234 = vmatprep.subr.bf16.mxu0 %v1964_v54  ;;  %v2041_v54 = vld [vmem:[%s2262_s5 + $0x170] ss:$8 sps:$4 sm:$0xff]  }
  0x51   : > { %819 = vmatpush1.bf16.msra.mxu1 %v1966_v55  ;;  %v2046_v55 = vld [vmem:[%s2262_s5 + $0x384] ss:$8 sps:$4 sm:$0xff]  }
  0x52   : > { %1235 = vmatpush1.bf16.msra.mxu0 %v1967_v56  ;;  %820 = vmatprep.subr.bf16.mxu1 %v1968_v57  ;;  %v2049_v56 = vld [vmem:[%s2262_s5 + $0x184] ss:$8 sps:$4 sm:$0xff]   ;;  %v2044_v57 = vld [vmem:[%s2262_s5 + $0x380] ss:$8 sps:$4 sm:$0xff]  }
  0x53   : > { %1236 = vmatprep.subr.bf16.mxu0 %v1970_v58  ;;  %v2047_v58 = vld [vmem:[%s2262_s5 + $0x180] ss:$8 sps:$4 sm:$0xff]  }
  0x55   : > { %821 = vmatpush1.bf16.msra.mxu1 %v1972_v59  ;;  %v2052_v59 = vld [vmem:[%s2262_s5 + $0x394] ss:$8 sps:$4 sm:$0xff]  }
  0x56   : > { %1237 = vmatpush1.bf16.msra.mxu0 %v1973_v60  ;;  %822 = vmatprep.subr.bf16.mxu1 %v1974_v61  ;;  %v2055_v60 = vld [vmem:[%s2262_s5 + $0x194] ss:$8 sps:$4 sm:$0xff]   ;;  %v2050_v61 = vld [vmem:[%s2262_s5 + $0x390] ss:$8 sps:$4 sm:$0xff]  }
  0x57   : > { %1238 = vmatprep.subr.bf16.mxu0 %v1976_v62  ;;  %v2053_v62 = vld [vmem:[%s2262_s5 + $0x190] ss:$8 sps:$4 sm:$0xff]  }
  0x59   : > { %823 = vmatpush1.bf16.msra.mxu1 %v1978_v0  ;;  %v2058_v0 = vld [vmem:[%s2262_s5 + $0x3a4] ss:$8 sps:$4 sm:$0xff]  }
  0x5a   : > { %1239 = vmatpush1.bf16.msra.mxu0 %v1979_v3  ;;  %824 = vmatprep.subr.bf16.mxu1 %v1980_v5  ;;  %v2061_v3 = vld [vmem:[%s2262_s5 + $0x1a4] ss:$8 sps:$4 sm:$0xff]   ;;  %v2059_v5 = vld [vmem:[%s2262_s5 + $0x1a0] ss:$8 sps:$4 sm:$0xff]  }
  0x5b   : > { %1240 = vmatprep.subr.bf16.mxu0 %v1982_v6  ;;  %v2064_v6 = vld [vmem:[%s2262_s5 + $0x3b4] ss:$8 sps:$4 sm:$0xff]  }
  0x5d   : > { %825 = vmatpush1.bf16.msra.mxu1 %v1984_v8  ;;  %v2062_v8 = vld [vmem:[%s2262_s5 + $0x3b0] ss:$8 sps:$4 sm:$0xff]  }
  0x5e   : > { %1241 = vmatpush1.bf16.msra.mxu0 %v1985_v9  ;;  %826 = vmatprep.subr.bf16.mxu1 %v1986_v1  ;;  %v2065_v9 = vld [vmem:[%s2262_s5 + $0x1b0] ss:$8 sps:$4 sm:$0xff]   ;;  %v2073_v1 = vld [vmem:[%s2262_s5 + $0x1c4] ss:$8 sps:$4 sm:$0xff]  }
  0x5f   : > { %1242 = vmatprep.subr.bf16.mxu0 %v1988_v11  ;;  %v2068_v11 = vld [vmem:[%s2262_s5 + $0x3c0] ss:$8 sps:$4 sm:$0xff]  }
  0x61   : > { %827 = vmatpush1.bf16.msra.mxu1 %v1990_v14  ;;  %v2079_v14 = vld [vmem:[%s2262_s5 + $0x1d4] ss:$8 sps:$4 sm:$0xff]  }
  0x62   : > { %1243 = vmatpush1.bf16.msra.mxu0 %v1991_v15  ;;  %837 = vmatprep.subr.bf16.mxu1 %v1996_v17  ;;  %v1685_v15 = vcombine.low %v2323_v63, %v2323_v63  ;;  %v2077_v17 = vld [vmem:[%s2262_s5 + $0x1d0] ss:$8 sps:$4 sm:$0xff]   ;;  %v2088_v63 = vld [vmem:[%s2262_s5 + $0x3f4] ss:$8 sps:$4 sm:$0xff]  }
  0x63   : > { %1253 = vmatprep.subr.bf16.mxu0 %v2001_v18  ;;  %v2082_v18 = vld [vmem:[%s2262_s5 + $0x3e4] ss:$8 sps:$4 sm:$0xff]  }
  0x64   : > { %829 = vmatmul.mubr.bf16.vlgmr.msra.gmra.mrb[0].mxu1 %v450_v25  ;;  %v461_v20 = vshll.u32 %v1685_v15, 16  ;;  %v459_v25 = vshrl.u32 %v1685_v15, 16 }
  0x65   : > { %1245 = vmatmul.mubr.bf16.vlgmr.msra.gmra.mrb[0].mxu0 %v1751_v23  ;;  %838 = vmatpush1.bf16.msra.mxu1 %v1994_v22  ;;  %v2080_v22 = vld [vmem:[%s2262_s5 + $0x3e0] ss:$8 sps:$4 sm:$0xff]  }
  0x66   : > { %1254 = vmatpush1.bf16.msra.mxu0 %v1999_v24  ;;  %839 = vmatprep.subr.bf16.mxu1 %v2004_v26  ;;  %v2083_v23 = vld [vmem:[%s2262_s5 + $0x1e0] ss:$8 sps:$4 sm:$0xff]   ;;  %v2091_v24 = vld [vmem:[%s2262_s5 + $0x1f4] ss:$8 sps:$4 sm:$0xff]   ;;  %v463_v26 = vrot.slane %v461_v20, 1 }
  0x67   : > { %1255 = vmatprep.subr.bf16.mxu0 %v2007_v27  ;;  %869 = vmatprep.mubr.bf16.mxu1 %v471_v28  ;;  %v2086_v27 = vld [vmem:[%s2262_s5 + $0x3f0] ss:$8 sps:$4 sm:$0xff]  }
  0x68   : > { %1285 = vmatprep.mubr.bf16.mxu0 %v1754_v29  ;;  %v2089_v28 = vld [vmem:[%s2262_s5 + $0x1f0] ss:$8 sps:$4 sm:$0xff]   ;;  %v1753_v29 = vcombine.low %v2342_v21, %v2342_v21 }
  0x69   : > { %840 = vmatpush1.bf16.msra.mxu1 %v2002_v2  ;;  %v464_v2 = vor.u32 %v463_v26, %v459_v25 }
  0x6a   : > { %1256 = vmatpush1.bf16.msra.mxu0 %v2005_v30  ;;  %841 = vmatprep.subr.bf16.mxu1 %v2010_v31 }
  0x6b   : > { %1257 = vmatprep.subr.bf16.mxu0 %v2013_v32 }
  0x6d   : > { %842 = vmatpush1.bf16.msra.mxu1 %v2008_v33 }
  0x6e   : > { %1258 = vmatpush1.bf16.msra.mxu0 %v2011_v34  ;;  %843 = vmatprep.subr.bf16.mxu1 %v2016_v35 }
  0x6f   : > { %1259 = vmatprep.subr.bf16.mxu0 %v2019_v36 }
  0x71   : > { %844 = vmatpush1.bf16.msra.mxu1 %v2014_v37 }
  0x72   : > { %1260 = vmatpush1.bf16.msra.mxu0 %v2017_v38  ;;  %845 = vmatprep.subr.bf16.mxu1 %v2022_v39  ;;  %v1294_v38 = vld [vmem:[#allocation2] sm:$0xff] }
  0x73   : > { %1261 = vmatprep.subr.bf16.mxu0 %v2025_v40 }
  0x75   : > { %846 = vmatpush1.bf16.msra.mxu1 %v2020_v41 }
  0x76   : > { %1262 = vmatpush1.bf16.msra.mxu0 %v2023_v42  ;;  %847 = vmatprep.subr.bf16.mxu1 %v2028_v43 }
  0x77   : > { %1263 = vmatprep.subr.bf16.mxu0 %v2031_v44 }
  0x79   : > { %848 = vmatpush1.bf16.msra.mxu1 %v2026_v45 }
  0x7a   : > { %1264 = vmatpush1.bf16.msra.mxu0 %v2029_v46  ;;  %849 = vmatprep.subr.bf16.mxu1 %v2034_v47 }
  0x7b   : > { %1265 = vmatprep.subr.bf16.mxu0 %v2037_v48 }
  0x7d   : > { %850 = vmatpush1.bf16.msra.mxu1 %v2032_v49 }
  0x7e   : > { %1266 = vmatpush1.bf16.msra.mxu0 %v2035_v50  ;;  %851 = vmatprep.subr.bf16.mxu1 %v2040_v51 }
  0x7f   : > { %1267 = vmatprep.subr.bf16.mxu0 %v2043_v52 }
  0x81   : > { %852 = vmatpush1.bf16.msra.mxu1 %v2038_v53 }
  0x82   : > { %1268 = vmatpush1.bf16.msra.mxu0 %v2041_v54  ;;  %853 = vmatprep.subr.bf16.mxu1 %v2046_v55  ;;  %v2154_v55 = vmov (!%p1819_p10), 1966171168  }
  0x83   : > { %1269 = vmatprep.subr.bf16.mxu0 %v2049_v56  ;;  %v1342_v56 = vunpack.c.l.s4 (!%p1819_p10), %v2154_v55 }
  0x85   : > { %854 = vmatpush1.bf16.msra.mxu1 %v2044_v57  ;;  %v1344_v57 = vlaneseq (!%p1819_p10) }
  0x86   : > { %1270 = vmatpush1.bf16.msra.mxu0 %v2047_v58  ;;  %855 = vmatprep.subr.bf16.mxu1 %v2052_v59 }
  0x87   : > { %1271 = vmatprep.subr.bf16.mxu0 %v2055_v60  ;;  %vm1358_vm1 = vcmp.lt.s32.totalorder (!%p1819_p10), %v1344_v57, 256 }
  0x89   : > { %856 = vmatpush1.bf16.msra.mxu1 %v2050_v61 }
  0x8a   : > { %1272 = vmatpush1.bf16.msra.mxu0 %v2053_v62  ;;  %857 = vmatprep.subr.bf16.mxu1 %v2058_v0 }
  0x8b   : > { %1273 = vmatprep.subr.bf16.mxu0 %v2061_v3 }
  0x8d   : > { %858 = vmatpush1.bf16.msra.mxu1 %v2056_v4 }
  0x8e   : > { %1274 = vmatpush1.bf16.msra.mxu0 %v2059_v5  ;;  %859 = vmatprep.subr.bf16.mxu1 %v2064_v6  ;;  %v1343_v5 = vunpack.c.0.s8 (!%p1819_p10), %v1342_v56  ;;  %v1345_v6 = vshrl.u32 (!%p1819_p10), %v1344_v57, 7 }
  0x8f   : > { %1275 = vmatprep.subr.bf16.mxu0 %v2067_v7 }
  0x90   : > { %v1346_v15 = vsub.s32 (!%p1819_p10), %v1343_v5, %v1345_v6 }
  0x91   : > { %860 = vmatpush1.bf16.msra.mxu1 %v2062_v8 }
  0x92   : > { %1276 = vmatpush1.bf16.msra.mxu0 %v2065_v9  ;;  %861 = vmatprep.subr.bf16.mxu1 %v2070_v10 }
  0x93   : > { %1277 = vmatprep.subr.bf16.mxu0 %v2073_v1 }
  0x95   : > { %862 = vmatpush1.bf16.msra.mxu1 %v2068_v11 }
  0x96   : > { %1278 = vmatpush1.bf16.msra.mxu0 %v2071_v12  ;;  %863 = vmatprep.subr.bf16.mxu1 %v2076_v13 }
  0x97   : > { %1279 = vmatprep.subr.bf16.mxu0 %v2079_v14 }
  0x99   : > { %864 = vmatpush1.bf16.msra.mxu1 %v2074_v16 }
  0x9a   : > { %1280 = vmatpush1.bf16.msra.mxu0 %v2077_v17  ;;  %865 = vmatprep.subr.bf16.mxu1 %v2082_v18 }
  0x9b   : > { %1281 = vmatprep.subr.bf16.mxu0 %v2085_v19 }
  0x9d   : > { %866 = vmatpush1.bf16.msra.mxu1 %v2080_v22 }
  0x9e   : > { %1282 = vmatpush1.bf16.msra.mxu0 %v2083_v23  ;;  %867 = vmatprep.subr.bf16.mxu1 %v2088_v63 }
  0x9f   : > { %1283 = vmatprep.subr.bf16.mxu0 %v2091_v24 }
  0xa1   : > { %868 = vmatpush1.bf16.msra.mxu1 %v2086_v27 }
  0xa2   : > { %1284 = vmatpush1.bf16.msra.mxu0 %v2089_v28 }
  0xa4   : > { %870 = vmatmul.mubr.bf16.vlgmr.msra.gmra.mrb[0].mxu1 %v464_v2 }
  0xa5   : > { %1286 = vmatmul.mubr.bf16.vlgmr.msra.gmra.mrb[0].mxu0 %v1753_v29 }
 0x177   : > { %v871_v30 = vpop.f32.mrb[0].mxu1 }
 0x178   : > { %v1287_v31 = vpop.f32.mrb[0].mxu0  ;;  %v873_v33 = vpop.f32.mrb[1].mxu1 }
 0x179   : > { %v1827_v32 = vadd.f32 %v1287_v31, %v871_v30  ;;  %v1289_v34 = vpop.f32.mrb[1].mxu0  ;;  %v875_v36 = vpop.f32.mrb[2].mxu1 }
 0x17a   : > { %v1828_v35 = vadd.f32 %v1289_v34, %v873_v33  ;;  %v1291_v37 = vpop.f32.mrb[2].mxu0  ;;  %v876_v39 = vpop.f32.mrb[3].mxu1  ;;  %1304 = sbr.rel (%p1819_p10) target bundleno = 416 (0x1a0), region = 36 }
 0x17b   : > { %v1292_v40 = vpop.f32.mrb[3].mxu0 }
 0x17c   : > { %v1297_v41 = vcombine.low %v1827_v32, %v1828_v35 }
 0x17e   : > { %v1299_v42 = vadd.f32 %v1297_v41, %v1294_v38 }
 0x180   : > { %1300 = vst [vmem:[#allocation2] sm:$0xff] %v1299_v42 }
 0x187   : > { %v1305_v21 = vld [vmem:[#allocation2] sm:$0xff] }
 0x188   : > { %v1307_v43 = vcombine.high %v1305_v21, %v1305_v21  ;;  %v1324_v44 = vsel %vm1323_vm0, %v1305_v21, 0.0  ;;  %v1361_v45 = vmul.f32 %v1305_v21, %v1305_v21 }
 0x189   : > { %v1325_v46 = vrot.slane %v1324_v44, 4 }
 0x18a   : > { %v1820_v47 = vpack.c.bf16 %v1307_v43, %v1305_v21  ;;  %v1331_v48 = vsel %vm1323_vm0, %v1307_v43, 0.0  ;;  %v1363_v49 = vcombine.high %v1361_v45, %v1361_v45  ;;  %v1365_v50 = vsel %vm1323_vm0, %v1361_v45, 0.0 }
 0x18b   : > { %v1326_v51 = vadd.f32 %v1325_v46, %v1324_v44  ;;  %v1332_v52 = vrot.slane %v1331_v48, 4  ;;  %v1366_v53 = vrot.slane %v1365_v50, 4 }
 0x18c   : > { %1821 = vst.sshfl [vmem:[%s2245_s26] sm:$0x33 pattern:$0x76325410] %v1820_v47  ;;  %v1372_v54 = vsel %vm1323_vm0, %v1363_v49, 0.0 }
 0x18d   : > { %v1327_v58 = vrot.slane %v1326_v51, 2  ;;  %v1333_v59 = vadd.f32 %v1332_v52, %v1331_v48  ;;  %v1367_v60 = vadd.f32 %v1366_v53, %v1365_v50  ;;  %v1373_v61 = vrot.slane %v1372_v54, 4 }
 0x18f   : > { %v1334_v62 = vrot.slane %v1333_v59, 2  ;;  %v1328_v0 = vadd.f32 %v1327_v58, %v1326_v51  ;;  %v1368_v3 = vrot.slane %v1367_v60, 2  ;;  %v1374_v4 = vadd.f32 %v1373_v61, %v1372_v54 }
 0x191   : > { %v1335_v7 = vadd.f32 %v1334_v62, %v1333_v59  ;;  %v1329_v8 = vrot.slane %v1328_v0, 1  ;;  %v1369_v9 = vadd.f32 %v1368_v3, %v1367_v60  ;;  %v1375_v10 = vrot.slane %v1374_v4, 2 }
 0x193   : > { %v1336_v1 = vrot.slane %v1335_v7, 1  ;;  %v1330_v11 = vadd.f32 %v1329_v8, %v1328_v0  ;;  %v1370_v12 = vrot.slane %v1369_v9, 1  ;;  %v1376_v13 = vadd.f32 %v1375_v10, %v1374_v4 }
 0x195   : > { %v1337_v14 = vadd.f32 %v1336_v1, %v1335_v7  ;;  %v1371_v16 = vadd.f32 %v1370_v12, %v1369_v9  ;;  %v1377_v17 = vrot.slane %v1376_v13, 1 }
 0x197   : > { %v1340_v18 = vcombine.low %v1330_v11, %v1337_v14  ;;  %v1378_v19 = vadd.f32 %v1377_v17, %v1376_v13 }
 0x199   : > { %v1347_v20 = vrot.slane %v1340_v18, %v1346_v15  ;;  %v1381_v22 = vcombine.low %v1371_v16, %v1378_v19 }
 0x19b   : > { %v1354_v23 = vrot.slane %v1347_v20, %v1346_v15  ;;  %v1388_v63 = vrot.slane %v1381_v22, %v1346_v15 }
 0x19d   : > { %1360 = vst.msk [vmem:[%s280_s13] sm:$0x3] %vm1358_vm1, %v1354_v23  ;;  %v1395_v24 = vrot.slane %v1388_v63, %v1346_v15 }
 0x19f   : > { %1397 = vst.msk [vmem:[%s288_s17] sm:$0x3] %vm1358_vm1, %v1395_v24 }
 0x1a0 PF: > { %s15_s21 = sadd.s32 1, %s2151_s21   ;;  %s2452_s15 = smov %s2139_s18 }
 0x1a1   : > { %p12_p11 = scmp.ge.s32.totalorder %s15_s21, 18   ;;  %s2453_s16 = smov %s2143_s19 }
 0x1a2   : > { %s2454_s17 = smov %s2147_s20  ;;  %s2455_s18 = smov %s2459_s22 }
 0x1a3   : > { %s2456_s19 = smov %s2463_s23  ;;  %s2457_s20 = smov %s2467_s24 }
 0x1a4   :  { %14 = sbr.rel (!%p12_p11) target bundleno = 4 (0x4), region = 92 }

// kernel: patch_discriminator.12
= control target key start
LH: loop header
LB: loop body
LE: loop exit
PB: predicated region body
PF: predicated region fallthrough
CT: control target
= control target key end

     0   :  { %s529_s12 = smov 0   ;;  %s531_s13 = smov 0   ;;  %s575_s0 = inlined_call_operand.vmem [shape: bf16[2,4,4,256], index: 0, kind: input, shape index: {}]   ;;  %s576_s1 = inlined_call_operand.vmem [shape: f32[1,256], index: 1, kind: input, shape index: {}]   ;;  %s577_s2 = inlined_call_operand.vmem [shape: f32[1,256], index: 2, kind: input, shape index: {}]   ;;  %s578_s3 = inlined_call_operand.vmem [shape: bf16[2,4,4,256], index: 3, kind: output, shape index: {}]  }
   0x1   :  { %s533_s14 = smov 0  }
   0x2 LB: > { %s25_s15 = sadd.s32 1, %s503_s13  ;;  %p435_p0 = scmp.ge.s32.totalorder %s507_s14, 1  ;;  %s507_s14 = sphi %s533_s14, %s13_s14   ;;  %s503_s13 = sphi %s531_s13, %s580_s13   ;;  %s499_s12 = sphi %s529_s12, %s579_s12  }
   0x3   : > { %p27_p1 = scmp.ge.s32.totalorder %s25_s15, 2  ;;  %p159_p2 = scmp.lt.s32.totalorder %s507_s14, 3 }
   0x5   : > { %s582_s15 = smov (%p27_p1, %s25_s15), 0  ;;  %p160_p3 = pnand %p435_p0, %p159_p2 }
   0x6   : > { %p194_p4 = scmp.lt.s32.totalorder (!%p160_p3), %s499_s12, 1  ;;  %v225_v0 = vlaneseq (!%p160_p3)  ;;  %v223_v2 = vld [vmem:[%s576_s1] sm:$0x3] (!%p160_p3) }
   0x7   : > { %163 = sbr.rel (%p160_p3) target bundleno = 35 (0x23), region = 32  ;;  %v239_v3 = vld [vmem:[%s577_s2] sm:$0x3] (!%p160_p3) }
   0x8   : > { %v226_v1 = vshrl.u32 (!%p160_p3), %v225_v0, 7 }
   0xa   : > { %v227_v4 = vsub.s32 (!%p160_p3), 0, %v226_v1  ;;  %v231_v5 = vsub.s32 (!%p160_p3), 1, %v226_v1 }
   0xc   : > { %v228_v8 = vrot.slane (!%p160_p3), %v223_v2, %v227_v4  ;;  %v232_v9 = vrot.slane (!%p160_p3), %v223_v2, %v231_v5  ;;  %v244_v10 = vrot.slane (!%p160_p3), %v239_v3, %v227_v4  ;;  %v248_v11 = vrot.slane (!%p160_p3), %v239_v3, %v231_v5 }
   0xe   : > { %s584_s12 = smov (!%p194_p4, %s499_s12), 1  ;;  %v233_v16 = vcombine.low %v228_v8, %v232_v9  ;;  %v249_v17 = vcombine.low %v244_v10, %v248_v11 }
   0xf   : > { %s450_s20 = sshll.u32 %s584_s12, 4 }
  0x10   : > { %s202_s23 = scalar_lea.vmem %s575_s0, %s450_s20  ;;  %s213_s26 = scalar_lea.vmem %s578_s3, %s450_s20 }
  0x11   : > { %v453_v6 = vld [vmem:[%s202_s23] sm:$0xff]   ;;  %v460_v7 = vld [vmem:[%s202_s23 + $0x8] sm:$0xff]  }
  0x12   : > { %v454_v12 = vunpack.c.l.bf16 %v453_v6  ;;  %v455_v13 = vunpack.c.h.bf16 %v453_v6  ;;  %v458_v14 = vunpack.c.l.bf16 %v460_v7  ;;  %v459_v15 = vunpack.c.h.bf16 %v460_v7 }
  0x14   : > { %v235_v18 = vmul.f32 %v454_v12, %v233_v16  ;;  %v236_v19 = vmul.f32 %v455_v13, %v233_v16  ;;  %v237_v20 = vmul.f32 %v458_v14, %v233_v16  ;;  %v238_v21 = vmul.f32 %v459_v15, %v233_v16 }
  0x16   : > { %v251_v22 = vadd.f32 %v249_v17, %v235_v18  ;;  %v252_v23 = vadd.f32 %v249_v17, %v236_v19  ;;  %v253_v24 = vadd.f32 %v249_v17, %v237_v20  ;;  %v254_v25 = vadd.f32 %v249_v17, %v238_v21 }
  0x18   : > { %vm255_vm0 = vcmp.gt.f32.partialorder %v251_v22, 0.0  ;;  %v259_v26 = vmul.f32 0.2, %v251_v22  ;;  %vm256_vm1 = vcmp.gt.f32.partialorder %v252_v23, 0.0  ;;  %v260_v27 = vmul.f32 0.2, %v252_v23 }
  0x19   : > { %vm257_vm2 = vcmp.gt.f32.partialorder %v253_v24, 0.0  ;;  %v261_v28 = vmul.f32 0.2, %v253_v24  ;;  %vm258_vm3 = vcmp.gt.f32.partialorder %v254_v25, 0.0  ;;  %v262_v29 = vmul.f32 0.2, %v254_v25 }
  0x1a   : > { %v263_v30 = vsel %vm255_vm0, %v251_v22, %v259_v26  ;;  %v264_v31 = vsel %vm256_vm1, %v252_v23, %v260_v27 }
  0x1b   : > { %v271_v32 = vcombine.high %v263_v30, %v263_v30  ;;  %v272_v33 = vcombine.high %v264_v31, %v264_v31  ;;  %v265_v34 = vsel %vm257_vm2, %v253_v24, %v261_v28  ;;  %v266_v35 = vsel %vm258_vm3, %v254_v25, %v262_v29 }
  0x1c   : > { %v273_v36 = vcombine.high %v265_v34, %v265_v34  ;;  %v274_v37 = vcombine.high %v266_v35, %v266_v35 }
  0x1d   : > { %v440_v38 = vpack.c.bf16 %v271_v32, %v263_v30  ;;  %v441_v39 = vpack.c.bf16 %v272_v33, %v264_v31 }
  0x1e   : > { %v442_v40 = vpack.c.bf16 %v273_v36, %v265_v34  ;;  %v443_v41 = vpack.c.bf16 %v274_v37, %v266_v35 }
  0x1f   : > { %444 = vst.sshfl [vmem:[%s213_s26] sm:$0x33 pattern:$0x76325410] %v440_v38 }
  0x20   : > { %445 = vst.sshfl [vmem:[%s213_s26 + $0x4] sm:$0x33 pattern:$0x76325410] %v441_v39 }
  0x21   : > { %446 = vst.sshfl [vmem:[%s213_s26 + $0x8] sm:$0x33 pattern:$0x76325410] %v442_v40 }
  0x22   : > { %447 = vst.sshfl [vmem:[%s213_s26 + $0xc] sm:$0x33 pattern:$0x76325410] %v443_v41 }
  0x23 PF: > { %s13_s14 = sadd.s32 1, %s507_s14   ;;  %s579_s12 = smov %s503_s13 }
  0x24   : > { %p10_p5 = scmp.ge.s32.totalorder %s13_s14, 4   ;;  %s580_s13 = smov %s582_s15 }
  0x26   :  { %12 = sbr.rel (!%p10_p5) target bundleno = 2 (0x2), region = 62 }

// kernel: patch_discriminator.14
= control target key start
LH: loop header
LB: loop body
LE: loop exit
PB: predicated region body
PF: predicated region fallthrough
CT: control target
= control target key end

     0   :  { %s600_s12 = smov 0   ;;  %s602_s13 = smov 0   ;;  %s684_s0 = inlined_call_operand.vmem [shape: bf16[2,3,3,512], index: 0, kind: input, shape index: {}]   ;;  %s685_s1 = inlined_call_operand.vmem [shape: f32[1,512], index: 1, kind: input, shape index: {}]   ;;  %s686_s2 = inlined_call_operand.vmem [shape: f32[1,512], index: 2, kind: input, shape index: {}]   ;;  %s687_s3 = inlined_call_operand.vmem [shape: bf16[2,3,3,512], index: 3, kind: output, shape index: {}]  }
   0x1   :  { %s604_s14 = smov 0  }
   0x2 LB: > { %s25_s15 = sadd.s32 1, %s573_s13  ;;  %p518_p0 = scmp.ge.s32.totalorder %s577_s14, 1  ;;  %s577_s14 = sphi %s604_s14, %s13_s14   ;;  %s573_s13 = sphi %s602_s13, %s697_s13   ;;  %s569_s12 = sphi %s600_s12, %s696_s12  }
   0x3   : > { %p27_p1 = scmp.ge.s32.totalorder %s25_s15, 2  ;;  %p159_p2 = scmp.lt.s32.totalorder %s577_s14, 3 }
   0x5   : > { %s699_s15 = smov (%p27_p1, %s25_s15), 0  ;;  %p160_p3 = pnand %p518_p0, %p159_p2 }
   0x6   : > { %p194_p4 = scmp.lt.s32.totalorder (!%p160_p3), %s569_s12, 1  ;;  %v226_v0 = vlaneseq (!%p160_p3)  ;;  %v224_v2 = vld [vmem:[%s685_s1] sm:$0xf] (!%p160_p3)  ;;  %vm394_vm0 = vcmask (!%p160_p3), 1041408   ;;  %v579_v8 = vmov (!%p160_p3), 1983009808  }
   0x7   : > { %163 = sbr.rel (%p160_p3) target bundleno = 42 (0x2a), region = 32  ;;  %v252_v3 = vld [vmem:[%s686_s2] sm:$0xf] (!%p160_p3)  ;;  %v343_v9 = vunpack.c.l.s4 (!%p160_p3), %v579_v8  ;;  %vm395_vm1 = vsmask.f32 (!%p160_p3), 1280  ;;  %vm397_vm2 = vcmask (!%p160_p3), 1043458  }
   0x8   : > { %v227_v1 = vshrl.u32 (!%p160_p3), %v226_v0, 7  ;;  %vm398_vm3 = vsmask.f32 (!%p160_p3), 3328  ;;  %vm401_vm4 = vcmask (!%p160_p3), 1045508   ;;  %vm634_vm5 = vmand (!%p160_p3), %vm394_vm0, %vm395_vm1  ;;  %vm402_vm7 = vsmask.f32 (!%p160_p3), 5376 }
   0x9   : > { %v344_v31 = vunpack.c.0.s8 (!%p160_p3), %v343_v9  ;;  %vm640_vm6 = vmand (!%p160_p3), %vm397_vm2, %vm398_vm3  ;;  %vm405_vm8 = vcmask (!%p160_p3), 1047558   ;;  %vm406_vm9 = vsmask.f32 (!%p160_p3), 7424 }
   0xa   : > { %v228_v4 = vsub.s32 (!%p160_p3), 0, %v227_v1  ;;  %v232_v5 = vsub.s32 (!%p160_p3), 1, %v227_v1  ;;  %v236_v6 = vsub.s32 (!%p160_p3), 2, %v227_v1  ;;  %v240_v7 = vsub.s32 (!%p160_p3), 3, %v227_v1  ;;  %vm400_vm12 = vmor (!%p160_p3), %vm640_vm6, %vm634_vm5 }
   0xb   : > { %v347_v44 = vsub.s32 (!%p160_p3), %v344_v31, %v227_v1  ;;  %vm403_vm13 = vmand (!%p160_p3), %vm401_vm4, %vm402_vm7 }
   0xc   : > { %v229_v10 = vrot.slane (!%p160_p3), %v224_v2, %v228_v4  ;;  %v233_v11 = vrot.slane (!%p160_p3), %v224_v2, %v232_v5  ;;  %v237_v12 = vrot.slane (!%p160_p3), %v224_v2, %v236_v6  ;;  %v241_v13 = vrot.slane (!%p160_p3), %v224_v2, %v240_v7  ;;  %vm650_vm2 = vmor (!%p160_p3), %vm403_vm13, %vm400_vm12 }
   0xd   : > { %v257_v17 = vrot.slane (!%p160_p3), %v252_v3, %v228_v4  ;;  %v261_v18 = vrot.slane (!%p160_p3), %v252_v3, %v232_v5  ;;  %v265_v19 = vrot.slane (!%p160_p3), %v252_v3, %v236_v6  ;;  %v269_v20 = vrot.slane (!%p160_p3), %v252_v3, %v240_v7  ;;  %vm407_vm3 = vmand (!%p160_p3), %vm405_vm8, %vm406_vm9 }
   0xe   : > { %s701_s12 = smov (!%p194_p4, %s569_s12), 1  ;;  %v242_v27 = vcombine.low %v229_v10, %v233_v11  ;;  %v243_v28 = vcombine.low %v237_v12, %v241_v13  ;;  %vm665_vm4 = vmor %vm407_vm3, %vm650_vm2 }
   0xf   : > { %s529_s20 = smul.u32 24, %s701_s12  ;;  %v270_v29 = vcombine.low %v257_v17, %v261_v18  ;;  %v271_v30 = vcombine.low %v265_v19, %v269_v20 }
  0x11   : > { %s202_s23 = scalar_lea.vmem %s684_s0, %s529_s20  ;;  %s213_s26 = scalar_lea.vmem %s687_s3, %s529_s20 }
  0x12   : > { %v215_v14 = vld [vmem:[%s202_s23] sm:$0xff]  ;;  %v216_v15 = vld [vmem:[%s202_s23 + $0x8] sm:$0xff]  ;;  %v217_v16 = vld [vmem:[%s202_s23 + $0x10] sm:$0xff] }
  0x13   : > { %v218_v21 = vunpack.c.l.bf16 %v215_v14  ;;  %v219_v22 = vunpack.c.h.bf16 %v215_v14  ;;  %v220_v23 = vunpack.c.l.bf16 %v216_v15  ;;  %v221_v24 = vunpack.c.h.bf16 %v216_v15  ;;  %v409_v9 = vld [vmem:[%s213_s26] sm:$0xff]  ;;  %v412_v13 = vld [vmem:[%s213_s26 + $0x8] sm:$0xff] }
  0x14   : > { %v222_v25 = vunpack.c.l.bf16 %v217_v16  ;;  %v223_v26 = vunpack.c.h.bf16 %v217_v16 }
  0x15   : > { %v246_v32 = vmul.f32 %v242_v27, %v218_v21  ;;  %v247_v33 = vmul.f32 %v243_v28, %v219_v22  ;;  %v248_v35 = vmul.f32 %v242_v27, %v220_v23  ;;  %v249_v36 = vmul.f32 %v243_v28, %v221_v24  ;;  %v415_v21 = vld [vmem:[%s213_s26 + $0x10] sm:$0xff] }
  0x16   : > { %v250_v38 = vmul.f32 %v242_v27, %v222_v25  ;;  %v251_v39 = vmul.f32 %v243_v28, %v223_v26 }
  0x17   : > { %v274_v40 = vadd.f32 %v270_v29, %v246_v32  ;;  %v275_v41 = vadd.f32 %v271_v30, %v247_v33  ;;  %v276_v42 = vadd.f32 %v270_v29, %v248_v35  ;;  %v277_v43 = vadd.f32 %v271_v30, %v249_v36 }
  0x18   : > { %v278_v45 = vadd.f32 %v270_v29, %v250_v38  ;;  %v279_v46 = vadd.f32 %v271_v30, %v251_v39 }
  0x19   : > { %vm280_vm10 = vcmp.gt.f32.partialorder %v274_v40, 0.0  ;;  %vm281_vm11 = vcmp.gt.f32.partialorder %v275_v41, 0.0  ;;  %v286_v47 = vmul.f32 0.2, %v274_v40  ;;  %v287_v48 = vmul.f32 0.2, %v275_v41 }
  0x1a   : > { %vm282_vm14 = vcmp.gt.f32.partialorder %v276_v42, 0.0  ;;  %vm283_vm15 = vcmp.gt.f32.partialorder %v277_v43, 0.0  ;;  %v288_v49 = vmul.f32 0.2, %v276_v42  ;;  %v289_v50 = vmul.f32 0.2, %v277_v43 }
  0x1b   : > { %v292_v51 = vsel %vm280_vm10, %v274_v40, %v286_v47  ;;  %v293_v52 = vsel %vm281_vm11, %v275_v41, %v287_v48  ;;  %vm284_vm0 = vcmp.gt.f32.partialorder %v278_v45, 0.0  ;;  %vm285_vm1 = vcmp.gt.f32.partialorder %v279_v46, 0.0 }
  0x1c   : > { %v304_v53 = vcombine.high %v292_v51, %v292_v51  ;;  %v305_v54 = vcombine.high %v293_v52, %v293_v52  ;;  %v294_v55 = vsel %vm282_vm14, %v276_v42, %v288_v49  ;;  %v295_v56 = vsel %vm283_vm15, %v277_v43, %v289_v50 }
  0x1d   : > { %v306_v58 = vcombine.high %v294_v55, %v294_v55  ;;  %v307_v59 = vcombine.high %v295_v56, %v295_v56  ;;  %v290_v60 = vmul.f32 0.2, %v278_v45  ;;  %v291_v61 = vmul.f32 0.2, %v279_v46 }
  0x1e   : > { %v521_v62 = vpack.c.bf16 %v304_v53, %v292_v51  ;;  %v522_v63 = vpack.c.bf16 %v305_v54, %v293_v52 }
  0x1f   : > { %v523_v0 = vpack.c.bf16 %v306_v58, %v294_v55  ;;  %v524_v1 = vpack.c.bf16 %v307_v59, %v295_v56  ;;  %v296_v2 = vsel %vm284_vm0, %v278_v45, %v290_v60  ;;  %v297_v3 = vsel %vm285_vm1, %v279_v46, %v291_v61 }
  0x20   : > { %v348_v4 = vrot.slane %v521_v62, %v347_v44  ;;  %v355_v5 = vrot.slane %v522_v63, %v347_v44  ;;  %v308_v6 = vcombine.high %v296_v2, %v296_v2  ;;  %v309_v7 = vcombine.high %v297_v3, %v297_v3 }
  0x21   : > { %v365_v10 = vrot.slane %v523_v0, %v347_v44  ;;  %v372_v11 = vrot.slane %v524_v1, %v347_v44 }
  0x22   : > { %v356_v12 = vcombine.low %v348_v4, %v355_v5  ;;  %v525_v14 = vpack.c.bf16 %v308_v6, %v296_v2  ;;  %v526_v15 = vpack.c.bf16 %v309_v7, %v297_v3 }
  0x23   : > { %v373_v16 = vcombine.low %v365_v10, %v372_v11 }
  0x24   : > { %v410_v17 = vsel %vm665_vm4, %v356_v12, %v409_v9  ;;  %v382_v18 = vrot.slane %v525_v14, %v347_v44  ;;  %v389_v19 = vrot.slane %v526_v15, %v347_v44 }
  0x25   : > { %411 = vst [vmem:[%s213_s26] sm:$0xff] %v410_v17  ;;  %v413_v20 = vsel %vm665_vm4, %v373_v16, %v412_v13 }
  0x26   : > { %414 = vst [vmem:[%s213_s26 + $0x8] sm:$0xff] %v413_v20  ;;  %v390_v22 = vcombine.low %v382_v18, %v389_v19 }
  0x28   : > { %v416_v23 = vsel %vm665_vm4, %v390_v22, %v415_v21 }
  0x29   : > { %417 = vst [vmem:[%s213_s26 + $0x10] sm:$0xff] %v416_v23 }
  0x2a PF: > { %s13_s14 = sadd.s32 1, %s577_s14   ;;  %s696_s12 = smov %s573_s13 }
  0x2b   : > { %p10_p5 = scmp.ge.s32.totalorder %s13_s14, 4   ;;  %s697_s13 = smov %s699_s15 }
  0x2d   :  { %12 = sbr.rel (!%p10_p5) target bundleno = 2 (0x2), region = 62 }

// kernel: patch_discriminator.13
= control target key start
LH: loop header
LB: loop body
LE: loop exit
PB: predicated region body
PF: predicated region fallthrough
CT: control target
= control target key end

     0   :  { %s3684_s15 = smov 0   ;;  %s3686_s16 = smov 0   ;;  %s4126_s0 = inlined_call_operand.vmem [shape: bf16[2,6,6,256], index: 0, kind: input, shape index: {}]   ;;  %s4127_s1 = inlined_call_operand.vmem [shape: bf16[16,256,512], index: 1, kind: input, shape index: {}]   ;;  %s4128_s2 = inlined_call_operand.vmem [shape: bf16[2,3,3,512], index: 2, kind: output, shape index: {0}]   ;;  %s4129_s3 = inlined_call_operand.vmem [shape: f32[2,3,1,512], index: 3, kind: output, shape index: {1}]   ;;  %s4130_s4 = inlined_call_operand.vmem [shape: f32[2,3,1,512], index: 4, kind: output, shape index: {2}]  }
   0x1   :  { %s3688_s17 = smov 0   ;;  %s3690_s18 = smov 0  }
   0x2   :  { %s3692_s19 = smov 0   ;;  %s3694_s20 = smov 0  }
   0x3   :  { %s3696_s21 = smov 0  }
   0x4 LB: > { %s27_s22 = sadd.s32 1, %s3642_s18  ;;  %s30_s23 = sadd.s32 1, %s3646_s19  ;;  %s3654_s21 = sphi %s3696_s21, %s15_s21   ;;  %s3650_s20 = sphi %s3694_s20, %s4142_s20   ;;  %s3646_s19 = sphi %s3692_s19, %s4141_s19   ;;  %s3642_s18 = sphi %s3690_s18, %s4140_s18   ;;  %s3638_s17 = sphi %s3688_s17, %s4139_s17   ;;  %s3634_s16 = sphi %s3686_s16, %s4138_s16   ;;  %s3630_s15 = sphi %s3684_s15, %s4137_s15  }
   0x5   : > { %p28_p0 = scmp.ge.s32.totalorder %s27_s22, 4  ;;  %p2647_p1 = scmp.ge.s32.totalorder %s3654_s21, 1 }
   0x6   : > { %p202_p2 = scmp.lt.s32.totalorder %s3654_s21, 25  ;;  %s34_s24 = sadd.s32 1, %s3650_s20 }
   0x7   : > { %s4144_s22 = smov (%p28_p0, %s27_s22), 0  ;;  %s4146_s23 = smov (!%p28_p0, %s30_s23), %s3646_s19 }
   0x8   : > { %p203_p3 = pnand %p2647_p1, %p202_p2  ;;  %p32_p4 = scmp.ge.s32.totalorder %s4146_s23, 3 }
   0x9   : > { %s253_s25 = sadd.s32 (!%p203_p3), %s3630_s15, %s3634_s16  ;;  %p254_p6 = scmp.lt.s32.totalorder (!%p203_p3), %s3638_s17, 1 }
   0xa   : > { %s4148_s23 = smov (%p32_p4, %s4146_s23), 0  ;;  %s4150_s24 = smov (!%p32_p4, %s34_s24), %s3650_s20 }
   0xb   : > { %p36_p5 = scmp.ge.s32.totalorder %s4150_s24, 2  ;;  %206 = sbr.rel (%p203_p3) target bundleno = 543 (0x21f), region = 28 }
   0xc   : > { %p256_p7 = scmp.lt.s32.totalorder (!%p203_p3), %s253_s25, 5  ;;  %p266_p8 = scmp.lt.s32.totalorder (!%p203_p3), %s3634_s16, 2 }
   0xd   : > { %s4152_s24 = smov (%p36_p5, %s4150_s24), 0  ;;  %p2654_p9 = scmp.ne.s32.totalorder (!%p203_p3), %s3630_s15, 0 }
  0x12   : > { %s4154_s17 = smov (!%p254_p6, %s3638_s17), 1  ;;  %s4156_s25 = smov (!%p256_p7, %s253_s25), 5 }
  0x13   : > { %s3150_s26 = smul.u32 12, %s4154_s17  ;;  %s2648_s27 = sshll.u32 %s4156_s25, 1  ;;  %v3656_v0 = vmov (!%p2654_p9), 0.0  }
  0x14   : > { %s4158_s16 = smov (!%p266_p8, %s3634_s16), 2  ;;  %292 = sbr.rel (%p2654_p9) target bundleno = 27 (0x1b), region = 32 }
  0x15   : > { %s260_s28 = sadd.s32 %s3150_s26, %s2648_s27  ;;  %s2650_s7 = sshll.u32 %s4158_s16, 2  ;;  %293 = vst [vmem:[#allocation2] sm:$0x77] (!%p2654_p9), %v3656_v0  ;;  %294 = vst [vmem:[#allocation2 + $0x8] sm:$0x77] (!%p2654_p9), %v3656_v0 }
  0x16   : > { %s2649_s29 = sshll.u32 %s260_s28, 2  ;;  %s3739_s8 = sadd.s32 %s3150_s26, %s2650_s7 }
  0x17   : > { %s3736_s6 = scalar_lea.vmem %s4126_s0, %s2649_s29  ;;  %s2651_s9 = sshll.u32 %s3739_s8, 1 }
  0x18   : > { %s280_s12 = scalar_lea.vmem %s4129_s3, %s3739_s8  ;;  %s3749_s17 = scalar_lea.vmem %s4128_s2, %s2651_s9 }
  0x19   : > { %s288_s28 = scalar_lea.vmem %s4130_s4, %s3739_s8 }
  0x1b PF: > { %s3122_s16 = sshll.u32 %s3630_s15, 11  ;;  %v3758_v1 = vld [vmem:[%s3736_s6] sm:$0x33]  ;;  %p3116_p10 = scmp.ne.s32.totalorder %s3630_s15, 3 }
  0x1c   : > { %s3763_s30 = scalar_lea.vmem %s4127_s1, %s3122_s16  ;;  %v3767_v2 = vcombine.high %v3758_v1, %v3758_v1  ;;  %v3829_v63 = vcombine.low %v3758_v1, %v3758_v1  ;;  %vm2287_vm0 = vcmask (!%p3116_p10), 1041408   ;;  %vm2288_vm1 = vsmask.f32 (!%p3116_p10), 1280 }
  0x1d   : > { %v3210_v3 = vld [vmem:[%s3763_s30 + $0x204] ss:$16 sps:$4 sm:$0xff]   ;;  %v3212_v4 = vld [vmem:[%s3763_s30 + $0x20c] ss:$16 sps:$4 sm:$0xff]   ;;  %v3214_v7 = vld [vmem:[%s3763_s30 + $0x200] ss:$16 sps:$4 sm:$0xff]  }
  0x1e   : > { %v445_v5 = vshrl.u32 %v3767_v2, 16  ;;  %v447_v6 = vshll.u32 %v3767_v2, 16  ;;  %773 = vmatprep.subr.bf16.mxu0 %v3210_v3  ;;  %v3215_v8 = vld [vmem:[%s3763_s30 + $0x208] ss:$16 sps:$4 sm:$0xff]   ;;  %814 = vmatprep.subr.bf16.mxu1 %v3212_v4  ;;  %v3216_v9 = vld [vmem:[%s3763_s30 + $0x224] ss:$16 sps:$4 sm:$0xff]   ;;  %vm4056_vm4 = vmand (!%p3116_p10), %vm2287_vm0, %vm2288_vm1 }
  0x1f   : > { %774 = vmatpush1.bf16.msra.mxu0 %v3214_v7  ;;  %815 = vmatpush1.bf16.msra.mxu1 %v3215_v8  ;;  %v3218_v11 = vld [vmem:[%s3763_s30 + $0x22c] ss:$16 sps:$4 sm:$0xff]   ;;  %v3220_v12 = vld [vmem:[%s3763_s30 + $0x220] ss:$16 sps:$4 sm:$0xff]   ;;  %v3221_v13 = vld [vmem:[%s3763_s30 + $0x228] ss:$16 sps:$4 sm:$0xff]  }
  0x20   : > { %v449_v10 = vrot.slane %v447_v6, 1  ;;  %775 = vmatprep.subr.bf16.mxu0 %v3216_v9  ;;  %816 = vmatprep.subr.bf16.mxu1 %v3218_v11  ;;  %v3222_v15 = vld [vmem:[%s3763_s30 + $0x244] ss:$16 sps:$4 sm:$0xff]   ;;  %v3224_v16 = vld [vmem:[%s3763_s30 + $0x24c] ss:$16 sps:$4 sm:$0xff]   ;;  %v440_v6 = vshll.u32 %v3829_v63, 16 }
  0x21   : > { %v3226_v17 = vld [vmem:[%s3763_s30 + $0x240] ss:$16 sps:$4 sm:$0xff]   ;;  %v3227_v18 = vld [vmem:[%s3763_s30 + $0x248] ss:$16 sps:$4 sm:$0xff]   ;;  %v3228_v19 = vld [vmem:[%s3763_s30 + $0x264] ss:$16 sps:$4 sm:$0xff]  }
  0x22   : > { %v450_v14 = vor.u32 %v449_v10, %v445_v5  ;;  %v3230_v20 = vld [vmem:[%s3763_s30 + $0x26c] ss:$16 sps:$4 sm:$0xff]   ;;  %v3232_v21 = vld [vmem:[%s3763_s30 + $0x260] ss:$16 sps:$4 sm:$0xff]   ;;  %v3233_v22 = vld [vmem:[%s3763_s30 + $0x268] ss:$16 sps:$4 sm:$0xff]  }
  0x23   : > { %776 = vmatpush1.bf16.msra.mxu0 %v3220_v12  ;;  %817 = vmatpush1.bf16.msra.mxu1 %v3221_v13  ;;  %v3234_v23 = vld [vmem:[%s3763_s30 + $0x284] ss:$16 sps:$4 sm:$0xff]   ;;  %v3236_v24 = vld [vmem:[%s3763_s30 + $0x28c] ss:$16 sps:$4 sm:$0xff]   ;;  %v3238_v25 = vld [vmem:[%s3763_s30 + $0x280] ss:$16 sps:$4 sm:$0xff]  }
  0x24   : > { %805 = vmatprep.mubr.bf16.mxu0 %v450_v14  ;;  %846 = vmatprep.mubr.bf16.mxu1 %v450_v14  ;;  %v3239_v26 = vld [vmem:[%s3763_s30 + $0x288] ss:$16 sps:$4 sm:$0xff]   ;;  %v3240_v27 = vld [vmem:[%s3763_s30 + $0x2a4] ss:$16 sps:$4 sm:$0xff]   ;;  %v3242_v28 = vld [vmem:[%s3763_s30 + $0x2ac] ss:$16 sps:$4 sm:$0xff]  }
  0x25   : > { %777 = vmatprep.subr.bf16.mxu0 %v3222_v15  ;;  %818 = vmatprep.subr.bf16.mxu1 %v3224_v16  ;;  %v3244_v29 = vld [vmem:[%s3763_s30 + $0x2a0] ss:$16 sps:$4 sm:$0xff]   ;;  %v3245_v30 = vld [vmem:[%s3763_s30 + $0x2a8] ss:$16 sps:$4 sm:$0xff]   ;;  %v3246_v31 = vld [vmem:[%s3763_s30 + $0x2c4] ss:$16 sps:$4 sm:$0xff]  }
  0x26   : > { %v3248_v32 = vld [vmem:[%s3763_s30 + $0x2cc] ss:$16 sps:$4 sm:$0xff]   ;;  %v3250_v33 = vld [vmem:[%s3763_s30 + $0x2c0] ss:$16 sps:$4 sm:$0xff]   ;;  %v3251_v34 = vld [vmem:[%s3763_s30 + $0x2c8] ss:$16 sps:$4 sm:$0xff]  }
  0x27   : > { %778 = vmatpush1.bf16.msra.mxu0 %v3226_v17  ;;  %819 = vmatpush1.bf16.msra.mxu1 %v3227_v18  ;;  %v3252_v35 = vld [vmem:[%s3763_s30 + $0x2e4] ss:$16 sps:$4 sm:$0xff]   ;;  %v3254_v36 = vld [vmem:[%s3763_s30 + $0x2ec] ss:$16 sps:$4 sm:$0xff]   ;;  %v3256_v37 = vld [vmem:[%s3763_s30 + $0x2e0] ss:$16 sps:$4 sm:$0xff]  }
  0x28   : > { %779 = vmatprep.subr.bf16.mxu0 %v3228_v19  ;;  %820 = vmatprep.subr.bf16.mxu1 %v3230_v20  ;;  %v3257_v38 = vld [vmem:[%s3763_s30 + $0x2e8] ss:$16 sps:$4 sm:$0xff]   ;;  %v3258_v39 = vld [vmem:[%s3763_s30 + $0x304] ss:$16 sps:$4 sm:$0xff]   ;;  %v3260_v40 = vld [vmem:[%s3763_s30 + $0x30c] ss:$16 sps:$4 sm:$0xff]  }
  0x29   : > { %v3262_v41 = vld [vmem:[%s3763_s30 + $0x300] ss:$16 sps:$4 sm:$0xff]   ;;  %v3263_v42 = vld [vmem:[%s3763_s30 + $0x308] ss:$16 sps:$4 sm:$0xff]   ;;  %v3264_v43 = vld [vmem:[%s3763_s30 + $0x324] ss:$16 sps:$4 sm:$0xff]  }
  0x2a   : > { %v3266_v44 = vld [vmem:[%s3763_s30 + $0x32c] ss:$16 sps:$4 sm:$0xff]   ;;  %v3268_v45 = vld [vmem:[%s3763_s30 + $0x320] ss:$16 sps:$4 sm:$0xff]   ;;  %v3269_v46 = vld [vmem:[%s3763_s30 + $0x328] ss:$16 sps:$4 sm:$0xff]  }
  0x2b   : > { %780 = vmatpush1.bf16.msra.mxu0 %v3232_v21  ;;  %821 = vmatpush1.bf16.msra.mxu1 %v3233_v22  ;;  %v3270_v47 = vld [vmem:[%s3763_s30 + $0x344] ss:$16 sps:$4 sm:$0xff]   ;;  %v3272_v48 = vld [vmem:[%s3763_s30 + $0x34c] ss:$16 sps:$4 sm:$0xff]   ;;  %v3274_v49 = vld [vmem:[%s3763_s30 + $0x340] ss:$16 sps:$4 sm:$0xff]  }
  0x2c   : > { %781 = vmatprep.subr.bf16.mxu0 %v3234_v23  ;;  %822 = vmatprep.subr.bf16.mxu1 %v3236_v24  ;;  %v3275_v50 = vld [vmem:[%s3763_s30 + $0x348] ss:$16 sps:$4 sm:$0xff]   ;;  %v3276_v51 = vld [vmem:[%s3763_s30 + $0x364] ss:$16 sps:$4 sm:$0xff]   ;;  %v3278_v52 = vld [vmem:[%s3763_s30 + $0x36c] ss:$16 sps:$4 sm:$0xff]  }
  0x2d   : > { %v3280_v53 = vld [vmem:[%s3763_s30 + $0x360] ss:$16 sps:$4 sm:$0xff]   ;;  %v3281_v54 = vld [vmem:[%s3763_s30 + $0x368] ss:$16 sps:$4 sm:$0xff]   ;;  %v3282_v55 = vld [vmem:[%s3763_s30 + $0x384] ss:$16 sps:$4 sm:$0xff]  }
  0x2e   : > { %v3284_v56 = vld [vmem:[%s3763_s30 + $0x38c] ss:$16 sps:$4 sm:$0xff]   ;;  %v3286_v57 = vld [vmem:[%s3763_s30 + $0x380] ss:$16 sps:$4 sm:$0xff]   ;;  %v3287_v58 = vld [vmem:[%s3763_s30 + $0x388] ss:$16 sps:$4 sm:$0xff]  }
  0x2f   : > { %782 = vmatpush1.bf16.msra.mxu0 %v3238_v25  ;;  %823 = vmatpush1.bf16.msra.mxu1 %v3239_v26  ;;  %v3288_v59 = vld [vmem:[%s3763_s30 + $0x3a4] ss:$16 sps:$4 sm:$0xff]   ;;  %v3290_v60 = vld [vmem:[%s3763_s30 + $0x3ac] ss:$16 sps:$4 sm:$0xff]   ;;  %v3292_v61 = vld [vmem:[%s3763_s30 + $0x3a0] ss:$16 sps:$4 sm:$0xff]  }
  0x30   : > { %783 = vmatprep.subr.bf16.mxu0 %v3240_v27  ;;  %824 = vmatprep.subr.bf16.mxu1 %v3242_v28  ;;  %v3293_v62 = vld [vmem:[%s3763_s30 + $0x3a8] ss:$16 sps:$4 sm:$0xff]   ;;  %v3294_v0 = vld [vmem:[%s3763_s30 + $0x3c4] ss:$16 sps:$4 sm:$0xff]   ;;  %v3296_v3 = vld [vmem:[%s3763_s30 + $0x3cc] ss:$16 sps:$4 sm:$0xff]  }
  0x31   : > { %v3298_v4 = vld [vmem:[%s3763_s30 + $0x3c0] ss:$16 sps:$4 sm:$0xff]   ;;  %v3299_v5 = vld [vmem:[%s3763_s30 + $0x3c8] ss:$16 sps:$4 sm:$0xff]   ;;  %v3300_v1 = vld [vmem:[%s3763_s30 + $0x3e4] ss:$16 sps:$4 sm:$0xff]  }
  0x32   : > { %v3302_v7 = vld [vmem:[%s3763_s30 + $0x3ec] ss:$16 sps:$4 sm:$0xff]   ;;  %v438_v8 = vshrl.u32 %v3829_v63, 16  ;;  %v3304_v9 = vld [vmem:[%s3763_s30 + $0x3e0] ss:$16 sps:$4 sm:$0xff]   ;;  %v442_v11 = vrot.slane %v440_v6, 1 }
  0x33   : > { %784 = vmatpush1.bf16.msra.mxu0 %v3244_v29  ;;  %825 = vmatpush1.bf16.msra.mxu1 %v3245_v30  ;;  %v3305_v10 = vld [vmem:[%s3763_s30 + $0x3e8] ss:$16 sps:$4 sm:$0xff]   ;;  %v3310_v12 = vld [vmem:[%s3763_s30 + $0x4] ss:$16 sps:$4 sm:$0xff]   ;;  %v3313_v13 = vld [vmem:[%s3763_s30 + $0xc] ss:$16 sps:$4 sm:$0xff]  }
  0x34   : > { %785 = vmatprep.subr.bf16.mxu0 %v3246_v31  ;;  %826 = vmatprep.subr.bf16.mxu1 %v3248_v32  ;;  %v3308_v14 = vld [vmem:[%s3763_s30] ss:$16 sps:$4 sm:$0xff]   ;;  %v3311_v15 = vld [vmem:[%s3763_s30 + $0x8] ss:$16 sps:$4 sm:$0xff]   ;;  %v443_v16 = vor.u32 %v442_v11, %v438_v8  ;;  %v3316_v17 = vld [vmem:[%s3763_s30 + $0x24] ss:$16 sps:$4 sm:$0xff]  }
  0x35   : > { %v3319_v18 = vld [vmem:[%s3763_s30 + $0x2c] ss:$16 sps:$4 sm:$0xff]   ;;  %v3314_v19 = vld [vmem:[%s3763_s30 + $0x20] ss:$16 sps:$4 sm:$0xff]   ;;  %v3317_v20 = vld [vmem:[%s3763_s30 + $0x28] ss:$16 sps:$4 sm:$0xff]  }
  0x36   : > { %v3322_v21 = vld [vmem:[%s3763_s30 + $0x44] ss:$16 sps:$4 sm:$0xff]   ;;  %v3325_v22 = vld [vmem:[%s3763_s30 + $0x4c] ss:$16 sps:$4 sm:$0xff]   ;;  %v3320_v23 = vld [vmem:[%s3763_s30 + $0x40] ss:$16 sps:$4 sm:$0xff]  }
  0x37   : > { %786 = vmatpush1.bf16.msra.mxu0 %v3250_v33  ;;  %827 = vmatpush1.bf16.msra.mxu1 %v3251_v34  ;;  %v3323_v24 = vld [vmem:[%s3763_s30 + $0x48] ss:$16 sps:$4 sm:$0xff]   ;;  %v3328_v25 = vld [vmem:[%s3763_s30 + $0x64] ss:$16 sps:$4 sm:$0xff]   ;;  %v3331_v26 = vld [vmem:[%s3763_s30 + $0x6c] ss:$16 sps:$4 sm:$0xff]  }
  0x38   : > { %787 = vmatprep.subr.bf16.mxu0 %v3252_v35  ;;  %828 = vmatprep.subr.bf16.mxu1 %v3254_v36  ;;  %v3326_v27 = vld [vmem:[%s3763_s30 + $0x60] ss:$16 sps:$4 sm:$0xff]   ;;  %v3329_v28 = vld [vmem:[%s3763_s30 + $0x68] ss:$16 sps:$4 sm:$0xff]   ;;  %v3337_v29 = vld [vmem:[%s3763_s30 + $0x8c] ss:$16 sps:$4 sm:$0xff]  }
  0x39   : > { %v3332_v30 = vld [vmem:[%s3763_s30 + $0x80] ss:$16 sps:$4 sm:$0xff]   ;;  %v3335_v31 = vld [vmem:[%s3763_s30 + $0x88] ss:$16 sps:$4 sm:$0xff]   ;;  %v3340_v32 = vld [vmem:[%s3763_s30 + $0xa4] ss:$16 sps:$4 sm:$0xff]  }
  0x3a   : > { %v3343_v33 = vld [vmem:[%s3763_s30 + $0xac] ss:$16 sps:$4 sm:$0xff]   ;;  %v3338_v34 = vld [vmem:[%s3763_s30 + $0xa0] ss:$16 sps:$4 sm:$0xff]   ;;  %v3341_v35 = vld [vmem:[%s3763_s30 + $0xa8] ss:$16 sps:$4 sm:$0xff]  }
  0x3b   : > { %788 = vmatpush1.bf16.msra.mxu0 %v3256_v37  ;;  %829 = vmatpush1.bf16.msra.mxu1 %v3257_v38  ;;  %v3346_v36 = vld [vmem:[%s3763_s30 + $0xc4] ss:$16 sps:$4 sm:$0xff]   ;;  %v3349_v37 = vld [vmem:[%s3763_s30 + $0xcc] ss:$16 sps:$4 sm:$0xff]   ;;  %v3344_v38 = vld [vmem:[%s3763_s30 + $0xc0] ss:$16 sps:$4 sm:$0xff]  }
  0x3c   : > { %789 = vmatprep.subr.bf16.mxu0 %v3258_v39  ;;  %830 = vmatprep.subr.bf16.mxu1 %v3260_v40  ;;  %v3347_v39 = vld [vmem:[%s3763_s30 + $0xc8] ss:$16 sps:$4 sm:$0xff]   ;;  %v3352_v40 = vld [vmem:[%s3763_s30 + $0xe4] ss:$16 sps:$4 sm:$0xff]   ;;  %v3392_v8 = vld [vmem:[%s3763_s30 + $0x1c0] ss:$16 sps:$4 sm:$0xff]  }
  0x3d   : > { %v3389_v6 = vld [vmem:[%s3763_s30 + $0x1a8] ss:$16 sps:$4 sm:$0xff]   ;;  %v3403_v11 = vld [vmem:[%s3763_s30 + $0x1ec] ss:$16 sps:$4 sm:$0xff]   ;;  %vm2290_vm2 = vcmask (!%p3116_p10), 1043458   ;;  %vm2294_vm5 = vcmask (!%p3116_p10), 1045508  }
  0x3e   : > { %vm2291_vm3 = vsmask.f32 (!%p3116_p10), 3328  ;;  %vm2295_vm7 = vsmask.f32 (!%p3116_p10), 5376  ;;  %vm2298_vm8 = vcmask (!%p3116_p10), 1047558   ;;  %vm2305_vm10 = vcmask (!%p3116_p10), 1042432  }
  0x3f   : > { %790 = vmatpush1.bf16.msra.mxu0 %v3262_v41  ;;  %831 = vmatpush1.bf16.msra.mxu1 %v3263_v42  ;;  %v3355_v41 = vld [vmem:[%s3763_s30 + $0xec] ss:$16 sps:$4 sm:$0xff]   ;;  %v3350_v42 = vld [vmem:[%s3763_s30 + $0xe0] ss:$16 sps:$4 sm:$0xff]   ;;  %vm4060_vm6 = vmand (!%p3116_p10), %vm2290_vm2, %vm2291_vm3  ;;  %vm2299_vm9 = vsmask.f32 (!%p3116_p10), 7424 }
  0x40   : > { %791 = vmatprep.subr.bf16.mxu0 %v3264_v43  ;;  %832 = vmatprep.subr.bf16.mxu1 %v3266_v44  ;;  %v3353_v43 = vld [vmem:[%s3763_s30 + $0xe8] ss:$16 sps:$4 sm:$0xff]   ;;  %v3358_v44 = vld [vmem:[%s3763_s30 + $0x104] ss:$16 sps:$4 sm:$0xff]   ;;  %vm2293_vm11 = vmor (!%p3116_p10), %vm4060_vm6, %vm4056_vm4 }
  0x41   : > { %vm2296_vm12 = vmand (!%p3116_p10), %vm2294_vm5, %vm2295_vm7 }
  0x42   : > { %vm4071_vm13 = vmor (!%p3116_p10), %vm2296_vm12, %vm2293_vm11 }
  0x43   : > { %792 = vmatpush1.bf16.msra.mxu0 %v3268_v45  ;;  %833 = vmatpush1.bf16.msra.mxu1 %v3269_v46  ;;  %v3361_v45 = vld [vmem:[%s3763_s30 + $0x10c] ss:$16 sps:$4 sm:$0xff]   ;;  %v3356_v46 = vld [vmem:[%s3763_s30 + $0x100] ss:$16 sps:$4 sm:$0xff]   ;;  %vm2300_vm14 = vmand (!%p3116_p10), %vm2298_vm8, %vm2299_vm9 }
  0x44   : > { %793 = vmatprep.subr.bf16.mxu0 %v3270_v47  ;;  %834 = vmatprep.subr.bf16.mxu1 %v3272_v48  ;;  %v3359_v47 = vld [vmem:[%s3763_s30 + $0x108] ss:$16 sps:$4 sm:$0xff]   ;;  %v3364_v48 = vld [vmem:[%s3763_s30 + $0x124] ss:$16 sps:$4 sm:$0xff]   ;;  %vm2301_vm15 = vmor (!%p3116_p10), %vm2300_vm14, %vm4071_vm13 }
  0x47   : > { %794 = vmatpush1.bf16.msra.mxu0 %v3274_v49  ;;  %835 = vmatpush1.bf16.msra.mxu1 %v3275_v50  ;;  %v3367_v49 = vld [vmem:[%s3763_s30 + $0x12c] ss:$16 sps:$4 sm:$0xff]   ;;  %v3362_v50 = vld [vmem:[%s3763_s30 + $0x120] ss:$16 sps:$4 sm:$0xff]  }
  0x48   : > { %795 = vmatprep.subr.bf16.mxu0 %v3276_v51  ;;  %836 = vmatprep.subr.bf16.mxu1 %v3278_v52  ;;  %v3365_v51 = vld [vmem:[%s3763_s30 + $0x128] ss:$16 sps:$4 sm:$0xff]   ;;  %v3370_v52 = vld [vmem:[%s3763_s30 + $0x144] ss:$16 sps:$4 sm:$0xff]  }
  0x4b   : > { %796 = vmatpush1.bf16.msra.mxu0 %v3280_v53  ;;  %837 = vmatpush1.bf16.msra.mxu1 %v3281_v54  ;;  %v3373_v53 = vld [vmem:[%s3763_s30 + $0x14c] ss:$16 sps:$4 sm:$0xff]   ;;  %v3368_v54 = vld [vmem:[%s3763_s30 + $0x140] ss:$16 sps:$4 sm:$0xff]  }
  0x4c   : > { %797 = vmatprep.subr.bf16.mxu0 %v3282_v55  ;;  %838 = vmatprep.subr.bf16.mxu1 %v3284_v56  ;;  %v3371_v55 = vld [vmem:[%s3763_s30 + $0x148] ss:$16 sps:$4 sm:$0xff]   ;;  %v3376_v56 = vld [vmem:[%s3763_s30 + $0x164] ss:$16 sps:$4 sm:$0xff]  }
  0x4f   : > { %798 = vmatpush1.bf16.msra.mxu0 %v3286_v57  ;;  %839 = vmatpush1.bf16.msra.mxu1 %v3287_v58  ;;  %v3379_v57 = vld [vmem:[%s3763_s30 + $0x16c] ss:$16 sps:$4 sm:$0xff]   ;;  %v3374_v58 = vld [vmem:[%s3763_s30 + $0x160] ss:$16 sps:$4 sm:$0xff]  }
  0x50   : > { %799 = vmatprep.subr.bf16.mxu0 %v3288_v59  ;;  %840 = vmatprep.subr.bf16.mxu1 %v3290_v60  ;;  %v3377_v59 = vld [vmem:[%s3763_s30 + $0x168] ss:$16 sps:$4 sm:$0xff]   ;;  %v3382_v60 = vld [vmem:[%s3763_s30 + $0x184] ss:$16 sps:$4 sm:$0xff]  }
  0x53   : > { %800 = vmatpush1.bf16.msra.mxu0 %v3292_v61  ;;  %841 = vmatpush1.bf16.msra.mxu1 %v3293_v62  ;;  %v3385_v61 = vld [vmem:[%s3763_s30 + $0x18c] ss:$16 sps:$4 sm:$0xff]   ;;  %v3380_v62 = vld [vmem:[%s3763_s30 + $0x180] ss:$16 sps:$4 sm:$0xff]  }
  0x54   : > { %801 = vmatprep.subr.bf16.mxu0 %v3294_v0  ;;  %842 = vmatprep.subr.bf16.mxu1 %v3296_v3  ;;  %v3383_v0 = vld [vmem:[%s3763_s30 + $0x188] ss:$16 sps:$4 sm:$0xff]   ;;  %v3388_v3 = vld [vmem:[%s3763_s30 + $0x1a4] ss:$16 sps:$4 sm:$0xff]  }
  0x57   : > { %802 = vmatpush1.bf16.msra.mxu0 %v3298_v4  ;;  %843 = vmatpush1.bf16.msra.mxu1 %v3299_v5  ;;  %v3391_v4 = vld [vmem:[%s3763_s30 + $0x1ac] ss:$16 sps:$4 sm:$0xff]   ;;  %v3386_v5 = vld [vmem:[%s3763_s30 + $0x1a0] ss:$16 sps:$4 sm:$0xff]  }
  0x58   : > { %803 = vmatprep.subr.bf16.mxu0 %v3300_v1  ;;  %844 = vmatprep.subr.bf16.mxu1 %v3302_v7  ;;  %v3394_v1 = vld [vmem:[%s3763_s30 + $0x1c4] ss:$16 sps:$4 sm:$0xff]   ;;  %v3397_v7 = vld [vmem:[%s3763_s30 + $0x1cc] ss:$16 sps:$4 sm:$0xff]  }
  0x5b   : > { %804 = vmatpush1.bf16.msra.mxu0 %v3304_v9  ;;  %845 = vmatpush1.bf16.msra.mxu1 %v3305_v10  ;;  %v3395_v9 = vld [vmem:[%s3763_s30 + $0x1c8] ss:$16 sps:$4 sm:$0xff]   ;;  %v3400_v10 = vld [vmem:[%s3763_s30 + $0x1e4] ss:$16 sps:$4 sm:$0xff]  }
  0x5c   : > { %1177 = vmatprep.subr.bf16.mxu0 %v3310_v12  ;;  %1218 = vmatprep.subr.bf16.mxu1 %v3313_v13  ;;  %v3398_v12 = vld [vmem:[%s3763_s30 + $0x1e0] ss:$16 sps:$4 sm:$0xff]   ;;  %v3401_v13 = vld [vmem:[%s3763_s30 + $0x1e8] ss:$16 sps:$4 sm:$0xff]  }
  0x5e   : > { %806 = vmatmul.mubr.bf16.vlgmr.msra.gmra.mrb[0].mxu0 %v443_v16  ;;  %847 = vmatmul.mubr.bf16.vlgmr.msra.gmra.mrb[0].mxu1 %v443_v16  ;;  %v3404_v16 = vld [vmem:[%s3763_s30 + $0x400] ss:$16 sps:$4 sm:$0xff]  }
  0x5f   : > { %1178 = vmatpush1.bf16.msra.mxu0 %v3308_v14  ;;  %1219 = vmatpush1.bf16.msra.mxu1 %v3311_v15  ;;  %v3406_v14 = vld [vmem:[%s3763_s30 + $0x404] ss:$16 sps:$4 sm:$0xff]   ;;  %v3409_v15 = vld [vmem:[%s3763_s30 + $0x40c] ss:$16 sps:$4 sm:$0xff]  }
  0x60   : > { %1179 = vmatprep.subr.bf16.mxu0 %v3316_v17  ;;  %1220 = vmatprep.subr.bf16.mxu1 %v3319_v18  ;;  %v3407_v17 = vld [vmem:[%s3763_s30 + $0x408] ss:$16 sps:$4 sm:$0xff]   ;;  %v3912_v18 = vld [vmem:[%s3736_s6] sm:$0x66] }
  0x61   : > { %1209 = vmatprep.mubr.bf16.mxu0 %v3767_v2  ;;  %1250 = vmatprep.mubr.bf16.mxu1 %v3767_v2  ;;  %v3334_v2 = vld [vmem:[%s3763_s30 + $0x84] ss:$16 sps:$4 sm:$0xff]  }
  0x63   : > { %1180 = vmatpush1.bf16.msra.mxu0 %v3314_v19  ;;  %1221 = vmatpush1.bf16.msra.mxu1 %v3317_v20  ;;  %v3412_v19 = vld [vmem:[%s3763_s30 + $0x424] ss:$16 sps:$4 sm:$0xff]   ;;  %v3415_v20 = vld [vmem:[%s3763_s30 + $0x42c] ss:$16 sps:$4 sm:$0xff]  }
  0x64   : > { %1181 = vmatprep.subr.bf16.mxu0 %v3322_v21  ;;  %1222 = vmatprep.subr.bf16.mxu1 %v3325_v22  ;;  %v3918_v21 = vcombine.high %v3912_v18, %v3912_v18  ;;  %v3410_v22 = vld [vmem:[%s3763_s30 + $0x420] ss:$16 sps:$4 sm:$0xff]  }
  0x67   : > { %1182 = vmatpush1.bf16.msra.mxu0 %v3320_v23  ;;  %1223 = vmatpush1.bf16.msra.mxu1 %v3323_v24  ;;  %v1334_v23 = vrot.slane %v3918_v21, 1  ;;  %v3413_v24 = vld [vmem:[%s3763_s30 + $0x428] ss:$16 sps:$4 sm:$0xff]  }
  0x68   : > { %1183 = vmatprep.subr.bf16.mxu0 %v3328_v25  ;;  %1224 = vmatprep.subr.bf16.mxu1 %v3331_v26  ;;  %v3418_v25 = vld [vmem:[%s3763_s30 + $0x444] ss:$16 sps:$4 sm:$0xff]   ;;  %v3421_v26 = vld [vmem:[%s3763_s30 + $0x44c] ss:$16 sps:$4 sm:$0xff]  }
  0x6b   : > { %1184 = vmatpush1.bf16.msra.mxu0 %v3326_v27  ;;  %1225 = vmatpush1.bf16.msra.mxu1 %v3329_v28  ;;  %v3416_v27 = vld [vmem:[%s3763_s30 + $0x440] ss:$16 sps:$4 sm:$0xff]   ;;  %v3424_v28 = vld [vmem:[%s3763_s30 + $0x464] ss:$16 sps:$4 sm:$0xff]  }
  0x6c   : > { %1185 = vmatprep.subr.bf16.mxu0 %v3334_v2  ;;  %1226 = vmatprep.subr.bf16.mxu1 %v3337_v29  ;;  %v3427_v2 = vld [vmem:[%s3763_s30 + $0x46c] ss:$16 sps:$4 sm:$0xff]   ;;  %v3422_v29 = vld [vmem:[%s3763_s30 + $0x460] ss:$16 sps:$4 sm:$0xff]  }
  0x6f   : > { %1186 = vmatpush1.bf16.msra.mxu0 %v3332_v30  ;;  %1227 = vmatpush1.bf16.msra.mxu1 %v3335_v31  ;;  %v3425_v30 = vld [vmem:[%s3763_s30 + $0x468] ss:$16 sps:$4 sm:$0xff]   ;;  %v3430_v31 = vld [vmem:[%s3763_s30 + $0x484] ss:$16 sps:$4 sm:$0xff]  }
  0x70   : > { %1187 = vmatprep.subr.bf16.mxu0 %v3340_v32  ;;  %1228 = vmatprep.subr.bf16.mxu1 %v3343_v33  ;;  %v3433_v32 = vld [vmem:[%s3763_s30 + $0x48c] ss:$16 sps:$4 sm:$0xff]   ;;  %v3428_v33 = vld [vmem:[%s3763_s30 + $0x480] ss:$16 sps:$4 sm:$0xff]  }
  0x73   : > { %1188 = vmatpush1.bf16.msra.mxu0 %v3338_v34  ;;  %1229 = vmatpush1.bf16.msra.mxu1 %v3341_v35  ;;  %v3431_v34 = vld [vmem:[%s3763_s30 + $0x488] ss:$16 sps:$4 sm:$0xff]   ;;  %v3436_v35 = vld [vmem:[%s3763_s30 + $0x4a4] ss:$16 sps:$4 sm:$0xff]  }
  0x74   : > { %1189 = vmatprep.subr.bf16.mxu0 %v3346_v36  ;;  %1230 = vmatprep.subr.bf16.mxu1 %v3349_v37  ;;  %v3439_v36 = vld [vmem:[%s3763_s30 + $0x4ac] ss:$16 sps:$4 sm:$0xff]   ;;  %v3434_v37 = vld [vmem:[%s3763_s30 + $0x4a0] ss:$16 sps:$4 sm:$0xff]  }
  0x77   : > { %1190 = vmatpush1.bf16.msra.mxu0 %v3344_v38  ;;  %1231 = vmatpush1.bf16.msra.mxu1 %v3347_v39  ;;  %v3437_v38 = vld [vmem:[%s3763_s30 + $0x4a8] ss:$16 sps:$4 sm:$0xff]   ;;  %v3442_v39 = vld [vmem:[%s3763_s30 + $0x4c4] ss:$16 sps:$4 sm:$0xff]  }
  0x78   : > { %1191 = vmatprep.subr.bf16.mxu0 %v3352_v40  ;;  %1232 = vmatprep.subr.bf16.mxu1 %v3355_v41  ;;  %v3445_v40 = vld [vmem:[%s3763_s30 + $0x4cc] ss:$16 sps:$4 sm:$0xff]   ;;  %v3440_v41 = vld [vmem:[%s3763_s30 + $0x4c0] ss:$16 sps:$4 sm:$0xff]  }
  0x7b   : > { %1192 = vmatpush1.bf16.msra.mxu0 %v3350_v42  ;;  %1233 = vmatpush1.bf16.msra.mxu1 %v3353_v43  ;;  %v3443_v42 = vld [vmem:[%s3763_s30 + $0x4c8] ss:$16 sps:$4 sm:$0xff]   ;;  %v3448_v43 = vld [vmem:[%s3763_s30 + $0x4e4] ss:$16 sps:$4 sm:$0xff]  }
  0x7c   : > { %1193 = vmatprep.subr.bf16.mxu0 %v3358_v44  ;;  %1234 = vmatprep.subr.bf16.mxu1 %v3361_v45  ;;  %v3451_v44 = vld [vmem:[%s3763_s30 + $0x4ec] ss:$16 sps:$4 sm:$0xff]   ;;  %v3446_v45 = vld [vmem:[%s3763_s30 + $0x4e0] ss:$16 sps:$4 sm:$0xff]  }
  0x7f   : > { %1194 = vmatpush1.bf16.msra.mxu0 %v3356_v46  ;;  %1235 = vmatpush1.bf16.msra.mxu1 %v3359_v47  ;;  %v3449_v46 = vld [vmem:[%s3763_s30 + $0x4e8] ss:$16 sps:$4 sm:$0xff]   ;;  %v3454_v47 = vld [vmem:[%s3763_s30 + $0x504] ss:$16 sps:$4 sm:$0xff]  }
  0x80   : > { %1195 = vmatprep.subr.bf16.mxu0 %v3364_v48  ;;  %1236 = vmatprep.subr.bf16.mxu1 %v3367_v49  ;;  %v3457_v48 = vld [vmem:[%s3763_s30 + $0x50c] ss:$16 sps:$4 sm:$0xff]   ;;  %v3452_v49 = vld [vmem:[%s3763_s30 + $0x500] ss:$16 sps:$4 sm:$0xff]  }
  0x83   : > { %1196 = vmatpush1.bf16.msra.mxu0 %v3362_v50  ;;  %1237 = vmatpush1.bf16.msra.mxu1 %v3365_v51  ;;  %v3455_v50 = vld [vmem:[%s3763_s30 + $0x508] ss:$16 sps:$4 sm:$0xff]   ;;  %v3460_v51 = vld [vmem:[%s3763_s30 + $0x524] ss:$16 sps:$4 sm:$0xff]  }
  0x84   : > { %1197 = vmatprep.subr.bf16.mxu0 %v3370_v52  ;;  %1238 = vmatprep.subr.bf16.mxu1 %v3373_v53  ;;  %v3463_v52 = vld [vmem:[%s3763_s30 + $0x52c] ss:$16 sps:$4 sm:$0xff]   ;;  %v3458_v53 = vld [vmem:[%s3763_s30 + $0x520] ss:$16 sps:$4 sm:$0xff]  }
  0x87   : > { %1198 = vmatpush1.bf16.msra.mxu0 %v3368_v54  ;;  %1239 = vmatpush1.bf16.msra.mxu1 %v3371_v55  ;;  %v3461_v54 = vld [vmem:[%s3763_s30 + $0x528] ss:$16 sps:$4 sm:$0xff]   ;;  %v3466_v55 = vld [vmem:[%s3763_s30 + $0x544] ss:$16 sps:$4 sm:$0xff]  }
  0x88   : > { %1199 = vmatprep.subr.bf16.mxu0 %v3376_v56  ;;  %1240 = vmatprep.subr.bf16.mxu1 %v3379_v57  ;;  %v3469_v56 = vld [vmem:[%s3763_s30 + $0x54c] ss:$16 sps:$4 sm:$0xff]   ;;  %v3464_v57 = vld [vmem:[%s3763_s30 + $0x540] ss:$16 sps:$4 sm:$0xff]  }
  0x8b   : > { %1200 = vmatpush1.bf16.msra.mxu0 %v3374_v58  ;;  %1241 = vmatpush1.bf16.msra.mxu1 %v3377_v59  ;;  %v3467_v58 = vld [vmem:[%s3763_s30 + $0x548] ss:$16 sps:$4 sm:$0xff]   ;;  %v3472_v59 = vld [vmem:[%s3763_s30 + $0x564] ss:$16 sps:$4 sm:$0xff]  }
  0x8c   : > { %1201 = vmatprep.subr.bf16.mxu0 %v3382_v60  ;;  %1242 = vmatprep.subr.bf16.mxu1 %v3385_v61  ;;  %v3475_v60 = vld [vmem:[%s3763_s30 + $0x56c] ss:$16 sps:$4 sm:$0xff]   ;;  %v3470_v61 = vld [vmem:[%s3763_s30 + $0x560] ss:$16 sps:$4 sm:$0xff]  }
  0x8f   : > { %1202 = vmatpush1.bf16.msra.mxu0 %v3380_v62  ;;  %1243 = vmatpush1.bf16.msra.mxu1 %v3383_v0  ;;  %v3473_v62 = vld [vmem:[%s3763_s30 + $0x568] ss:$16 sps:$4 sm:$0xff]   ;;  %v3478_v0 = vld [vmem:[%s3763_s30 + $0x584] ss:$16 sps:$4 sm:$0xff]  }
  0x90   : > { %1203 = vmatprep.subr.bf16.mxu0 %v3388_v3  ;;  %1244 = vmatprep.subr.bf16.mxu1 %v3391_v4  ;;  %v3481_v3 = vld [vmem:[%s3763_s30 + $0x58c] ss:$16 sps:$4 sm:$0xff]   ;;  %v3476_v4 = vld [vmem:[%s3763_s30 + $0x580] ss:$16 sps:$4 sm:$0xff]  }
  0x93   : > { %1204 = vmatpush1.bf16.msra.mxu0 %v3386_v5  ;;  %1245 = vmatpush1.bf16.msra.mxu1 %v3389_v6  ;;  %v3479_v5 = vld [vmem:[%s3763_s30 + $0x588] ss:$16 sps:$4 sm:$0xff]   ;;  %v3484_v6 = vld [vmem:[%s3763_s30 + $0x5a4] ss:$16 sps:$4 sm:$0xff]  }
  0x94   : > { %1205 = vmatprep.subr.bf16.mxu0 %v3394_v1  ;;  %1246 = vmatprep.subr.bf16.mxu1 %v3397_v7  ;;  %v3487_v1 = vld [vmem:[%s3763_s30 + $0x5ac] ss:$16 sps:$4 sm:$0xff]   ;;  %v3482_v7 = vld [vmem:[%s3763_s30 + $0x5a0] ss:$16 sps:$4 sm:$0xff]  }
  0x97   : > { %1206 = vmatpush1.bf16.msra.mxu0 %v3392_v8  ;;  %1247 = vmatpush1.bf16.msra.mxu1 %v3395_v9  ;;  %v3485_v8 = vld [vmem:[%s3763_s30 + $0x5a8] ss:$16 sps:$4 sm:$0xff]   ;;  %v3490_v9 = vld [vmem:[%s3763_s30 + $0x5c4] ss:$16 sps:$4 sm:$0xff]  }
  0x98   : > { %1207 = vmatprep.subr.bf16.mxu0 %v3400_v10  ;;  %1248 = vmatprep.subr.bf16.mxu1 %v3403_v11  ;;  %v3493_v10 = vld [vmem:[%s3763_s30 + $0x5cc] ss:$16 sps:$4 sm:$0xff]   ;;  %v3488_v11 = vld [vmem:[%s3763_s30 + $0x5c0] ss:$16 sps:$4 sm:$0xff]  }
  0x9b   : > { %1208 = vmatpush1.bf16.msra.mxu0 %v3398_v12  ;;  %1249 = vmatpush1.bf16.msra.mxu1 %v3401_v13  ;;  %v3491_v12 = vld [vmem:[%s3763_s30 + $0x5c8] ss:$16 sps:$4 sm:$0xff]   ;;  %v3496_v13 = vld [vmem:[%s3763_s30 + $0x5e4] ss:$16 sps:$4 sm:$0xff]  }
  0x9c   : > { %1657 = vmatprep.subr.bf16.mxu0 %v3406_v14  ;;  %1698 = vmatprep.subr.bf16.mxu1 %v3409_v15  ;;  %v3499_v14 = vld [vmem:[%s3763_s30 + $0x5ec] ss:$16 sps:$4 sm:$0xff]   ;;  %v1820_v15 = vshrl.u32 %v3918_v21, 16 }
  0x9e   : > { %1210 = vmatmul.mubr.bf16.vlgmr.msra.gmra.mrb[0].mxu0 %v3829_v63  ;;  %1251 = vmatmul.mubr.bf16.vlgmr.msra.gmra.mrb[0].mxu1 %v3829_v63  ;;  %v3419_v63 = vld [vmem:[%s3763_s30 + $0x448] ss:$16 sps:$4 sm:$0xff]  }
  0x9f   : > { %1658 = vmatpush1.bf16.msra.mxu0 %v3404_v16  ;;  %1699 = vmatpush1.bf16.msra.mxu1 %v3407_v17  ;;  %v1823_v16 = vshll.u32 %v3918_v21, 16  ;;  %v3983_v17 = vcombine.low %v3912_v18, %v3912_v18  ;;  %v3502_v18 = vld [vmem:[%s3763_s30 + $0x600] ss:$16 sps:$4 sm:$0xff]  }
  0xa0   : > { %1659 = vmatprep.subr.bf16.mxu0 %v3412_v19  ;;  %1700 = vmatprep.subr.bf16.mxu1 %v3415_v20  ;;  %v3494_v19 = vld [vmem:[%s3763_s30 + $0x5e0] ss:$16 sps:$4 sm:$0xff]   ;;  %v3497_v20 = vld [vmem:[%s3763_s30 + $0x5e8] ss:$16 sps:$4 sm:$0xff]  }
  0xa1   : > { %1689 = vmatprep.mubr.bf16.mxu0 %v1334_v23  ;;  %1730 = vmatprep.mubr.bf16.mxu1 %v1334_v23  ;;  %v3507_v23 = vld [vmem:[%s3763_s30 + $0x60c] ss:$16 sps:$4 sm:$0xff]   ;;  %v1333_v21 = vrot.slane %v3983_v17, 1 }
  0xa3   : > { %1660 = vmatpush1.bf16.msra.mxu0 %v3410_v22  ;;  %1701 = vmatpush1.bf16.msra.mxu1 %v3413_v24  ;;  %v3504_v22 = vld [vmem:[%s3763_s30 + $0x604] ss:$16 sps:$4 sm:$0xff]   ;;  %v1822_v24 = vrot.slane %v1820_v15, 1  ;;  %v3583_v15 = vld [vmem:[%s3763_s30 + $0x7a8] ss:$16 sps:$4 sm:$0xff]  }
  0xa4   : > { %1661 = vmatprep.subr.bf16.mxu0 %v3418_v25  ;;  %1702 = vmatprep.subr.bf16.mxu1 %v3421_v26  ;;  %v1825_v25 = vrot.slane %v1823_v16, 2  ;;  %v3505_v26 = vld [vmem:[%s3763_s30 + $0x608] ss:$16 sps:$4 sm:$0xff]   ;;  %v3588_v16 = vld [vmem:[%s3763_s30 + $0x7c4] ss:$16 sps:$4 sm:$0xff]  }
  0xa7   : > { %1662 = vmatpush1.bf16.msra.mxu0 %v3416_v27  ;;  %1703 = vmatpush1.bf16.msra.mxu1 %v3419_v63  ;;  %v3510_v27 = vld [vmem:[%s3763_s30 + $0x624] ss:$16 sps:$4 sm:$0xff]   ;;  %v3513_v63 = vld [vmem:[%s3763_s30 + $0x62c] ss:$16 sps:$4 sm:$0xff]  }
  0xa8   : > { %1663 = vmatprep.subr.bf16.mxu0 %v3424_v28  ;;  %1704 = vmatprep.subr.bf16.mxu1 %v3427_v2  ;;  %v1826_v28 = vor.u32 %v1825_v25, %v1822_v24  ;;  %v3508_v2 = vld [vmem:[%s3763_s30 + $0x620] ss:$16 sps:$4 sm:$0xff]   ;;  %v3589_v24 = vld [vmem:[%s3763_s30 + $0x7c8] ss:$16 sps:$4 sm:$0xff]   ;;  %v3594_v25 = vld [vmem:[%s3763_s30 + $0x7e4] ss:$16 sps:$4 sm:$0xff]  }
  0xab   : > { %1664 = vmatpush1.bf16.msra.mxu0 %v3422_v29  ;;  %1705 = vmatpush1.bf16.msra.mxu1 %v3425_v30  ;;  %v3511_v29 = vld [vmem:[%s3763_s30 + $0x628] ss:$16 sps:$4 sm:$0xff]   ;;  %v3516_v30 = vld [vmem:[%s3763_s30 + $0x644] ss:$16 sps:$4 sm:$0xff]  }
  0xac   : > { %1665 = vmatprep.subr.bf16.mxu0 %v3430_v31  ;;  %1706 = vmatprep.subr.bf16.mxu1 %v3433_v32  ;;  %v3519_v31 = vld [vmem:[%s3763_s30 + $0x64c] ss:$16 sps:$4 sm:$0xff]   ;;  %v3514_v32 = vld [vmem:[%s3763_s30 + $0x640] ss:$16 sps:$4 sm:$0xff]  }
  0xaf   : > { %1666 = vmatpush1.bf16.msra.mxu0 %v3428_v33  ;;  %1707 = vmatpush1.bf16.msra.mxu1 %v3431_v34  ;;  %v3517_v33 = vld [vmem:[%s3763_s30 + $0x648] ss:$16 sps:$4 sm:$0xff]   ;;  %v3522_v34 = vld [vmem:[%s3763_s30 + $0x664] ss:$16 sps:$4 sm:$0xff]  }
  0xb0   : > { %1667 = vmatprep.subr.bf16.mxu0 %v3436_v35  ;;  %1708 = vmatprep.subr.bf16.mxu1 %v3439_v36  ;;  %v3525_v35 = vld [vmem:[%s3763_s30 + $0x66c] ss:$16 sps:$4 sm:$0xff]   ;;  %v3520_v36 = vld [vmem:[%s3763_s30 + $0x660] ss:$16 sps:$4 sm:$0xff]  }
  0xb3   : > { %1668 = vmatpush1.bf16.msra.mxu0 %v3434_v37  ;;  %1709 = vmatpush1.bf16.msra.mxu1 %v3437_v38  ;;  %v3523_v37 = vld [vmem:[%s3763_s30 + $0x668] ss:$16 sps:$4 sm:$0xff]   ;;  %v3528_v38 = vld [vmem:[%s3763_s30 + $0x684] ss:$16 sps:$4 sm:$0xff]  }
  0xb4   : > { %1669 = vmatprep.subr.bf16.mxu0 %v3442_v39  ;;  %1710 = vmatprep.subr.bf16.mxu1 %v3445_v40  ;;  %v3531_v39 = vld [vmem:[%s3763_s30 + $0x68c] ss:$16 sps:$4 sm:$0xff]   ;;  %v3526_v40 = vld [vmem:[%s3763_s30 + $0x680] ss:$16 sps:$4 sm:$0xff]  }
  0xb7   : > { %1670 = vmatpush1.bf16.msra.mxu0 %v3440_v41  ;;  %1711 = vmatpush1.bf16.msra.mxu1 %v3443_v42  ;;  %v3529_v41 = vld [vmem:[%s3763_s30 + $0x688] ss:$16 sps:$4 sm:$0xff]   ;;  %v3534_v42 = vld [vmem:[%s3763_s30 + $0x6a4] ss:$16 sps:$4 sm:$0xff]  }
  0xb8   : > { %1671 = vmatprep.subr.bf16.mxu0 %v3448_v43  ;;  %1712 = vmatprep.subr.bf16.mxu1 %v3451_v44  ;;  %v3537_v43 = vld [vmem:[%s3763_s30 + $0x6ac] ss:$16 sps:$4 sm:$0xff]   ;;  %v3532_v44 = vld [vmem:[%s3763_s30 + $0x6a0] ss:$16 sps:$4 sm:$0xff]  }
  0xbb   : > { %1672 = vmatpush1.bf16.msra.mxu0 %v3446_v45  ;;  %1713 = vmatpush1.bf16.msra.mxu1 %v3449_v46  ;;  %v3535_v45 = vld [vmem:[%s3763_s30 + $0x6a8] ss:$16 sps:$4 sm:$0xff]   ;;  %v3540_v46 = vld [vmem:[%s3763_s30 + $0x6c4] ss:$16 sps:$4 sm:$0xff]  }
  0xbc   : > { %1673 = vmatprep.subr.bf16.mxu0 %v3454_v47  ;;  %1714 = vmatprep.subr.bf16.mxu1 %v3457_v48  ;;  %v3543_v47 = vld [vmem:[%s3763_s30 + $0x6cc] ss:$16 sps:$4 sm:$0xff]   ;;  %v3538_v48 = vld [vmem:[%s3763_s30 + $0x6c0] ss:$16 sps:$4 sm:$0xff]  }
  0xbf   : > { %1674 = vmatpush1.bf16.msra.mxu0 %v3452_v49  ;;  %1715 = vmatpush1.bf16.msra.mxu1 %v3455_v50  ;;  %v3541_v49 = vld [vmem:[%s3763_s30 + $0x6c8] ss:$16 sps:$4 sm:$0xff]   ;;  %v3546_v50 = vld [vmem:[%s3763_s30 + $0x6e4] ss:$16 sps:$4 sm:$0xff]  }
  0xc0   : > { %1675 = vmatprep.subr.bf16.mxu0 %v3460_v51  ;;  %1716 = vmatprep.subr.bf16.mxu1 %v3463_v52  ;;  %v3549_v51 = vld [vmem:[%s3763_s30 + $0x6ec] ss:$16 sps:$4 sm:$0xff]   ;;  %v3544_v52 = vld [vmem:[%s3763_s30 + $0x6e0] ss:$16 sps:$4 sm:$0xff]  }
  0xc3   : > { %1676 = vmatpush1.bf16.msra.mxu0 %v3458_v53  ;;  %1717 = vmatpush1.bf16.msra.mxu1 %v3461_v54  ;;  %v3547_v53 = vld [vmem:[%s3763_s30 + $0x6e8] ss:$16 sps:$4 sm:$0xff]   ;;  %v3552_v54 = vld [vmem:[%s3763_s30 + $0x704] ss:$16 sps:$4 sm:$0xff]  }
  0xc4   : > { %1677 = vmatprep.subr.bf16.mxu0 %v3466_v55  ;;  %1718 = vmatprep.subr.bf16.mxu1 %v3469_v56  ;;  %v3555_v55 = vld [vmem:[%s3763_s30 + $0x70c] ss:$16 sps:$4 sm:$0xff]   ;;  %v3550_v56 = vld [vmem:[%s3763_s30 + $0x700] ss:$16 sps:$4 sm:$0xff]  }
  0xc7   : > { %1678 = vmatpush1.bf16.msra.mxu0 %v3464_v57  ;;  %1719 = vmatpush1.bf16.msra.mxu1 %v3467_v58  ;;  %v3553_v57 = vld [vmem:[%s3763_s30 + $0x708] ss:$16 sps:$4 sm:$0xff]   ;;  %v3558_v58 = vld [vmem:[%s3763_s30 + $0x724] ss:$16 sps:$4 sm:$0xff]  }
  0xc8   : > { %1679 = vmatprep.subr.bf16.mxu0 %v3472_v59  ;;  %1720 = vmatprep.subr.bf16.mxu1 %v3475_v60  ;;  %v3561_v59 = vld [vmem:[%s3763_s30 + $0x72c] ss:$16 sps:$4 sm:$0xff]   ;;  %v3556_v60 = vld [vmem:[%s3763_s30 + $0x720] ss:$16 sps:$4 sm:$0xff]  }
  0xcb   : > { %1680 = vmatpush1.bf16.msra.mxu0 %v3470_v61  ;;  %1721 = vmatpush1.bf16.msra.mxu1 %v3473_v62  ;;  %v3559_v61 = vld [vmem:[%s3763_s30 + $0x728] ss:$16 sps:$4 sm:$0xff]   ;;  %v3564_v62 = vld [vmem:[%s3763_s30 + $0x744] ss:$16 sps:$4 sm:$0xff]  }
  0xcc   : > { %1681 = vmatprep.subr.bf16.mxu0 %v3478_v0  ;;  %1722 = vmatprep.subr.bf16.mxu1 %v3481_v3  ;;  %v3567_v0 = vld [vmem:[%s3763_s30 + $0x74c] ss:$16 sps:$4 sm:$0xff]   ;;  %v3562_v3 = vld [vmem:[%s3763_s30 + $0x740] ss:$16 sps:$4 sm:$0xff]  }
  0xcf   : > { %1682 = vmatpush1.bf16.msra.mxu0 %v3476_v4  ;;  %1723 = vmatpush1.bf16.msra.mxu1 %v3479_v5  ;;  %v3565_v4 = vld [vmem:[%s3763_s30 + $0x748] ss:$16 sps:$4 sm:$0xff]   ;;  %v3570_v5 = vld [vmem:[%s3763_s30 + $0x764] ss:$16 sps:$4 sm:$0xff]  }
  0xd0   : > { %1683 = vmatprep.subr.bf16.mxu0 %v3484_v6  ;;  %1724 = vmatprep.subr.bf16.mxu1 %v3487_v1  ;;  %v3573_v6 = vld [vmem:[%s3763_s30 + $0x76c] ss:$16 sps:$4 sm:$0xff]   ;;  %v3568_v1 = vld [vmem:[%s3763_s30 + $0x760] ss:$16 sps:$4 sm:$0xff]  }
  0xd3   : > { %1684 = vmatpush1.bf16.msra.mxu0 %v3482_v7  ;;  %1725 = vmatpush1.bf16.msra.mxu1 %v3485_v8  ;;  %v3571_v7 = vld [vmem:[%s3763_s30 + $0x768] ss:$16 sps:$4 sm:$0xff]   ;;  %v3576_v8 = vld [vmem:[%s3763_s30 + $0x784] ss:$16 sps:$4 sm:$0xff]  }
  0xd4   : > { %1685 = vmatprep.subr.bf16.mxu0 %v3490_v9  ;;  %1726 = vmatprep.subr.bf16.mxu1 %v3493_v10  ;;  %v3579_v9 = vld [vmem:[%s3763_s30 + $0x78c] ss:$16 sps:$4 sm:$0xff]   ;;  %v3574_v10 = vld [vmem:[%s3763_s30 + $0x780] ss:$16 sps:$4 sm:$0xff]  }
  0xd7   : > { %1686 = vmatpush1.bf16.msra.mxu0 %v3488_v11  ;;  %1727 = vmatpush1.bf16.msra.mxu1 %v3491_v12  ;;  %v3577_v11 = vld [vmem:[%s3763_s30 + $0x788] ss:$16 sps:$4 sm:$0xff]   ;;  %v3582_v12 = vld [vmem:[%s3763_s30 + $0x7a4] ss:$16 sps:$4 sm:$0xff]  }
  0xd8   : > { %1687 = vmatprep.subr.bf16.mxu0 %v3496_v13  ;;  %1728 = vmatprep.subr.bf16.mxu1 %v3499_v14  ;;  %v3585_v13 = vld [vmem:[%s3763_s30 + $0x7ac] ss:$16 sps:$4 sm:$0xff]   ;;  %v3580_v14 = vld [vmem:[%s3763_s30 + $0x7a0] ss:$16 sps:$4 sm:$0xff]  }
  0xdb   : > { %1688 = vmatpush1.bf16.msra.mxu0 %v3494_v19  ;;  %1729 = vmatpush1.bf16.msra.mxu1 %v3497_v20  ;;  %v3591_v19 = vld [vmem:[%s3763_s30 + $0x7cc] ss:$16 sps:$4 sm:$0xff]   ;;  %v1812_v20 = vshrl.u32 %v3983_v17, 16 }
  0xdc   : > { %2149 = vmatprep.subr.bf16.mxu0 %v3504_v22  ;;  %2190 = vmatprep.subr.bf16.mxu1 %v3507_v23  ;;  %v1815_v22 = vshll.u32 %v3983_v17, 16  ;;  %v3586_v23 = vld [vmem:[%s3763_s30 + $0x7c0] ss:$16 sps:$4 sm:$0xff]  }
  0xde   : > { %1690 = vmatmul.mubr.bf16.vlgmr.msra.gmra.mrb[0].mxu0 %v1333_v21  ;;  %1731 = vmatmul.mubr.bf16.vlgmr.msra.gmra.mrb[0].mxu1 %v1333_v21  ;;  %v3597_v21 = vld [vmem:[%s3763_s30 + $0x7ec] ss:$16 sps:$4 sm:$0xff]  }
  0xdf   : > { %2150 = vmatpush1.bf16.msra.mxu0 %v3502_v18  ;;  %2191 = vmatpush1.bf16.msra.mxu1 %v3505_v26  ;;  %v1814_v18 = vrot.slane %v1812_v20, 1  ;;  %v1817_v26 = vrot.slane %v1815_v22, 2 }
  0xe0   : > { %2151 = vmatprep.subr.bf16.mxu0 %v3510_v27  ;;  %2192 = vmatprep.subr.bf16.mxu1 %v3513_v63  ;;  %v3592_v27 = vld [vmem:[%s3763_s30 + $0x7e0] ss:$16 sps:$4 sm:$0xff]   ;;  %v3595_v63 = vld [vmem:[%s3763_s30 + $0x7e8] ss:$16 sps:$4 sm:$0xff]  }
  0xe1   : > { %2181 = vmatprep.mubr.bf16.mxu0 %v1826_v28  ;;  %2222 = vmatprep.mubr.bf16.mxu1 %v1826_v28  ;;  %v1818_v28 = vor.u32 %v1817_v26, %v1814_v18 }
  0xe3   : > { %2152 = vmatpush1.bf16.msra.mxu0 %v3508_v2  ;;  %2193 = vmatpush1.bf16.msra.mxu1 %v3511_v29 }
  0xe4   : > { %2153 = vmatprep.subr.bf16.mxu0 %v3516_v30  ;;  %2194 = vmatprep.subr.bf16.mxu1 %v3519_v31  ;;  %v2235_v30 = vld [vmem:[#allocation2] sm:$0x77] }
  0xe7   : > { %2154 = vmatpush1.bf16.msra.mxu0 %v3514_v32  ;;  %2195 = vmatpush1.bf16.msra.mxu1 %v3517_v33  ;;  %v2236_v32 = vld [vmem:[#allocation2 + $0x8] sm:$0x77] }
  0xe8   : > { %2155 = vmatprep.subr.bf16.mxu0 %v3522_v34  ;;  %2196 = vmatprep.subr.bf16.mxu1 %v3525_v35 }
  0xeb   : > { %2156 = vmatpush1.bf16.msra.mxu0 %v3520_v36  ;;  %2197 = vmatpush1.bf16.msra.mxu1 %v3523_v37 }
  0xec   : > { %2157 = vmatprep.subr.bf16.mxu0 %v3528_v38  ;;  %2198 = vmatprep.subr.bf16.mxu1 %v3531_v39 }
  0xef   : > { %2158 = vmatpush1.bf16.msra.mxu0 %v3526_v40  ;;  %2199 = vmatpush1.bf16.msra.mxu1 %v3529_v41 }
  0xf0   : > { %2159 = vmatprep.subr.bf16.mxu0 %v3534_v42  ;;  %2200 = vmatprep.subr.bf16.mxu1 %v3537_v43  ;;  %v2274_v43 = vlaneseq (!%p3116_p10) }
  0xf2   : > { %vm2365_vm0 = vcmp.lt.s32.totalorder (!%p3116_p10), %v2274_v43, 512 }
  0xf3   : > { %2160 = vmatpush1.bf16.msra.mxu0 %v3532_v44  ;;  %2201 = vmatpush1.bf16.msra.mxu1 %v3535_v45 }
  0xf4   : > { %2161 = vmatprep.subr.bf16.mxu0 %v3540_v46  ;;  %2202 = vmatprep.subr.bf16.mxu1 %v3543_v47  ;;  %v3657_v46 = vmov (!%p3116_p10), 1983009808  }
  0xf5   : > { %v2272_v47 = vunpack.c.l.s4 (!%p3116_p10), %v3657_v46 }
  0xf7   : > { %2162 = vmatpush1.bf16.msra.mxu0 %v3538_v48  ;;  %2203 = vmatpush1.bf16.msra.mxu1 %v3541_v49  ;;  %v2275_v48 = vshrl.u32 (!%p3116_p10), %v2274_v43, 7 }
  0xf8   : > { %2163 = vmatprep.subr.bf16.mxu0 %v3546_v50  ;;  %2204 = vmatprep.subr.bf16.mxu1 %v3549_v51  ;;  %v2273_v51 = vunpack.c.0.s8 (!%p3116_p10), %v2272_v47 }
  0xfb   : > { %2164 = vmatpush1.bf16.msra.mxu0 %v3544_v52  ;;  %2205 = vmatpush1.bf16.msra.mxu1 %v3547_v53 }
  0xfc   : > { %2165 = vmatprep.subr.bf16.mxu0 %v3552_v54  ;;  %2206 = vmatprep.subr.bf16.mxu1 %v3555_v55  ;;  %v2276_v54 = vsub.s32 (!%p3116_p10), %v2273_v51, %v2275_v48 }
  0xff   : > { %2166 = vmatpush1.bf16.msra.mxu0 %v3550_v56  ;;  %2207 = vmatpush1.bf16.msra.mxu1 %v3553_v57 }
 0x100   : > { %2167 = vmatprep.subr.bf16.mxu0 %v3558_v58  ;;  %2208 = vmatprep.subr.bf16.mxu1 %v3561_v59  ;;  %v3658_v59 = vmov (!%p3116_p10), 1966171168  }
 0x103   : > { %2168 = vmatpush1.bf16.msra.mxu0 %v3556_v60  ;;  %2209 = vmatpush1.bf16.msra.mxu1 %v3559_v61  ;;  %v2341_v60 = vunpack.c.l.s4 (!%p3116_p10), %v3658_v59 }
 0x104   : > { %2169 = vmatprep.subr.bf16.mxu0 %v3564_v62  ;;  %2210 = vmatprep.subr.bf16.mxu1 %v3567_v0 }
 0x107   : > { %2170 = vmatpush1.bf16.msra.mxu0 %v3562_v3  ;;  %2211 = vmatpush1.bf16.msra.mxu1 %v3565_v4 }
 0x108   : > { %2171 = vmatprep.subr.bf16.mxu0 %v3570_v5  ;;  %2212 = vmatprep.subr.bf16.mxu1 %v3573_v6  ;;  %v2302_v6 = vld [vmem:[%s3749_s17] sm:$0xff] (!%p3116_p10) }
 0x10b   : > { %2172 = vmatpush1.bf16.msra.mxu0 %v3568_v1  ;;  %2213 = vmatpush1.bf16.msra.mxu1 %v3571_v7  ;;  %v2342_v1 = vunpack.c.0.s8 (!%p3116_p10), %v2341_v60 }
 0x10c   : > { %2173 = vmatprep.subr.bf16.mxu0 %v3576_v8  ;;  %2214 = vmatprep.subr.bf16.mxu1 %v3579_v9 }
 0x10f   : > { %2174 = vmatpush1.bf16.msra.mxu0 %v3574_v10  ;;  %2215 = vmatpush1.bf16.msra.mxu1 %v3577_v11 }
 0x110   : > { %2175 = vmatprep.subr.bf16.mxu0 %v3582_v12  ;;  %2216 = vmatprep.subr.bf16.mxu1 %v3585_v13  ;;  %v4081_v13 = vsub.s32 (!%p3116_p10), %v2342_v1, %v2275_v48 }
 0x113   : > { %2176 = vmatpush1.bf16.msra.mxu0 %v3580_v14  ;;  %2217 = vmatpush1.bf16.msra.mxu1 %v3583_v15 }
 0x114   : > { %2177 = vmatprep.subr.bf16.mxu0 %v3588_v16  ;;  %2218 = vmatprep.subr.bf16.mxu1 %v3591_v19 }
 0x117   : > { %2178 = vmatpush1.bf16.msra.mxu0 %v3586_v23  ;;  %2219 = vmatpush1.bf16.msra.mxu1 %v3589_v24 }
 0x118   : > { %2179 = vmatprep.subr.bf16.mxu0 %v3594_v25  ;;  %2220 = vmatprep.subr.bf16.mxu1 %v3597_v21 }
 0x11b   : > { %2180 = vmatpush1.bf16.msra.mxu0 %v3592_v27  ;;  %2221 = vmatpush1.bf16.msra.mxu1 %v3595_v63 }
 0x11e   : > { %2182 = vmatmul.mubr.bf16.vlgmr.msra.gmra.mrb[0].mxu0 %v1818_v28  ;;  %2223 = vmatmul.mubr.bf16.vlgmr.msra.gmra.mrb[0].mxu1 %v1818_v28 }
 0x1f1   : > { %v2183_v17 = vpop.f32.mrb[0].mxu0  ;;  %v2224_v2 = vpop.f32.mrb[0].mxu1  ;;  %2252 = sbr.rel (%p3116_p10) target bundleno = 543 (0x21f), region = 36 }
 0x1f2   : > { %v2185_v29 = vpop.f32.mrb[1].mxu0  ;;  %v2226_v31 = vpop.f32.mrb[1].mxu1 }
 0x1f3   : > { %v2241_v33 = vcombine.low %v2183_v17, %v2185_v29  ;;  %v2242_v34 = vcombine.low %v2224_v2, %v2226_v31  ;;  %v2187_v35 = vpop.f32.mrb[2].mxu0  ;;  %v2228_v36 = vpop.f32.mrb[2].mxu1 }
 0x1f4   : > { %v2188_v37 = vpop.f32.mrb[3].mxu0  ;;  %v2229_v38 = vpop.f32.mrb[3].mxu1 }
 0x1f5   : > { %v2245_v39 = vadd.f32 %v2241_v33, %v2235_v30  ;;  %v2246_v40 = vadd.f32 %v2242_v34, %v2236_v32 }
 0x1f7   : > { %2247 = vst [vmem:[#allocation2] sm:$0x77] %v2245_v39  ;;  %2248 = vst [vmem:[#allocation2 + $0x8] sm:$0x77] %v2246_v40 }
 0x1fe   : > { %v2253_v41 = vld [vmem:[#allocation2] sm:$0x77]  ;;  %v2254_v42 = vld [vmem:[#allocation2 + $0x8] sm:$0x77] }
 0x1ff   : > { %v2257_v44 = vcombine.high %v2253_v41, %v2253_v41  ;;  %v2258_v45 = vcombine.high %v2254_v42, %v2254_v42  ;;  %v2306_v61 = vsel %vm2305_vm10, %v2253_v41, 0.0  ;;  %v2320_v5 = vsel %vm2305_vm10, %v2254_v42, 0.0 }
 0x200   : > { %v2307_v4 = vrot.slane %v2306_v61, 4  ;;  %v2321_v8 = vrot.slane %v2320_v5, 4  ;;  %v2368_v12 = vmul.f32 %v2253_v41, %v2253_v41  ;;  %v2369_v22 = vmul.f32 %v2254_v42, %v2254_v42 }
 0x201   : > { %v3117_v49 = vpack.c.bf16 %v2257_v44, %v2253_v41  ;;  %v3118_v50 = vpack.c.bf16 %v2258_v45, %v2254_v42  ;;  %v2313_v55 = vsel %vm2305_vm10, %v2257_v44, 0.0  ;;  %v2327_v56 = vsel %vm2305_vm10, %v2258_v45, 0.0 }
 0x202   : > { %v2314_v57 = vrot.slane %v2313_v55, 4  ;;  %v2328_v58 = vrot.slane %v2327_v56, 4  ;;  %v2308_v11 = vadd.f32 %v2307_v4, %v2306_v61  ;;  %v2322_v15 = vadd.f32 %v2321_v8, %v2320_v5 }
 0x203   : > { %v2277_v62 = vrot.slane %v3117_v49, %v2276_v54  ;;  %v2284_v0 = vrot.slane %v3118_v50, %v2276_v54  ;;  %v2372_v23 = vcombine.high %v2368_v12, %v2368_v12  ;;  %v2376_v18 = vsel %vm2305_vm10, %v2368_v12, 0.0 }
 0x204   : > { %v2315_v7 = vadd.f32 %v2314_v57, %v2313_v55  ;;  %v2329_v9 = vadd.f32 %v2328_v58, %v2327_v56  ;;  %v2309_v20 = vrot.slane %v2308_v11, 2  ;;  %v2323_v25 = vrot.slane %v2322_v15, 2 }
 0x205   : > { %v2285_v10 = vcombine.low %v2277_v62, %v2284_v0  ;;  %v2373_v27 = vcombine.high %v2369_v22, %v2369_v22  ;;  %v2377_v63 = vrot.slane %v2376_v18, 4  ;;  %v2383_v28 = vsel %vm2305_vm10, %v2372_v23, 0.0 }
 0x206   : > { %v2316_v14 = vrot.slane %v2315_v7, 2  ;;  %v2330_v16 = vrot.slane %v2329_v9, 2  ;;  %v2310_v26 = vadd.f32 %v2309_v20, %v2308_v11  ;;  %v2324_v2 = vadd.f32 %v2323_v25, %v2322_v15 }
 0x207   : > { %v2303_v19 = vsel %vm2301_vm15, %v2285_v10, %v2302_v6  ;;  %v2384_v30 = vrot.slane %v2383_v28, 4  ;;  %v2378_v32 = vadd.f32 %v2377_v63, %v2376_v18  ;;  %v2390_v33 = vsel %vm2305_vm10, %v2369_v22, 0.0 }
 0x208   : > { %2304 = vst [vmem:[%s3749_s17] sm:$0xff] %v2303_v19  ;;  %v2317_v24 = vadd.f32 %v2316_v14, %v2315_v7  ;;  %v2331_v21 = vadd.f32 %v2330_v16, %v2329_v9  ;;  %v2311_v31 = vrot.slane %v2310_v26, 1  ;;  %v2397_v34 = vsel %vm2305_vm10, %v2373_v27, 0.0 }
 0x209   : > { %v2325_v36 = vrot.slane %v2324_v2, 1  ;;  %v2385_v38 = vadd.f32 %v2384_v30, %v2383_v28  ;;  %v2379_v40 = vrot.slane %v2378_v32, 2  ;;  %v2391_v41 = vrot.slane %v2390_v33, 4 }
 0x20a   : > { %v2318_v17 = vrot.slane %v2317_v24, 1  ;;  %v2332_v29 = vrot.slane %v2331_v21, 1  ;;  %v2312_v39 = vadd.f32 %v2311_v31, %v2310_v26  ;;  %v2398_v42 = vrot.slane %v2397_v34, 4 }
 0x20b   : > { %v2326_v44 = vadd.f32 %v2325_v36, %v2324_v2  ;;  %v2386_v45 = vrot.slane %v2385_v38, 2  ;;  %v2380_v47 = vadd.f32 %v2379_v40, %v2378_v32  ;;  %v2392_v48 = vadd.f32 %v2391_v41, %v2390_v33 }
 0x20c   : > { %v2319_v35 = vadd.f32 %v2318_v17, %v2317_v24  ;;  %v2333_v37 = vadd.f32 %v2332_v29, %v2331_v21  ;;  %v2399_v49 = vadd.f32 %v2398_v42, %v2397_v34 }
 0x20d   : > { %v2387_v51 = vadd.f32 %v2386_v45, %v2385_v38  ;;  %v2381_v53 = vrot.slane %v2380_v47, 1  ;;  %v2393_v54 = vrot.slane %v2392_v48, 2 }
 0x20e   : > { %v2338_v46 = vcombine.low %v2312_v39, %v2319_v35  ;;  %v2339_v50 = vcombine.low %v2326_v44, %v2333_v37  ;;  %v2400_v55 = vrot.slane %v2399_v49, 2 }
 0x20f   : > { %v2388_v57 = vrot.slane %v2387_v51, 1  ;;  %v2382_v58 = vadd.f32 %v2381_v53, %v2380_v47  ;;  %v2394_v59 = vadd.f32 %v2393_v54, %v2392_v48 }
 0x210   : > { %v2346_v52 = vrot.slane %v2338_v46, %v4081_v13  ;;  %v2353_v56 = vrot.slane %v2339_v50, %v4081_v13  ;;  %v2401_v60 = vadd.f32 %v2400_v55, %v2399_v49 }
 0x211   : > { %v2389_v62 = vadd.f32 %v2388_v57, %v2387_v51  ;;  %v2395_v0 = vrot.slane %v2394_v59, 1 }
 0x212   : > { %v2354_v61 = vcombine.low %v2346_v52, %v2353_v56  ;;  %v2402_v3 = vrot.slane %v2401_v60, 1 }
 0x213   : > { %v2408_v5 = vcombine.low %v2382_v58, %v2389_v62  ;;  %v2396_v6 = vadd.f32 %v2395_v0, %v2394_v59 }
 0x214   : > { %v2361_v4 = vrot.slane %v2354_v61, %v4081_v13  ;;  %v2403_v1 = vadd.f32 %v2402_v3, %v2401_v60 }
 0x215   : > { %v2416_v8 = vrot.slane %v2408_v5, %v4081_v13 }
 0x216   : > { %2367 = vst.msk [vmem:[%s280_s12] sm:$0xf] %vm2365_vm0, %v2361_v4  ;;  %v2409_v7 = vcombine.low %v2396_v6, %v2403_v1 }
 0x218   : > { %v2423_v9 = vrot.slane %v2409_v7, %v4081_v13 }
 0x21a   : > { %v2424_v10 = vcombine.low %v2416_v8, %v2423_v9 }
 0x21c   : > { %v2431_v43 = vrot.slane %v2424_v10, %v4081_v13 }
 0x21e   : > { %2433 = vst.msk [vmem:[%s288_s28] sm:$0xf] %vm2365_vm0, %v2431_v43 }
 0x21f PF: > { %s15_s21 = sadd.s32 1, %s3654_s21   ;;  %s4137_s15 = smov %s3642_s18 }
 0x220   : > { %p12_p11 = scmp.ge.s32.totalorder %s15_s21, 26   ;;  %s4138_s16 = smov %s3646_s19 }
 0x221   : > { %s4139_s17 = smov %s3650_s20  ;;  %s4140_s18 = smov %s4144_s22 }
 0x222   : > { %s4141_s19 = smov %s4148_s23  ;;  %s4142_s20 = smov %s4152_s24 }
 0x223   :  { %14 = sbr.rel (!%p12_p11) target bundleno = 4 (0x4), region = 94 }

// kernel: patch_discriminator.15
= control target key start
LH: loop header
LB: loop body
LE: loop exit
PB: predicated region body
PF: predicated region fallthrough
CT: control target
= control target key end

     0   :  { %s2661_s12 = smov 0   ;;  %s2663_s13 = smov 0   ;;  %s2913_s0 = inlined_call_operand.vmem [shape: bf16[2,5,5,512], index: 0, kind: input, shape index: {}]   ;;  %s2914_s1 = inlined_call_operand.vmem [shape: bf16[16,512,128], index: 1, kind: input, shape index: {}]   ;;  %s2915_s2 = inlined_call_operand.vmem [shape: f32[1,128], index: 2, kind: input, shape index: {}]   ;;  %s2916_s3 = inlined_call_operand.vmem [shape: bf16[2,2,2,128], index: 3, kind: output, shape index: {}]  }
   0x1   :  { %s2665_s14 = smov 0   ;;  %s2667_s15 = smov 0  }
   0x2   :  { %s2669_s16 = smov 0   ;;  %s2671_s17 = smov 0  }
   0x3   :  { %s2673_s18 = smov 0  }
   0x4 LB: > { %s25_s19 = sadd.s32 1, %s2626_s15  ;;  %s28_s20 = sadd.s32 1, %s2630_s16  ;;  %s2638_s18 = sphi %s2673_s18, %s13_s18   ;;  %s2634_s17 = sphi %s2671_s17, %s2922_s17   ;;  %s2630_s16 = sphi %s2669_s16, %s2921_s16   ;;  %s2626_s15 = sphi %s2667_s15, %s2920_s15   ;;  %s2622_s14 = sphi %s2665_s14, %s2919_s14   ;;  %s2618_s13 = sphi %s2663_s13, %s2918_s13   ;;  %s2614_s12 = sphi %s2661_s12, %s2917_s12  }
   0x5   : > { %p26_p0 = scmp.ge.s32.totalorder %s25_s19, 4  ;;  %p1843_p1 = scmp.ge.s32.totalorder %s2638_s18, 1 }
   0x6   : > { %p168_p2 = scmp.lt.s32.totalorder %s2638_s18, 17  ;;  %s32_s21 = sadd.s32 1, %s2634_s17 }
   0x7   : > { %s2924_s19 = smov (%p26_p0, %s25_s19), 0  ;;  %s2926_s20 = smov (!%p26_p0, %s28_s20), %s2630_s16 }
   0x8   : > { %p169_p3 = pnand %p1843_p1, %p168_p2  ;;  %p30_p4 = scmp.ge.s32.totalorder %s2926_s20, 2 }
   0x9   : > { %s199_s22 = sadd.s32 (!%p169_p3), %s2614_s12, %s2618_s13  ;;  %p200_p6 = scmp.lt.s32.totalorder (!%p169_p3), %s2622_s14, 1 }
   0xa   : > { %s2928_s20 = smov (%p30_p4, %s2926_s20), 0  ;;  %s2930_s21 = smov (!%p30_p4, %s32_s21), %s2634_s17 }
   0xb   : > { %p34_p5 = scmp.ge.s32.totalorder %s2930_s21, 2  ;;  %172 = sbr.rel (%p169_p3) target bundleno = 425 (0x1a9), region = 32 }
   0xc   : > { %p202_p7 = scmp.lt.s32.totalorder (!%p169_p3), %s199_s22, 4  ;;  %p212_p8 = scmp.lt.s32.totalorder (!%p169_p3), %s2618_s13, 1 }
   0xd   : > { %s2932_s21 = smov (%p34_p5, %s2930_s21), 0  ;;  %p1847_p9 = scmp.ne.s32.totalorder (!%p169_p3), %s2614_s12, 0 }
  0x12   : > { %s2934_s14 = smov (!%p200_p6, %s2622_s14), 1  ;;  %s2936_s22 = smov (!%p202_p7, %s199_s22), 4 }
  0x13   : > { %s2378_s23 = smul.u32 20, %s2934_s14  ;;  %s1844_s24 = sshll.u32 %s2936_s22, 2  ;;  %v2640_v0 = vmov (!%p1847_p9), 0.0  }
  0x14   : > { %s1846_s30 = sshll.u32 %s2934_s14, 1  ;;  %s2938_s13 = smov (!%p212_p8, %s2618_s13), 1  ;;  %222 = vst [vmem:[#allocation2] sm:$0x3] (!%p1847_p9), %v2640_v0 }
  0x15   : > { %s206_s25 = sadd.s32 %s2378_s23, %s1844_s24  ;;  %s2716_s4 = sadd.s32 %s1846_s30, %s2938_s13 }
  0x16   : > { %s1845_s26 = sshll.u32 %s206_s25, 2  ;;  %s216_s7 = scalar_lea.vmem %s2916_s3, %s2716_s4 }
  0x17   : > { %s2713_s29 = scalar_lea.vmem %s2913_s0, %s1845_s26  ;;  %221 = sbr.rel (%p1847_p9) target bundleno = 30 (0x1e), region = 36 }
  0x1e PF: > { %s2198_s8 = sshll.u32 %s2614_s12, 10  ;;  %v293_v1 = vld [vmem:[%s2713_s29] sm:$0x33]  ;;  %v294_v2 = vld [vmem:[%s2713_s29 + $0x8] sm:$0x33]  ;;  %p2193_p10 = scmp.ne.s32.totalorder %s2614_s12, 3 }
  0x1f   : > { %s2729_s11 = scalar_lea.vmem %s2914_s1, %s2198_s8  ;;  %v1918_v3 = vcombine.high %v293_v1, %v293_v1  ;;  %v1920_v7 = vcombine.high %v294_v2, %v294_v2  ;;  %v1917_v33 = vcombine.low %v293_v1, %v293_v1  ;;  %v1919_v35 = vcombine.low %v294_v2, %v294_v2  ;;  %v2761_v50 = vld [vmem:[%s2713_s29] sm:$0x11]  ;;  %v2765_v52 = vld [vmem:[%s2713_s29 + $0x8] sm:$0x11] }
  0x20   : > { %v2436_v4 = vld [vmem:[%s2729_s11 + $0x140] sm:$0xff]   ;;  %v2440_v12 = vld [vmem:[%s2729_s11 + $0x148] sm:$0xff]   ;;  %v2444_v20 = vld [vmem:[%s2729_s11 + $0x150] sm:$0xff]   ;;  %v1954_v59 = vcombine.high %v2761_v50, %v2761_v50  ;;  %v1956_v61 = vcombine.high %v2765_v52, %v2765_v52 }
  0x21   : > { %v2437_v5 = vld [vmem:[%s2729_s11 + $0x1c0] sm:$0xff]   ;;  %v381_v6 = vshrl.u32 %v1918_v3, 16  ;;  %2202 = vmatprep.subr.bf16.mxu0 %v2436_v4  ;;  %v383_v9 = vshll.u32 %v1918_v3, 16  ;;  %v395_v11 = vshrl.u32 %v1920_v7, 16  ;;  %v2441_v14 = vld [vmem:[%s2729_s11 + $0x1c8] sm:$0xff]   ;;  %v397_v15 = vshll.u32 %v1920_v7, 16 }
  0x22   : > { %v2438_v8 = vld [vmem:[%s2729_s11 + $0x100] sm:$0xff]   ;;  %2224 = vmatprep.subr.bf16.mxu1 %v2437_v5  ;;  %v2442_v16 = vld [vmem:[%s2729_s11 + $0x108] sm:$0xff]   ;;  %v2445_v21 = vld [vmem:[%s2729_s11 + $0x1d0] sm:$0xff]   ;;  %v376_v39 = vshll.u32 %v1917_v33, 16  ;;  %v390_v41 = vshll.u32 %v1919_v35, 16  ;;  %v374_v43 = vshrl.u32 %v1917_v33, 16 }
  0x23   : > { %v2439_v10 = vld [vmem:[%s2729_s11 + $0x180] sm:$0xff]   ;;  %2203 = vmatpush3.bf16.msra.mxu0 %v2438_v8  ;;  %v385_v13 = vrot.slane %v383_v9, 1  ;;  %v2443_v18 = vld [vmem:[%s2729_s11 + $0x188] sm:$0xff]   ;;  %v399_v19 = vrot.slane %v397_v15, 1  ;;  %v2446_v23 = vld [vmem:[%s2729_s11 + $0x110] sm:$0xff]   ;;  %v388_v45 = vshrl.u32 %v1919_v35, 16 }
  0x24   : > { %2225 = vmatpush3.bf16.msra.mxu1 %v2439_v10  ;;  %2204 = vmatprep.subr.bf16.mxu0 %v2440_v12  ;;  %v2447_v24 = vld [vmem:[%s2729_s11 + $0x190] sm:$0xff]   ;;  %v2448_v25 = vld [vmem:[%s2729_s11 + $0x158] sm:$0xff]   ;;  %v2452_v29 = vld [vmem:[%s2729_s11 + $0x160] sm:$0xff]   ;;  %v378_v47 = vrot.slane %v376_v39, 1  ;;  %v392_v49 = vrot.slane %v390_v41, 1 }
  0x25   : > { %v386_v17 = vor.u32 %v385_v13, %v381_v6  ;;  %2226 = vmatprep.subr.bf16.mxu1 %v2441_v14  ;;  %v400_v22 = vor.u32 %v399_v19, %v395_v11  ;;  %v2449_v26 = vld [vmem:[%s2729_s11 + $0x1d8] sm:$0xff]   ;;  %v2453_v30 = vld [vmem:[%s2729_s11 + $0x1e0] sm:$0xff]   ;;  %v2456_v34 = vld [vmem:[%s2729_s11 + $0x168] sm:$0xff]  }
  0x26   : > { %v2450_v27 = vld [vmem:[%s2729_s11 + $0x118] sm:$0xff]   ;;  %v2454_v31 = vld [vmem:[%s2729_s11 + $0x120] sm:$0xff]   ;;  %v2457_v36 = vld [vmem:[%s2729_s11 + $0x1e8] sm:$0xff]   ;;  %v379_v55 = vor.u32 %v378_v47, %v374_v43  ;;  %v393_v56 = vor.u32 %v392_v49, %v388_v45 }
  0x27   : > { %2205 = vmatpush3.bf16.msra.mxu0 %v2442_v16  ;;  %629 = vmatprep.mubr.bf16.mxu0 %v386_v17  ;;  %v2451_v28 = vld [vmem:[%s2729_s11 + $0x198] sm:$0xff]   ;;  %v2455_v32 = vld [vmem:[%s2729_s11 + $0x1a0] sm:$0xff]   ;;  %v2458_v37 = vld [vmem:[%s2729_s11 + $0x128] sm:$0xff]  }
  0x28   : > { %2227 = vmatpush3.bf16.msra.mxu1 %v2443_v18  ;;  %2206 = vmatprep.subr.bf16.mxu0 %v2444_v20  ;;  %v2459_v38 = vld [vmem:[%s2729_s11 + $0x1a8] sm:$0xff]   ;;  %v2460_v40 = vld [vmem:[%s2729_s11 + $0x170] sm:$0xff]   ;;  %v2464_v48 = vld [vmem:[%s2729_s11 + $0x178] sm:$0xff]  }
  0x29   : > { %2228 = vmatprep.subr.bf16.mxu1 %v2445_v21  ;;  %669 = vmatprep.mubr.bf16.mxu1 %v400_v22  ;;  %v2461_v42 = vld [vmem:[%s2729_s11 + $0x1f0] sm:$0xff]   ;;  %v2465_v51 = vld [vmem:[%s2729_s11 + $0x1f8] sm:$0xff]   ;;  %v2472_v57 = vld [vmem:[%s2729_s11 + $0x40] sm:$0xff]  }
  0x2a   : > { %v2462_v44 = vld [vmem:[%s2729_s11 + $0x130] sm:$0xff]   ;;  %v2466_v53 = vld [vmem:[%s2729_s11 + $0x138] sm:$0xff]   ;;  %v2473_v58 = vld [vmem:[%s2729_s11 + $0xc0] sm:$0xff]  }
  0x2b   : > { %2207 = vmatpush3.bf16.msra.mxu0 %v2446_v23  ;;  %v2463_v46 = vld [vmem:[%s2729_s11 + $0x1b0] sm:$0xff]   ;;  %v2467_v54 = vld [vmem:[%s2729_s11 + $0x1b8] sm:$0xff]   ;;  %v2474_v60 = vld [vmem:[%s2729_s11] sm:$0xff]  }
  0x2c   : > { %2229 = vmatpush3.bf16.msra.mxu1 %v2447_v24  ;;  %2208 = vmatprep.subr.bf16.mxu0 %v2448_v25  ;;  %v2475_v62 = vld [vmem:[%s2729_s11 + $0x80] sm:$0xff]   ;;  %v2476_v63 = vld [vmem:[%s2729_s11 + $0x48] sm:$0xff]   ;;  %v2480_v3 = vld [vmem:[%s2729_s11 + $0x50] sm:$0xff]  }
  0x2d   : > { %2230 = vmatprep.subr.bf16.mxu1 %v2449_v26  ;;  %v2477_v0 = vld [vmem:[%s2729_s11 + $0xc8] sm:$0xff]   ;;  %v2481_v4 = vld [vmem:[%s2729_s11 + $0xd0] sm:$0xff]   ;;  %v2484_v7 = vld [vmem:[%s2729_s11 + $0x58] sm:$0xff]  }
  0x2e   : > { %v2478_v1 = vld [vmem:[%s2729_s11 + $0x8] sm:$0xff]   ;;  %v2482_v5 = vld [vmem:[%s2729_s11 + $0x10] sm:$0xff]   ;;  %v2485_v8 = vld [vmem:[%s2729_s11 + $0xd8] sm:$0xff]  }
  0x2f   : > { %2209 = vmatpush3.bf16.msra.mxu0 %v2450_v27  ;;  %v2479_v2 = vld [vmem:[%s2729_s11 + $0x88] sm:$0xff]   ;;  %v2483_v6 = vld [vmem:[%s2729_s11 + $0x90] sm:$0xff]   ;;  %v2486_v9 = vld [vmem:[%s2729_s11 + $0x18] sm:$0xff]  }
  0x30   : > { %2231 = vmatpush3.bf16.msra.mxu1 %v2451_v28  ;;  %2210 = vmatprep.subr.bf16.mxu0 %v2452_v29  ;;  %v2487_v10 = vld [vmem:[%s2729_s11 + $0x98] sm:$0xff]   ;;  %v2488_v11 = vld [vmem:[%s2729_s11 + $0x60] sm:$0xff]   ;;  %v2492_v15 = vld [vmem:[%s2729_s11 + $0x68] sm:$0xff]   ;;  %v1953_v29 = vcombine.low %v2761_v50, %v2761_v50 }
  0x31   : > { %2232 = vmatprep.subr.bf16.mxu1 %v2453_v30  ;;  %v2489_v12 = vld [vmem:[%s2729_s11 + $0xe0] sm:$0xff]   ;;  %v2493_v16 = vld [vmem:[%s2729_s11 + $0xe8] sm:$0xff]   ;;  %v2496_v19 = vld [vmem:[%s2729_s11 + $0x70] sm:$0xff]   ;;  %v1955_v30 = vcombine.low %v2765_v52, %v2765_v52 }
  0x32   : > { %v2490_v13 = vld [vmem:[%s2729_s11 + $0x20] sm:$0xff]   ;;  %v2494_v17 = vld [vmem:[%s2729_s11 + $0x28] sm:$0xff]   ;;  %v2497_v21 = vld [vmem:[%s2729_s11 + $0xf0] sm:$0xff]  }
  0x33   : > { %2211 = vmatpush3.bf16.msra.mxu0 %v2454_v31  ;;  %v2491_v14 = vld [vmem:[%s2729_s11 + $0xa0] sm:$0xff]   ;;  %v2495_v18 = vld [vmem:[%s2729_s11 + $0xa8] sm:$0xff]   ;;  %v2498_v22 = vld [vmem:[%s2729_s11 + $0x30] sm:$0xff]  }
  0x34   : > { %2233 = vmatpush3.bf16.msra.mxu1 %v2455_v32  ;;  %2212 = vmatprep.subr.bf16.mxu0 %v2456_v34  ;;  %v2799_v20 = vld [vmem:[%s2713_s29] sm:$0x22]  ;;  %v2499_v23 = vld [vmem:[%s2729_s11 + $0xb0] sm:$0xff]   ;;  %v2500_v24 = vld [vmem:[%s2729_s11 + $0x78] sm:$0xff]  }
  0x35   : > { %2234 = vmatprep.subr.bf16.mxu1 %v2457_v36  ;;  %v2501_v25 = vld [vmem:[%s2729_s11 + $0xf8] sm:$0xff]   ;;  %v2056_v26 = vcombine.high %v2799_v20, %v2799_v20  ;;  %v2508_v31 = vld [vmem:[%s2729_s11 + $0x240] sm:$0xff]   ;;  %v2512_v36 = vld [vmem:[%s2729_s11 + $0x248] sm:$0xff]  }
  0x36   : > { %v2502_v27 = vld [vmem:[%s2729_s11 + $0x38] sm:$0xff]   ;;  %v2509_v32 = vld [vmem:[%s2729_s11 + $0x2c0] sm:$0xff]   ;;  %v2515_v39 = vld [vmem:[%s2729_s11 + $0x288] sm:$0xff]  }
  0x37   : > { %2213 = vmatpush3.bf16.msra.mxu0 %v2458_v37  ;;  %v2503_v28 = vld [vmem:[%s2729_s11 + $0xb8] sm:$0xff]   ;;  %v1044_v33 = vrot.slane %v2056_v26, 1  ;;  %v2510_v34 = vld [vmem:[%s2729_s11 + $0x200] sm:$0xff]   ;;  %v2513_v37 = vld [vmem:[%s2729_s11 + $0x2c8] sm:$0xff]  }
  0x38   : > { %2235 = vmatpush3.bf16.msra.mxu1 %v2459_v38  ;;  %2214 = vmatprep.subr.bf16.mxu0 %v2460_v40  ;;  %v2511_v35 = vld [vmem:[%s2729_s11 + $0x280] sm:$0xff]   ;;  %v2514_v38 = vld [vmem:[%s2729_s11 + $0x208] sm:$0xff]   ;;  %v2516_v40 = vld [vmem:[%s2729_s11 + $0x250] sm:$0xff]  }
  0x39   : > { %2236 = vmatprep.subr.bf16.mxu1 %v2461_v42  ;;  %v2517_v41 = vld [vmem:[%s2729_s11 + $0x2d0] sm:$0xff]   ;;  %v2521_v45 = vld [vmem:[%s2729_s11 + $0x2d8] sm:$0xff]   ;;  %v2525_v49 = vld [vmem:[%s2729_s11 + $0x2e0] sm:$0xff]  }
  0x3a   : > { %v2518_v42 = vld [vmem:[%s2729_s11 + $0x210] sm:$0xff]   ;;  %v2523_v47 = vld [vmem:[%s2729_s11 + $0x298] sm:$0xff]   ;;  %v2526_v50 = vld [vmem:[%s2729_s11 + $0x220] sm:$0xff]  }
  0x3b   : > { %2215 = vmatpush3.bf16.msra.mxu0 %v2462_v44  ;;  %v2519_v43 = vld [vmem:[%s2729_s11 + $0x290] sm:$0xff]   ;;  %v2520_v44 = vld [vmem:[%s2729_s11 + $0x258] sm:$0xff]   ;;  %v2528_v52 = vld [vmem:[%s2729_s11 + $0x268] sm:$0xff]  }
  0x3c   : > { %2237 = vmatpush3.bf16.msra.mxu1 %v2463_v46  ;;  %2216 = vmatprep.subr.bf16.mxu0 %v2464_v48  ;;  %v2522_v46 = vld [vmem:[%s2729_s11 + $0x218] sm:$0xff]   ;;  %v2524_v48 = vld [vmem:[%s2729_s11 + $0x260] sm:$0xff]  }
  0x3d   : > { %2238 = vmatprep.subr.bf16.mxu1 %v2465_v51  ;;  %v2527_v51 = vld [vmem:[%s2729_s11 + $0x2a0] sm:$0xff]  }
  0x3e   : > { %v2563_v26 = vld [vmem:[%s2729_s11 + $0x3a0] sm:$0xff]  }
  0x3f   : > { %2217 = vmatpush3.bf16.msra.mxu0 %v2466_v53  ;;  %v2529_v53 = vld [vmem:[%s2729_s11 + $0x2e8] sm:$0xff]  }
  0x40   : > { %2239 = vmatpush3.bf16.msra.mxu1 %v2467_v54  ;;  %2246 = vmatprep.subr.bf16.mxu0 %v2472_v57  ;;  %v2530_v54 = vld [vmem:[%s2729_s11 + $0x228] sm:$0xff]   ;;  %v2533_v57 = vld [vmem:[%s2729_s11 + $0x2f0] sm:$0xff]  }
  0x41   : > { %2268 = vmatprep.subr.bf16.mxu1 %v2473_v58  ;;  %v2534_v58 = vld [vmem:[%s2729_s11 + $0x230] sm:$0xff]  }
  0x42   : > { %630 = vmatmul.mubr.bf16.vlgmr.msra.gmra.mrb[0].mxu0 %v379_v55  ;;  %v2531_v55 = vld [vmem:[%s2729_s11 + $0x2a8] sm:$0xff]  }
  0x43   : > { %670 = vmatmul.mubr.bf16.vlgmr.msra.gmra.mrb[0].mxu1 %v393_v56  ;;  %2247 = vmatpush3.bf16.msra.mxu0 %v2474_v60  ;;  %v2532_v56 = vld [vmem:[%s2729_s11 + $0x270] sm:$0xff]   ;;  %v2055_v60 = vcombine.low %v2799_v20, %v2799_v20  ;;  %v2557_v20 = vld [vmem:[%s2729_s11 + $0x3d8] sm:$0xff]  }
  0x44   : > { %2269 = vmatpush3.bf16.msra.mxu1 %v2475_v62  ;;  %915 = vmatprep.mubr.bf16.mxu0 %v1954_v59  ;;  %v2535_v59 = vld [vmem:[%s2729_s11 + $0x2b0] sm:$0xff]   ;;  %v2537_v62 = vld [vmem:[%s2729_s11 + $0x2f8] sm:$0xff]  }
  0x45   : > { %2248 = vmatprep.subr.bf16.mxu0 %v2476_v63  ;;  %955 = vmatprep.mubr.bf16.mxu1 %v1956_v61  ;;  %v2536_v61 = vld [vmem:[%s2729_s11 + $0x278] sm:$0xff]  }
  0x46   : > { %2270 = vmatprep.subr.bf16.mxu1 %v2477_v0  ;;  %v2538_v63 = vld [vmem:[%s2729_s11 + $0x238] sm:$0xff]  }
  0x47   : > { %2249 = vmatpush3.bf16.msra.mxu0 %v2478_v1  ;;  %v2539_v0 = vld [vmem:[%s2729_s11 + $0x2b8] sm:$0xff]   ;;  %v1043_v1 = vrot.slane %v2055_v60, 1 }
  0x48   : > { %2271 = vmatpush3.bf16.msra.mxu1 %v2479_v2  ;;  %2250 = vmatprep.subr.bf16.mxu0 %v2480_v3  ;;  %v964_v2 = vld [vmem:[%s2713_s29 + $0x8] sm:$0x22] }
  0x49   : > { %2272 = vmatprep.subr.bf16.mxu1 %v2481_v4  ;;  %v2057_v3 = vcombine.low %v964_v2, %v964_v2  ;;  %v2058_v4 = vcombine.high %v964_v2, %v964_v2 }
  0x4b   : > { %2251 = vmatpush3.bf16.msra.mxu0 %v2482_v5  ;;  %v2544_v5 = vld [vmem:[%s2729_s11 + $0x340] sm:$0xff]  }
  0x4c   : > { %2273 = vmatpush3.bf16.msra.mxu1 %v2483_v6  ;;  %2252 = vmatprep.subr.bf16.mxu0 %v2484_v7  ;;  %v2545_v6 = vld [vmem:[%s2729_s11 + $0x3c0] sm:$0xff]   ;;  %v1045_v7 = vrot.slane %v2057_v3, 1 }
  0x4d   : > { %2274 = vmatprep.subr.bf16.mxu1 %v2485_v8  ;;  %v1046_v8 = vrot.slane %v2058_v4, 1 }
  0x4f   : > { %2253 = vmatpush3.bf16.msra.mxu0 %v2486_v9  ;;  %v2546_v9 = vld [vmem:[%s2729_s11 + $0x300] sm:$0xff]  }
  0x50   : > { %2275 = vmatpush3.bf16.msra.mxu1 %v2487_v10  ;;  %2254 = vmatprep.subr.bf16.mxu0 %v2488_v11  ;;  %v2547_v10 = vld [vmem:[%s2729_s11 + $0x380] sm:$0xff]   ;;  %v2548_v11 = vld [vmem:[%s2729_s11 + $0x348] sm:$0xff]  }
  0x51   : > { %2276 = vmatprep.subr.bf16.mxu1 %v2489_v12  ;;  %v2549_v12 = vld [vmem:[%s2729_s11 + $0x3c8] sm:$0xff]  }
  0x53   : > { %2255 = vmatpush3.bf16.msra.mxu0 %v2490_v13  ;;  %v2550_v13 = vld [vmem:[%s2729_s11 + $0x308] sm:$0xff]  }
  0x54   : > { %2277 = vmatpush3.bf16.msra.mxu1 %v2491_v14  ;;  %2256 = vmatprep.subr.bf16.mxu0 %v2492_v15  ;;  %v2551_v14 = vld [vmem:[%s2729_s11 + $0x388] sm:$0xff]   ;;  %v2552_v15 = vld [vmem:[%s2729_s11 + $0x350] sm:$0xff]  }
  0x55   : > { %2278 = vmatprep.subr.bf16.mxu1 %v2493_v16  ;;  %v2553_v16 = vld [vmem:[%s2729_s11 + $0x3d0] sm:$0xff]  }
  0x57   : > { %2257 = vmatpush3.bf16.msra.mxu0 %v2494_v17  ;;  %v2554_v17 = vld [vmem:[%s2729_s11 + $0x310] sm:$0xff]  }
  0x58   : > { %2279 = vmatpush3.bf16.msra.mxu1 %v2495_v18  ;;  %2258 = vmatprep.subr.bf16.mxu0 %v2496_v19  ;;  %v2555_v18 = vld [vmem:[%s2729_s11 + $0x390] sm:$0xff]   ;;  %v2556_v19 = vld [vmem:[%s2729_s11 + $0x358] sm:$0xff]  }
  0x59   : > { %2280 = vmatprep.subr.bf16.mxu1 %v2497_v21  ;;  %v2558_v21 = vld [vmem:[%s2729_s11 + $0x318] sm:$0xff]  }
  0x5b   : > { %2259 = vmatpush3.bf16.msra.mxu0 %v2498_v22  ;;  %v2559_v22 = vld [vmem:[%s2729_s11 + $0x398] sm:$0xff]  }
  0x5c   : > { %2281 = vmatpush3.bf16.msra.mxu1 %v2499_v23  ;;  %2260 = vmatprep.subr.bf16.mxu0 %v2500_v24  ;;  %v2560_v23 = vld [vmem:[%s2729_s11 + $0x360] sm:$0xff]  }
  0x5d   : > { %2282 = vmatprep.subr.bf16.mxu1 %v2501_v25  ;;  %v2561_v24 = vld [vmem:[%s2729_s11 + $0x3e0] sm:$0xff]  }
  0x5e   : > { %v2562_v25 = vld [vmem:[%s2729_s11 + $0x320] sm:$0xff]  }
  0x5f   : > { %2261 = vmatpush3.bf16.msra.mxu0 %v2502_v27  ;;  %v2564_v27 = vld [vmem:[%s2729_s11 + $0x368] sm:$0xff]  }
  0x60   : > { %2283 = vmatpush3.bf16.msra.mxu1 %v2503_v28  ;;  %2290 = vmatprep.subr.bf16.mxu0 %v2508_v31  ;;  %v2565_v28 = vld [vmem:[%s2729_s11 + $0x3e8] sm:$0xff]   ;;  %v2568_v31 = vld [vmem:[%s2729_s11 + $0x370] sm:$0xff]  }
  0x61   : > { %2312 = vmatprep.subr.bf16.mxu1 %v2509_v32  ;;  %v2569_v32 = vld [vmem:[%s2729_s11 + $0x3f0] sm:$0xff]  }
  0x62   : > { %916 = vmatmul.mubr.bf16.vlgmr.msra.gmra.mrb[4].mxu0 %v1953_v29  ;;  %v2566_v29 = vld [vmem:[%s2729_s11 + $0x328] sm:$0xff]  }
  0x63   : > { %956 = vmatmul.mubr.bf16.vlgmr.msra.gmra.mrb[4].mxu1 %v1955_v30  ;;  %2291 = vmatpush3.bf16.msra.mxu0 %v2510_v34  ;;  %v2567_v30 = vld [vmem:[%s2729_s11 + $0x3a8] sm:$0xff]   ;;  %v2571_v34 = vld [vmem:[%s2729_s11 + $0x3b0] sm:$0xff]  }
  0x64   : > { %2313 = vmatpush3.bf16.msra.mxu1 %v2511_v35  ;;  %1275 = vmatprep.mubr.bf16.mxu0 %v1044_v33  ;;  %v2570_v33 = vld [vmem:[%s2729_s11 + $0x330] sm:$0xff]   ;;  %v2572_v35 = vld [vmem:[%s2729_s11 + $0x378] sm:$0xff]  }
  0x65   : > { %2292 = vmatprep.subr.bf16.mxu0 %v2512_v36  ;;  %2314 = vmatprep.subr.bf16.mxu1 %v2513_v37  ;;  %v2573_v36 = vld [vmem:[%s2729_s11 + $0x3f8] sm:$0xff]  }
  0x66   : > { %1315 = vmatprep.mubr.bf16.mxu1 %v1046_v8  ;;  %v2574_v37 = vld [vmem:[%s2729_s11 + $0x338] sm:$0xff]  }
  0x67   : > { %2293 = vmatpush3.bf16.msra.mxu0 %v2514_v38  ;;  %v2575_v38 = vld [vmem:[%s2729_s11 + $0x3b8] sm:$0xff]  }
  0x68   : > { %2315 = vmatpush3.bf16.msra.mxu1 %v2515_v39  ;;  %2294 = vmatprep.subr.bf16.mxu0 %v2516_v40  ;;  %v1324_v39 = vld [vmem:[%s2713_s29] sm:$0x66]  ;;  %v1325_v40 = vld [vmem:[%s2713_s29 + $0x8] sm:$0x66] }
  0x69   : > { %2316 = vmatprep.subr.bf16.mxu1 %v2517_v41  ;;  %v2157_v41 = vcombine.low %v1324_v39, %v1324_v39 }
  0x6b   : > { %2295 = vmatpush3.bf16.msra.mxu0 %v2518_v42  ;;  %v2158_v42 = vcombine.high %v1324_v39, %v1324_v39 }
  0x6c   : > { %2317 = vmatpush3.bf16.msra.mxu1 %v2519_v43  ;;  %2296 = vmatprep.subr.bf16.mxu0 %v2520_v44  ;;  %v2159_v43 = vcombine.low %v1325_v40, %v1325_v40  ;;  %v2160_v44 = vcombine.high %v1325_v40, %v1325_v40 }
  0x6d   : > { %2318 = vmatprep.subr.bf16.mxu1 %v2521_v45  ;;  %v1413_v45 = vshrl.u32 %v2158_v42, 16 }
  0x6f   : > { %2297 = vmatpush3.bf16.msra.mxu0 %v2522_v46  ;;  %v1416_v46 = vshll.u32 %v2158_v42, 16 }
  0x70   : > { %2319 = vmatpush3.bf16.msra.mxu1 %v2523_v47  ;;  %2298 = vmatprep.subr.bf16.mxu0 %v2524_v48  ;;  %v1429_v47 = vshrl.u32 %v2160_v44, 16  ;;  %v1432_v48 = vshll.u32 %v2160_v44, 16 }
  0x71   : > { %2320 = vmatprep.subr.bf16.mxu1 %v2525_v49  ;;  %v1405_v49 = vshrl.u32 %v2157_v41, 16 }
  0x73   : > { %2299 = vmatpush3.bf16.msra.mxu0 %v2526_v50  ;;  %v1408_v50 = vshll.u32 %v2157_v41, 16 }
  0x74   : > { %2321 = vmatpush3.bf16.msra.mxu1 %v2527_v51  ;;  %2300 = vmatprep.subr.bf16.mxu0 %v2528_v52  ;;  %v1421_v51 = vshrl.u32 %v2159_v43, 16  ;;  %v1424_v52 = vshll.u32 %v2159_v43, 16 }
  0x75   : > { %2322 = vmatprep.subr.bf16.mxu1 %v2529_v53  ;;  %v1415_v53 = vrot.slane %v1413_v45, 1 }
  0x76   : > { %v1426_v60 = vrot.slane %v1424_v52, 2 }
  0x77   : > { %2301 = vmatpush3.bf16.msra.mxu0 %v2530_v54  ;;  %v1418_v54 = vrot.slane %v1416_v46, 2 }
  0x78   : > { %2323 = vmatpush3.bf16.msra.mxu1 %v2531_v55  ;;  %2302 = vmatprep.subr.bf16.mxu0 %v2532_v56  ;;  %v1431_v55 = vrot.slane %v1429_v47, 1  ;;  %v1434_v56 = vrot.slane %v1432_v48, 2  ;;  %v1713_v47 = vld [vmem:[#allocation2] sm:$0x3] }
  0x79   : > { %2324 = vmatprep.subr.bf16.mxu1 %v2533_v57  ;;  %v1407_v57 = vrot.slane %v1405_v49, 1 }
  0x7b   : > { %2303 = vmatpush3.bf16.msra.mxu0 %v2534_v58  ;;  %v1410_v58 = vrot.slane %v1408_v50, 2 }
  0x7c   : > { %2325 = vmatpush3.bf16.msra.mxu1 %v2535_v59  ;;  %2304 = vmatprep.subr.bf16.mxu0 %v2536_v61  ;;  %v1423_v59 = vrot.slane %v1421_v51, 1  ;;  %v1419_v61 = vor.u32 %v1418_v54, %v1415_v53  ;;  %v2194_v51 = vld [vmem:[%s2915_s2] ss:$0 sm:$0xff] (!%p2193_p10) }
  0x7d   : > { %2326 = vmatprep.subr.bf16.mxu1 %v2537_v62  ;;  %v1435_v62 = vor.u32 %v1434_v56, %v1431_v55 }
  0x7f   : > { %2305 = vmatpush3.bf16.msra.mxu0 %v2538_v63  ;;  %v1411_v63 = vor.u32 %v1410_v58, %v1407_v57 }
  0x80   : > { %2327 = vmatpush3.bf16.msra.mxu1 %v2539_v0  ;;  %2334 = vmatprep.subr.bf16.mxu0 %v2544_v5  ;;  %v1427_v0 = vor.u32 %v1426_v60, %v1423_v59 }
  0x81   : > { %2356 = vmatprep.subr.bf16.mxu1 %v2545_v6 }
  0x82   : > { %1276 = vmatmul.mubr.bf16.vlgmr.msra.gmra.mrb[8].mxu0 %v1043_v1 }
  0x83   : > { %2335 = vmatpush3.bf16.msra.mxu0 %v2546_v9  ;;  %1316 = vmatmul.mubr.bf16.vlgmr.msra.gmra.mrb[8].mxu1 %v1045_v7 }
  0x84   : > { %2357 = vmatpush3.bf16.msra.mxu1 %v2547_v10  ;;  %2336 = vmatprep.subr.bf16.mxu0 %v2548_v11 }
  0x85   : > { %2358 = vmatprep.subr.bf16.mxu1 %v2549_v12  ;;  %1664 = vmatprep.mubr.bf16.mxu0 %v1419_v61 }
  0x86   : > { %1704 = vmatprep.mubr.bf16.mxu1 %v1435_v62 }
  0x87   : > { %2337 = vmatpush3.bf16.msra.mxu0 %v2550_v13 }
  0x88   : > { %2359 = vmatpush3.bf16.msra.mxu1 %v2551_v14  ;;  %2338 = vmatprep.subr.bf16.mxu0 %v2552_v15 }
  0x89   : > { %2360 = vmatprep.subr.bf16.mxu1 %v2553_v16 }
  0x8b   : > { %2339 = vmatpush3.bf16.msra.mxu0 %v2554_v17 }
  0x8c   : > { %2361 = vmatpush3.bf16.msra.mxu1 %v2555_v18  ;;  %2340 = vmatprep.subr.bf16.mxu0 %v2556_v19 }
  0x8d   : > { %2362 = vmatprep.subr.bf16.mxu1 %v2557_v20 }
  0x8f   : > { %2341 = vmatpush3.bf16.msra.mxu0 %v2558_v21 }
  0x90   : > { %2363 = vmatpush3.bf16.msra.mxu1 %v2559_v22  ;;  %2342 = vmatprep.subr.bf16.mxu0 %v2560_v23 }
  0x91   : > { %2364 = vmatprep.subr.bf16.mxu1 %v2561_v24 }
  0x93   : > { %2343 = vmatpush3.bf16.msra.mxu0 %v2562_v25 }
  0x94   : > { %2365 = vmatpush3.bf16.msra.mxu1 %v2563_v26  ;;  %2344 = vmatprep.subr.bf16.mxu0 %v2564_v27 }
  0x95   : > { %2366 = vmatprep.subr.bf16.mxu1 %v2565_v28 }
  0x97   : > { %2345 = vmatpush3.bf16.msra.mxu0 %v2566_v29 }
  0x98   : > { %2367 = vmatpush3.bf16.msra.mxu1 %v2567_v30  ;;  %2346 = vmatprep.subr.bf16.mxu0 %v2568_v31 }
  0x99   : > { %2368 = vmatprep.subr.bf16.mxu1 %v2569_v32 }
  0x9b   : > { %2347 = vmatpush3.bf16.msra.mxu0 %v2570_v33 }
  0x9c   : > { %2369 = vmatpush3.bf16.msra.mxu1 %v2571_v34  ;;  %2348 = vmatprep.subr.bf16.mxu0 %v2572_v35 }
  0x9d   : > { %2370 = vmatprep.subr.bf16.mxu1 %v2573_v36 }
  0x9f   : > { %2349 = vmatpush3.bf16.msra.mxu0 %v2574_v37 }
  0xa0   : > { %2371 = vmatpush3.bf16.msra.mxu1 %v2575_v38 }
  0xa2   : > { %1665 = vmatmul.mubr.bf16.vlgmr.msra.gmra.mrb[12].mxu0 %v1411_v63 }
  0xa3   : > { %1705 = vmatmul.mubr.bf16.vlgmr.msra.gmra.mrb[12].mxu1 %v1427_v0 }
 0x115   : > { %v2218_v1 = vpop.f32.mrb[0].mxu0 }
 0x116   : > { %v2240_v2 = vpop.f32.mrb[0].mxu1  ;;  %v2219_v3 = vpop.f32.mrb[1].mxu0 }
 0x117   : > { %v2220_v4 = vadd.f32 %v2219_v3, %v2218_v1  ;;  %v2241_v5 = vpop.f32.mrb[1].mxu1  ;;  %v2221_v6 = vpop.f32.mrb[2].mxu0 }
 0x118   : > { %v2242_v7 = vadd.f32 %v2241_v5, %v2240_v2  ;;  %v2243_v8 = vpop.f32.mrb[2].mxu1  ;;  %v2222_v9 = vpop.f32.mrb[3].mxu0 }
 0x119   : > { %v2244_v10 = vpop.f32.mrb[3].mxu1 }
 0x11a   : > { %v672_v11 = vadd.f32 %v2242_v7, %v2220_v4 }
 0x135   : > { %v2262_v12 = vpop.f32.mrb[4].mxu0 }
 0x136   : > { %v2284_v13 = vpop.f32.mrb[4].mxu1  ;;  %v2263_v14 = vpop.f32.mrb[5].mxu0 }
 0x137   : > { %v2264_v15 = vadd.f32 %v2263_v14, %v2262_v12  ;;  %v2285_v16 = vpop.f32.mrb[5].mxu1  ;;  %v2265_v17 = vpop.f32.mrb[6].mxu0 }
 0x138   : > { %v2286_v18 = vadd.f32 %v2285_v16, %v2284_v13  ;;  %v2287_v19 = vpop.f32.mrb[6].mxu1  ;;  %v2266_v20 = vpop.f32.mrb[7].mxu0 }
 0x139   : > { %v918_v21 = vadd.f32 %v2264_v15, %v672_v11  ;;  %v2288_v22 = vpop.f32.mrb[7].mxu1 }
 0x13b   : > { %v958_v23 = vadd.f32 %v2286_v18, %v918_v21 }
 0x155   : > { %v2306_v24 = vpop.f32.mrb[8].mxu0 }
 0x156   : > { %v2307_v25 = vpop.f32.mrb[9].mxu0  ;;  %v2328_v28 = vpop.f32.mrb[8].mxu1 }
 0x157   : > { %v2308_v26 = vadd.f32 %v2307_v25, %v2306_v24  ;;  %v2309_v27 = vpop.f32.mrb[10].mxu0  ;;  %v2329_v30 = vpop.f32.mrb[9].mxu1 }
 0x158   : > { %v2310_v29 = vpop.f32.mrb[11].mxu0  ;;  %v2330_v31 = vadd.f32 %v2329_v30, %v2328_v28  ;;  %v2331_v32 = vpop.f32.mrb[10].mxu1 }
 0x159   : > { %v2332_v33 = vpop.f32.mrb[11].mxu1 }
 0x15a   : > { %v1318_v34 = vadd.f32 %v2330_v31, %v2308_v26 }
 0x15c   : > { %v1323_v35 = vadd.f32 %v1318_v34, %v958_v23 }
 0x175   : > { %v2350_v36 = vpop.f32.mrb[12].mxu0 }
 0x176   : > { %v2372_v37 = vpop.f32.mrb[12].mxu1  ;;  %v2351_v38 = vpop.f32.mrb[13].mxu0 }
 0x177   : > { %v2373_v39 = vpop.f32.mrb[13].mxu1  ;;  %v2352_v40 = vadd.f32 %v2351_v38, %v2350_v36  ;;  %v2353_v42 = vpop.f32.mrb[14].mxu0 }
 0x178   : > { %v2374_v41 = vadd.f32 %v2373_v39, %v2372_v37  ;;  %v2375_v43 = vpop.f32.mrb[14].mxu1  ;;  %v2354_v44 = vpop.f32.mrb[15].mxu0 }
 0x179   : > { %v2376_v45 = vpop.f32.mrb[15].mxu1 }
 0x17a   : > { %v1707_v46 = vadd.f32 %v2374_v41, %v2352_v40  ;;  %1719 = sbr.rel (%p2193_p10) target bundleno = 425 (0x1a9), region = 40 }
 0x17c   : > { %v1712_v48 = vadd.f32 %v1707_v46, %v1323_v35 }
 0x17e   : > { %v1714_v49 = vadd.f32 %v1713_v47, %v1712_v48 }
 0x180   : > { %1715 = vst [vmem:[#allocation2] sm:$0x3] %v1714_v49 }
 0x187   : > { %v1720_v50 = vld [vmem:[#allocation2] sm:$0x3] }
 0x188   : > { %v1728_v52 = vadd.f32 %v2194_v51, %v1720_v50 }
 0x18a   : > { %v1729_v53 = vsub.f32 0.0, %v1728_v52 }
 0x18c   : > { %v1730_v54 = vmul.f32 1.442695, %v1729_v53 }
 0x18e   : > { %2580 = vpow2.f32 %v1730_v54 }
 0x198   : > { %v2581_v55 = vpop.eup %2580 }
 0x199   : > { %v1732_v56 = vadd.f32 1.0, %v2581_v55 }
 0x19b   : > { %2582 = vrcp.f32 %v1732_v56 }
 0x1a5   : > { %v2583_v57 = vpop.eup %2582 }
 0x1a6   : > { %v1734_v58 = vpack.c.bf16 %v2583_v57, %v2583_v57 }
 0x1a8   : > { %1735 = vst [vmem:[%s216_s7] sm:$0x1] %v1734_v58 }
 0x1a9 PF: > { %s13_s18 = sadd.s32 1, %s2638_s18   ;;  %s2917_s12 = smov %s2626_s15 }
 0x1aa   : > { %p10_p11 = scmp.ge.s32.totalorder %s13_s18, 18   ;;  %s2918_s13 = smov %s2630_s16 }
 0x1ab   : > { %s2919_s14 = smov %s2634_s17  ;;  %s2920_s15 = smov %s2924_s19 }
 0x1ac   : > { %s2921_s16 = smov %s2928_s20  ;;  %s2922_s17 = smov %s2932_s21 }
 0x1ad   :  { %12 = sbr.rel (!%p10_p11) target bundleno = 4 (0x4), region = 74 }

</bundles_post_ra>
